<compile_context>
chip_gen: v7x
topology: tpu7x:2x2x1
jax: 0.10.0
libtpu: 0.0.40
codegen_flags: <defaults>
</compile_context>

<pallas_src>
import functools

import jax
import jax.numpy as jnp
from jax.experimental import pallas as pl
from jax.experimental.pallas import tpu as pltpu

_VMEM_LIMIT = 32 * 1024 * 1024  # explicit scoped-VMEM budget (safe on v5e/v6e/v7x)


def _round_up(x, m):
    return (x + m - 1) // m * m


# ----------------------------- Pallas kernels -----------------------------

def _matmul_kernel(a_ref, w_ref, o_ref):
    # bf16 x bf16 -> f32 accumulation on the MXU.
    o_ref[...] = jnp.dot(a_ref[...], w_ref[...],
                         preferred_element_type=jnp.float32)


def matmul_mxu(a, w, *, tm=512, tn=512):
    """(M, K) @ (K, N) in bf16 on the MXU, f32 output. Tiled over M and N."""
    M, K = a.shape
    K2, N = w.shape
    assert K == K2
    tm = min(tm, _round_up(M, 8))          # bounded tile, multiple of 8
    Mp = _round_up(M, tm)
    tn = min(tn, N)
    if N % tn != 0:
        tn = N                              # N is small (<= 1024) in this model
    if Mp != M:
        a = jnp.pad(a, ((0, Mp - M), (0, 0)))  # zero rows, sliced off below
    out = pl.pallas_call(
        _matmul_kernel,
        out_shape=jax.ShapeDtypeStruct((Mp, N), jnp.float32),
        grid=(Mp // tm, N // tn),
        in_specs=[
            pl.BlockSpec((tm, K), lambda i, j: (i, 0)),
            pl.BlockSpec((K, tn), lambda i, j: (0, j)),
        ],
        out_specs=pl.BlockSpec((tm, tn), lambda i, j: (i, j)),
        compiler_params=pltpu.CompilerParams(
            dimension_semantics=("parallel", "parallel"),
            vmem_limit_bytes=_VMEM_LIMIT),
    )(a.astype(jnp.bfloat16), w.astype(jnp.bfloat16))
    return out[:M] if Mp != M else out


def _bn_stats_kernel(x_ref, sum_ref, ssq_ref):
    @pl.when(pl.program_id(0) == 0)
    def _():
        sum_ref[...] = jnp.zeros_like(sum_ref)
        ssq_ref[...] = jnp.zeros_like(ssq_ref)
    x = x_ref[...]
    sum_ref[...] += jnp.sum(x, axis=0, keepdims=True)
    ssq_ref[...] += jnp.sum(x * x, axis=0, keepdims=True)


def bn_stats(x, *, tm=512):
    """Per-lane sum / sum-of-squares over rows of (M, N), tiled over M."""
    M, N = x.shape
    tm = min(tm, _round_up(M, 8))
    Mp = _round_up(M, tm)
    if Mp != M:
        x = jnp.pad(x, ((0, Mp - M), (0, 0)))  # zero rows do not change sums
    return pl.pallas_call(
        _bn_stats_kernel,
        out_shape=(jax.ShapeDtypeStruct((1, N), jnp.float32),
                   jax.ShapeDtypeStruct((1, N), jnp.float32)),
        grid=(Mp // tm,),
        in_specs=[pl.BlockSpec((tm, N), lambda i: (i, 0))],
        out_specs=(pl.BlockSpec((1, N), lambda i: (0, 0)),
                   pl.BlockSpec((1, N), lambda i: (0, 0))),
        compiler_params=pltpu.CompilerParams(
            dimension_semantics=("arbitrary",),
            vmem_limit_bytes=_VMEM_LIMIT),
    )(x)


def _scale_shift_act_kernel(x_ref, s_ref, b_ref, o_ref, *, activation):
    y = x_ref[...] * s_ref[...] + b_ref[...]       # f32 elementwise (v5e-safe)
    if activation == "relu":
        y = jnp.maximum(y, 0.0)
    elif activation == "sigmoid":
        y = jax.nn.sigmoid(y)
    o_ref[...] = y.astype(o_ref.dtype)


def scale_shift_act(x, scale, shift, activation="none", *, tm=512):
    """y = act(x * scale + shift), per-lane scale/shift, tiled over M."""
    M, N = x.shape
    tm = min(tm, _round_up(M, 8))
    Mp = _round_up(M, tm)
    if Mp != M:
        x = jnp.pad(x, ((0, Mp - M), (0, 0)))
    kernel = functools.partial(_scale_shift_act_kernel, activation=activation)
    out = pl.pallas_call(
        kernel,
        out_shape=jax.ShapeDtypeStruct((Mp, N), jnp.float32),
        grid=(Mp // tm,),
        in_specs=[pl.BlockSpec((tm, N), lambda i: (i, 0)),
                  pl.BlockSpec((1, N), lambda i: (0, 0)),
                  pl.BlockSpec((1, N), lambda i: (0, 0))],
        out_specs=pl.BlockSpec((tm, N), lambda i: (i, 0)),
        compiler_params=pltpu.CompilerParams(
            dimension_semantics=("parallel",),
            vmem_limit_bytes=_VMEM_LIMIT),
    )(x, scale.reshape(1, N).astype(jnp.float32),
      shift.reshape(1, N).astype(jnp.float32))
    return out[:M] if Mp != M else out


# --------------------------- ConvTranspose glue ----------------------------
# ConvTranspose2d:  out[oy, ox] += in[iy, ix] * W[ky, kx]  with
#   oy = iy*stride - padding + ky,  ox analogous.
# For stride=2, k=4, pad=1 we run one gemm producing all 16 tap products and
# then interleave the 4 output phases (col2im) with shifted adds in XLA.

def col2im_s2_k4_p1(y, B, H, W, Cout):
    """y: (B*H*W, 16*Cout), tap order (ky, kx, co). Returns (B, 2H, 2W, Cout)."""
    y = y.reshape(B, H, W, 4, 4, Cout)
    yp = jnp.pad(y, ((0, 0), (1, 1), (1, 1), (0, 0), (0, 0), (0, 0)))

    def tap(ky, kx, dy, dx):
        return yp[:, 1 + dy:1 + dy + H, 1 + dx:1 + dx + W, ky, kx, :]

    # output parity 0 (oy = 2q):   taps ky=3 @ iy=q-1, ky=1 @ iy=q
    # output parity 1 (oy = 2q+1): taps ky=2 @ iy=q,   ky=0 @ iy=q+1
    taps = {0: ((3, -1), (1, 0)), 1: ((2, 0), (0, 1))}
    rows = []
    for py in (0, 1):
        cols = []
        for px in (0, 1):
            acc = None
            for ky, dy in taps[py]:
                for kx, dx in taps[px]:
                    t = tap(ky, kx, dy, dx)
                    acc = t if acc is None else acc + t
            cols.append(acc)
        rows.append(jnp.stack(cols, axis=3))        # (B, H, W, 2, C)
    out = jnp.stack(rows, axis=2)                   # (B, H, 2, W, 2, C)
    return out.reshape(B, 2 * H, 2 * W, Cout)


def deconv_s2_k4_p1(h, weight):
    """ConvTranspose2d(k=4, stride=2, padding=1), no bias.  h: NHWC f32."""
    B, H, W, Cin = h.shape
    _, Cout, K, _ = weight.shape
    w_mat = jnp.transpose(weight, (0, 2, 3, 1)).reshape(Cin, K * K * Cout)
    y = matmul_mxu(h.reshape(B * H * W, Cin), w_mat)
    return col2im_s2_k4_p1(y, B, H, W, Cout)


def deconv1_1x1_k4(h, weight):
    """ConvTranspose2d(k=4, stride=1, padding=0) on a 1x1 spatial input."""
    B, H, W, Cin = h.shape
    # TODO(synk): general H,W > 1 for the first (stride-1) layer is not needed
    # for the DCGAN latent and is not implemented here.
    assert H == 1 and W == 1, "first deconv expects a 1x1 latent"
    _, Cout, K, _ = weight.shape
    w_mat = jnp.transpose(weight, (0, 2, 3, 1)).reshape(Cin, K * K * Cout)
    y = matmul_mxu(h.reshape(B, Cin), w_mat)
    return y.reshape(B, K, K, Cout)


# ----------------------------- BN / activations -----------------------------

def batchnorm_relu_nhwc(h, gamma, beta, eps=1e-5):
    """Train-mode BatchNorm2d (biased batch stats) + ReLU, lane-dense tiling."""
    B, H, W, C = h.shape
    x2d = h.reshape(B * H, W * C)                    # lane dim W*C >= 128
    s, ss = bn_stats(x2d)
    count = B * H * W
    sum_c = s.reshape(W, C).sum(axis=0)
    ssq_c = ss.reshape(W, C).sum(axis=0)
    mean = sum_c / count
    var = jnp.maximum(ssq_c / count - mean * mean, 0.0)
    scale_c = gamma * jax.lax.rsqrt(var + eps)
    shift_c = beta - mean * scale_c
    scale = jnp.tile(scale_c, W)                     # replicate over the W packing
    shift = jnp.tile(shift_c, W)
    y2d = scale_shift_act(x2d, scale, shift, activation="relu")
    return y2d.reshape(B, H, W, C)


def bias_sigmoid(h, bias):
    """Per-channel bias + sigmoid on NHWC, presented lane-dense to the kernel."""
    B, H, W, C = h.shape
    if C == 1:
        total = B * H * W
        lane = next((l for l in (512, 256, 128) if total % l == 0), W)
        x2d = h.reshape(total // lane, lane)
        shift = jnp.full((lane,), bias[0], jnp.float32)
    else:
        lane = W * C
        x2d = h.reshape(B * H, lane)
        shift = jnp.tile(bias.astype(jnp.float32), W)
    scale = jnp.ones((lane,), jnp.float32)
    y2d = scale_shift_act(x2d, scale, shift, activation="sigmoid")
    return y2d.reshape(B, H, W, C)


# ------------------------------- Generator ---------------------------------

def init_generator_params(key, input_dim, num_filters, output_dim):
    params = {"hidden": []}
    in_c = input_dim
    for nf in num_filters:
        key, kw, kb, kg, kbe = jax.random.split(key, 5)
        params["hidden"].append({
            "w": 0.02 * jax.random.normal(kw, (in_c, nf, 4, 4), jnp.float32),
            "b": 0.01 * jax.random.normal(kb, (nf,), jnp.float32),
            "gamma": 1.0 + 0.1 * jax.random.normal(kg, (nf,), jnp.float32),
            "beta": 0.1 * jax.random.normal(kbe, (nf,), jnp.float32),
        })
        in_c = nf
    key, kw, kb = jax.random.split(key, 3)
    params["out"] = {
        "w": 0.02 * jax.random.normal(kw, (in_c, output_dim, 4, 4), jnp.float32),
        "b": 0.1 * jax.random.normal(kb, (output_dim,), jnp.float32),
    }
    return params


def generator_forward(x, params):
    # Matches Generator.forward: accept (B, C) latent or (B, C, 1, 1) NCHW.
    if x.ndim == 2:
        x = x[:, :, None, None]
    assert x.ndim == 4, "WRONG INPUT DIMENSION"
    h = jnp.transpose(x, (0, 2, 3, 1)).astype(jnp.float32)   # -> NHWC

    for i, layer in enumerate(params["hidden"]):
        # Conv bias before train-mode BatchNorm is cancelled exactly by the
        # mean subtraction, so it is dropped (mathematically identical).
        if i == 0:
            h = deconv1_1x1_k4(h, layer["w"])
        else:
            h = deconv_s2_k4_p1(h, layer["w"])
        h = batchnorm_relu_nhwc(h, layer["gamma"], layer["beta"])

    h = deconv_s2_k4_p1(h, params["out"]["w"])
    out = bias_sigmoid(h, params["out"]["b"])
    return jnp.transpose(out, (0, 3, 1, 2))                  # -> NCHW


# --------------------------- pure-JAX reference ------------------------------
# Independent lowering (zero-dilate + flip-kernel im2col) used only to verify
# the Pallas path numerically.

def _ref_conv_transpose(x_nhwc, weight, bias, stride, padding):
    B, H, W, Cin = x_nhwc.shape
    _, Cout, K, _ = weight.shape
    if stride > 1:
        Hd, Wd = (H - 1) * stride + 1, (W - 1) * stride + 1
        xd = jnp.zeros((B, Hd, Wd, Cin), x_nhwc.dtype)
        xd = xd.at[:, ::stride, ::stride, :].set(x_nhwc)
    else:
        xd, Hd, Wd = x_nhwc, H, W
    pad = K - 1 - padding
    xp = jnp.pad(xd, ((0, 0), (pad, pad), (pad, pad), (0, 0)))
    OH, OW = Hd + 2 * pad - K + 1, Wd + 2 * pad - K + 1
    cols = [xp[:, kh:kh + OH, kw:kw + OW, :] for kh in range(K) for kw in range(K)]
    patches = jnp.concatenate(cols, axis=-1).reshape(B * OH * OW, K * K * Cin)
    w_flip = weight[:, :, ::-1, ::-1]
    w_mat = jnp.transpose(w_flip, (2, 3, 0, 1)).reshape(K * K * Cin, Cout)
    y = patches @ w_mat + bias
    return y.reshape(B, OH, OW, Cout)


def _ref_forward(x, params, eps=1e-5):
    if x.ndim == 2:
        x = x[:, :, None, None]
    h = jnp.transpose(x, (0, 2, 3, 1)).astype(jnp.float32)
    for i, layer in enumerate(params["hidden"]):
        stride, padding = (1, 0) if i == 0 else (2, 1)
        h = _ref_conv_transpose(h, layer["w"], layer["b"], stride, padding)
        mean = h.mean(axis=(0, 1, 2))
        var = ((h - mean) ** 2).mean(axis=(0, 1, 2))
        h = (h - mean) * jax.lax.rsqrt(var + eps) * layer["gamma"] + layer["beta"]
        h = jnp.maximum(h, 0.0)
    h = _ref_conv_transpose(h, params["out"]["w"], params["out"]["b"], 2, 1)
    h = jax.nn.sigmoid(h)
    return jnp.transpose(h, (0, 3, 1, 2))


# --------------------------------- main -------------------------------------

if __name__ == "__main__":
    # small, shape-consistent configuration
    input_dim = 32
    num_filters = [64, 32, 16, 16]
    output_dim = 1
    batch = 2

    key = jax.random.PRNGKey(0)
    k_param, k_x = jax.random.split(key)
    params = init_generator_params(k_param, input_dim, num_filters, output_dim)

    # 2-D latent input, exactly like the PyTorch module supports
    x = jax.random.normal(k_x, (batch, input_dim), jnp.float32)

    out = jax.jit(generator_forward)(x, params)
    out = jax.block_until_ready(out)

    # 1x1 -> 4 -> 8 -> 16 -> 32 -> 64 spatial upsampling
    assert out.shape == (batch, output_dim, 64, 64), out.shape
    assert bool(jnp.all(jnp.isfinite(out)))
    assert bool(jnp.all((out >= 0.0) & (out <= 1.0)))   # sigmoid range

    ref = jax.jit(_ref_forward)(x, params)
    max_err = float(jnp.max(jnp.abs(out - ref)))
    assert max_err < 2e-2, f"mismatch vs reference: {max_err}"

    print("KERNEL_OK")
</pallas_src>

<mosaic_0001>
module attributes {stable_mosaic.version = 11 : i64} {
  func.func @_matmul_kernel(%arg0: i32, %arg1: i32, %arg2: memref<8x32xbf16, #tpu.memory_space<vmem>>, %arg3: memref<32x512xbf16, #tpu.memory_space<vmem>>, %arg4: memref<8x512xf32, #tpu.memory_space<vmem>>) attributes {dimension_semantics = [#tpu.dimension_semantics<parallel>, #tpu.dimension_semantics<parallel>], iteration_bounds = array<i64: 1, 2>, scalar_prefetch = 0 : i64, scratch_operands = 0 : i64, tpu.core_type = #tpu.core_type<tc>, window_params = [{transform_indices = @transform_0, window_bounds = array<i64: 8, 32>}, {transform_indices = @transform_1, window_bounds = array<i64: 32, 512>}, {transform_indices = @transform_2, window_bounds = array<i64: 8, 512>}]} {
    %c0 = arith.constant 0 : index
    %c0_0 = arith.constant 0 : index
    %0 = vector.load %arg2[%c0, %c0_0] : memref<8x32xbf16, #tpu.memory_space<vmem>>, vector<8x32xbf16>
    %c0_1 = arith.constant 0 : index
    %c0_2 = arith.constant 0 : index
    %1 = vector.load %arg3[%c0_1, %c0_2] : memref<32x512xbf16, #tpu.memory_space<vmem>>, vector<32x512xbf16>
    %cst = arith.constant dense<0.000000e+00> : vector<8x512xf32>
    %2 = tpu.matmul %0, %1, %cst {dimension_numbers = #tpu.dot_dimension_numbers<[1], [0], [0], [1], [0, 0, 1, 1], [], []>} : vector<8x32xbf16>, vector<32x512xbf16>, vector<8x512xf32> -> vector<8x512xf32>
    %c0_3 = arith.constant 0 : index
    %c0_4 = arith.constant 0 : index
    %3 = vector.load %arg4[%c0_3, %c0_4] : memref<8x512xf32, #tpu.memory_space<vmem>>, vector<8x512xf32>
    tpu.vector_store %arg4[%c0_3, %c0_4], %2 {strides = array<i32>} : memref<8x512xf32, #tpu.memory_space<vmem>>, vector<8x512xf32>,
    return
  }
  func.func @transform_0(%arg0: i32, %arg1: i32) -> (i32, i32) {
    %c0_i32 = arith.constant 0 : i32
    %c0_i32_0 = arith.constant 0 : i32
    return %arg0, %c0_i32 : i32, i32
  }
  func.func @transform_1(%arg0: i32, %arg1: i32) -> (i32, i32) {
    %c0_i32 = arith.constant 0 : i32
    %c0_i32_0 = arith.constant 0 : i32
    return %c0_i32, %arg1 : i32, i32
  }
  func.func @transform_2(%arg0: i32, %arg1: i32) -> (i32, i32) {
    %c0_i32 = arith.constant 0 : i32
    return %arg0, %arg1 : i32, i32
  }
}

module attributes {stable_mosaic.version = 11 : i64} {
  func.func @_bn_stats_kernel(%arg0: i32, %arg1: memref<8x256xf32, #tpu.memory_space<vmem>>, %arg2: memref<1x256xf32, #tpu.memory_space<vmem>>, %arg3: memref<1x256xf32, #tpu.memory_space<vmem>>) attributes {dimension_semantics = [#tpu.dimension_semantics<arbitrary>], iteration_bounds = array<i64: 1>, scalar_prefetch = 0 : i64, scratch_operands = 0 : i64, tpu.core_type = #tpu.core_type<tc>, window_params = [{transform_indices = @transform_0, window_bounds = array<i64: 8, 256>}, {pipeline_mode = #tpu.pipeline_mode<synchronous>, transform_indices = @transform_1, window_bounds = array<i64: 1, 256>}, {pipeline_mode = #tpu.pipeline_mode<synchronous>, transform_indices = @transform_2, window_bounds = array<i64: 1, 256>}]} {
    %c0_i32 = arith.constant 0 : i32
    %0 = arith.cmpi eq, %arg0, %c0_i32 : i32
    %1 = arith.extui %0 : i1 to i32
    %c0_i32_0 = arith.constant 0 : i32
    %2 = arith.cmpi ne, %1, %c0_i32_0 : i32
    scf.if %2 {
      %cst_11 = arith.constant 0.000000e+00 : f32
      %15 = vector.broadcast %cst_11 : f32 to vector<1x256xf32>
      %c0_12 = arith.constant 0 : index
      %c0_13 = arith.constant 0 : index
      %16 = vector.load %arg2[%c0_12, %c0_13] : memref<1x256xf32, #tpu.memory_space<vmem>>, vector<1x256xf32>
      tpu.vector_store %arg2[%c0_12, %c0_13], %15 {strides = array<i32>} : memref<1x256xf32, #tpu.memory_space<vmem>>, vector<1x256xf32>,
      %cst_14 = arith.constant 0.000000e+00 : f32
      %17 = vector.broadcast %cst_14 : f32 to vector<1x256xf32>
      %c0_15 = arith.constant 0 : index
      %c0_16 = arith.constant 0 : index
      %18 = vector.load %arg3[%c0_15, %c0_16] : memref<1x256xf32, #tpu.memory_space<vmem>>, vector<1x256xf32>
      tpu.vector_store %arg3[%c0_15, %c0_16], %17 {strides = array<i32>} : memref<1x256xf32, #tpu.memory_space<vmem>>, vector<1x256xf32>,
    } else {
    }
    %c0 = arith.constant 0 : index
    %c0_1 = arith.constant 0 : index
    %3 = vector.load %arg1[%c0, %c0_1] : memref<8x256xf32, #tpu.memory_space<vmem>>, vector<8x256xf32>
    %c0_2 = arith.constant 0 : index
    %c0_3 = arith.constant 0 : index
    %4 = vector.load %arg2[%c0_2, %c0_3] : memref<1x256xf32, #tpu.memory_space<vmem>>, vector<1x256xf32>
    %cst = arith.constant dense<0.000000e+00> : vector<256xf32>
    %5 = vector.multi_reduction <add>, %3, %cst [0] : vector<8x256xf32> to vector<256xf32>
    %6 = vector.shape_cast %5 : vector<256xf32> to vector<1x256xf32>
    %7 = arith.addf %4, %6 : vector<1x256xf32>
    %c0_4 = arith.constant 0 : index
    %c0_5 = arith.constant 0 : index
    %8 = vector.load %arg2[%c0_4, %c0_5] : memref<1x256xf32, #tpu.memory_space<vmem>>, vector<1x256xf32>
    tpu.vector_store %arg2[%c0_4, %c0_5], %7 {strides = array<i32>} : memref<1x256xf32, #tpu.memory_space<vmem>>, vector<1x256xf32>,
    %c0_6 = arith.constant 0 : index
    %c0_7 = arith.constant 0 : index
    %9 = vector.load %arg3[%c0_6, %c0_7] : memref<1x256xf32, #tpu.memory_space<vmem>>, vector<1x256xf32>
    %10 = arith.mulf %3, %3 : vector<8x256xf32>
    %cst_8 = arith.constant dense<0.000000e+00> : vector<256xf32>
    %11 = vector.multi_reduction <add>, %10, %cst_8 [0] : vector<8x256xf32> to vector<256xf32>
    %12 = vector.shape_cast %11 : vector<256xf32> to vector<1x256xf32>
    %13 = arith.addf %9, %12 : vector<1x256xf32>
    %c0_9 = arith.constant 0 : index
    %c0_10 = arith.constant 0 : index
    %14 = vector.load %arg3[%c0_9, %c0_10] : memref<1x256xf32, #tpu.memory_space<vmem>>, vector<1x256xf32>
    tpu.vector_store %arg3[%c0_9, %c0_10], %13 {strides = array<i32>} : memref<1x256xf32, #tpu.memory_space<vmem>>, vector<1x256xf32>,
    return
  }
  func.func @transform_0(%arg0: i32) -> (i32, i32) {
    %c0_i32 = arith.constant 0 : i32
    %c0_i32_0 = arith.constant 0 : i32
    return %arg0, %c0_i32 : i32, i32
  }
  func.func @transform_1(%arg0: i32) -> (i32, i32) {
    %c0_i32 = arith.constant 0 : i32
    %c0_i32_0 = arith.constant 0 : i32
    %c0_i32_1 = arith.constant 0 : i32
    return %c0_i32, %c0_i32_0 : i32, i32
  }
  func.func @transform_2(%arg0: i32) -> (i32, i32) {
    %c0_i32 = arith.constant 0 : i32
    %c0_i32_0 = arith.constant 0 : i32
    %c0_i32_1 = arith.constant 0 : i32
    return %c0_i32, %c0_i32_0 : i32, i32
  }
}

module attributes {stable_mosaic.version = 11 : i64} {
  func.func @_scale_shift_act_kernel(%arg0: i32, %arg1: memref<8x256xf32, #tpu.memory_space<vmem>>, %arg2: memref<1x256xf32, #tpu.memory_space<vmem>>, %arg3: memref<1x256xf32, #tpu.memory_space<vmem>>, %arg4: memref<8x256xf32, #tpu.memory_space<vmem>>) attributes {dimension_semantics = [#tpu.dimension_semantics<parallel>], iteration_bounds = array<i64: 1>, scalar_prefetch = 0 : i64, scratch_operands = 0 : i64, tpu.core_type = #tpu.core_type<tc>, window_params = [{transform_indices = @transform_0, window_bounds = array<i64: 8, 256>}, {pipeline_mode = #tpu.pipeline_mode<synchronous>, transform_indices = @transform_1, window_bounds = array<i64: 1, 256>}, {pipeline_mode = #tpu.pipeline_mode<synchronous>, transform_indices = @transform_2, window_bounds = array<i64: 1, 256>}, {transform_indices = @transform_3, window_bounds = array<i64: 8, 256>}]} {
    %c0 = arith.constant 0 : index
    %c0_0 = arith.constant 0 : index
    %0 = vector.load %arg1[%c0, %c0_0] : memref<8x256xf32, #tpu.memory_space<vmem>>, vector<8x256xf32>
    %c0_1 = arith.constant 0 : index
    %c0_2 = arith.constant 0 : index
    %1 = vector.load %arg2[%c0_1, %c0_2] : memref<1x256xf32, #tpu.memory_space<vmem>>, vector<1x256xf32>
    %2 = vector.broadcast %1 : vector<1x256xf32> to vector<8x256xf32>
    %3 = arith.mulf %0, %2 : vector<8x256xf32>
    %c0_3 = arith.constant 0 : index
    %c0_4 = arith.constant 0 : index
    %4 = vector.load %arg3[%c0_3, %c0_4] : memref<1x256xf32, #tpu.memory_space<vmem>>, vector<1x256xf32>
    %5 = vector.broadcast %4 : vector<1x256xf32> to vector<8x256xf32>
    %6 = arith.addf %3, %5 : vector<8x256xf32>
    %cst = arith.constant 0.000000e+00 : f32
    %7 = vector.broadcast %cst : f32 to vector<8x256xf32>
    %8 = arith.maximumf %6, %7 : vector<8x256xf32>
    %c0_5 = arith.constant 0 : index
    %c0_6 = arith.constant 0 : index
    %9 = vector.load %arg4[%c0_5, %c0_6] : memref<8x256xf32, #tpu.memory_space<vmem>>, vector<8x256xf32>
    tpu.vector_store %arg4[%c0_5, %c0_6], %8 {strides = array<i32>} : memref<8x256xf32, #tpu.memory_space<vmem>>, vector<8x256xf32>,
    return
  }
  func.func @transform_0(%arg0: i32) -> (i32, i32) {
    %c0_i32 = arith.constant 0 : i32
    %c0_i32_0 = arith.constant 0 : i32
    return %arg0, %c0_i32 : i32, i32
  }
  func.func @transform_1(%arg0: i32) -> (i32, i32) {
    %c0_i32 = arith.constant 0 : i32
    %c0_i32_0 = arith.constant 0 : i32
    %c0_i32_1 = arith.constant 0 : i32
    return %c0_i32, %c0_i32_0 : i32, i32
  }
  func.func @transform_2(%arg0: i32) -> (i32, i32) {
    %c0_i32 = arith.constant 0 : i32
    %c0_i32_0 = arith.constant 0 : i32
    %c0_i32_1 = arith.constant 0 : i32
    return %c0_i32, %c0_i32_0 : i32, i32
  }
  func.func @transform_3(%arg0: i32) -> (i32, i32) {
    %c0_i32 = arith.constant 0 : i32
    %c0_i32_0 = arith.constant 0 : i32
    return %arg0, %c0_i32 : i32, i32
  }
}

module attributes {stable_mosaic.version = 11 : i64} {
  func.func @_matmul_kernel(%arg0: i32, %arg1: i32, %arg2: memref<32x64xbf16, #tpu.memory_space<vmem>>, %arg3: memref<64x512xbf16, #tpu.memory_space<vmem>>, %arg4: memref<32x512xf32, #tpu.memory_space<vmem>>) attributes {dimension_semantics = [#tpu.dimension_semantics<parallel>, #tpu.dimension_semantics<parallel>], iteration_bounds = array<i64: 1, 1>, scalar_prefetch = 0 : i64, scratch_operands = 0 : i64, tpu.core_type = #tpu.core_type<tc>, window_params = [{transform_indices = @transform_0, window_bounds = array<i64: 32, 64>}, {transform_indices = @transform_1, window_bounds = array<i64: 64, 512>}, {transform_indices = @transform_2, window_bounds = array<i64: 32, 512>}]} {
    %c0 = arith.constant 0 : index
    %c0_0 = arith.constant 0 : index
    %0 = vector.load %arg2[%c0, %c0_0] : memref<32x64xbf16, #tpu.memory_space<vmem>>, vector<32x64xbf16>
    %c0_1 = arith.constant 0 : index
    %c0_2 = arith.constant 0 : index
    %1 = vector.load %arg3[%c0_1, %c0_2] : memref<64x512xbf16, #tpu.memory_space<vmem>>, vector<64x512xbf16>
    %cst = arith.constant dense<0.000000e+00> : vector<32x512xf32>
    %2 = tpu.matmul %0, %1, %cst {dimension_numbers = #tpu.dot_dimension_numbers<[1], [0], [0], [1], [0, 0, 1, 1], [], []>} : vector<32x64xbf16>, vector<64x512xbf16>, vector<32x512xf32> -> vector<32x512xf32>
    %c0_3 = arith.constant 0 : index
    %c0_4 = arith.constant 0 : index
    %3 = vector.load %arg4[%c0_3, %c0_4] : memref<32x512xf32, #tpu.memory_space<vmem>>, vector<32x512xf32>
    tpu.vector_store %arg4[%c0_3, %c0_4], %2 {strides = array<i32>} : memref<32x512xf32, #tpu.memory_space<vmem>>, vector<32x512xf32>,
    return
  }
  func.func @transform_0(%arg0: i32, %arg1: i32) -> (i32, i32) {
    %c0_i32 = arith.constant 0 : i32
    %c0_i32_0 = arith.constant 0 : i32
    return %arg0, %c0_i32 : i32, i32
  }
  func.func @transform_1(%arg0: i32, %arg1: i32) -> (i32, i32) {
    %c0_i32 = arith.constant 0 : i32
    %c0_i32_0 = arith.constant 0 : i32
    return %c0_i32, %arg1 : i32, i32
  }
  func.func @transform_2(%arg0: i32, %arg1: i32) -> (i32, i32) {
    %c0_i32 = arith.constant 0 : i32
    return %arg0, %arg1 : i32, i32
  }
}

module attributes {stable_mosaic.version = 11 : i64} {
  func.func @_bn_stats_kernel(%arg0: i32, %arg1: memref<16x256xf32, #tpu.memory_space<vmem>>, %arg2: memref<1x256xf32, #tpu.memory_space<vmem>>, %arg3: memref<1x256xf32, #tpu.memory_space<vmem>>) attributes {dimension_semantics = [#tpu.dimension_semantics<arbitrary>], iteration_bounds = array<i64: 1>, scalar_prefetch = 0 : i64, scratch_operands = 0 : i64, tpu.core_type = #tpu.core_type<tc>, window_params = [{transform_indices = @transform_0, window_bounds = array<i64: 16, 256>}, {pipeline_mode = #tpu.pipeline_mode<synchronous>, transform_indices = @transform_1, window_bounds = array<i64: 1, 256>}, {pipeline_mode = #tpu.pipeline_mode<synchronous>, transform_indices = @transform_2, window_bounds = array<i64: 1, 256>}]} {
    %c0_i32 = arith.constant 0 : i32
    %0 = arith.cmpi eq, %arg0, %c0_i32 : i32
    %1 = arith.extui %0 : i1 to i32
    %c0_i32_0 = arith.constant 0 : i32
    %2 = arith.cmpi ne, %1, %c0_i32_0 : i32
    scf.if %2 {
      %cst_11 = arith.constant 0.000000e+00 : f32
      %15 = vector.broadcast %cst_11 : f32 to vector<1x256xf32>
      %c0_12 = arith.constant 0 : index
      %c0_13 = arith.constant 0 : index
      %16 = vector.load %arg2[%c0_12, %c0_13] : memref<1x256xf32, #tpu.memory_space<vmem>>, vector<1x256xf32>
      tpu.vector_store %arg2[%c0_12, %c0_13], %15 {strides = array<i32>} : memref<1x256xf32, #tpu.memory_space<vmem>>, vector<1x256xf32>,
      %cst_14 = arith.constant 0.000000e+00 : f32
      %17 = vector.broadcast %cst_14 : f32 to vector<1x256xf32>
      %c0_15 = arith.constant 0 : index
      %c0_16 = arith.constant 0 : index
      %18 = vector.load %arg3[%c0_15, %c0_16] : memref<1x256xf32, #tpu.memory_space<vmem>>, vector<1x256xf32>
      tpu.vector_store %arg3[%c0_15, %c0_16], %17 {strides = array<i32>} : memref<1x256xf32, #tpu.memory_space<vmem>>, vector<1x256xf32>,
    } else {
    }
    %c0 = arith.constant 0 : index
    %c0_1 = arith.constant 0 : index
    %3 = vector.load %arg1[%c0, %c0_1] : memref<16x256xf32, #tpu.memory_space<vmem>>, vector<16x256xf32>
    %c0_2 = arith.constant 0 : index
    %c0_3 = arith.constant 0 : index
    %4 = vector.load %arg2[%c0_2, %c0_3] : memref<1x256xf32, #tpu.memory_space<vmem>>, vector<1x256xf32>
    %cst = arith.constant dense<0.000000e+00> : vector<256xf32>
    %5 = vector.multi_reduction <add>, %3, %cst [0] : vector<16x256xf32> to vector<256xf32>
    %6 = vector.shape_cast %5 : vector<256xf32> to vector<1x256xf32>
    %7 = arith.addf %4, %6 : vector<1x256xf32>
    %c0_4 = arith.constant 0 : index
    %c0_5 = arith.constant 0 : index
    %8 = vector.load %arg2[%c0_4, %c0_5] : memref<1x256xf32, #tpu.memory_space<vmem>>, vector<1x256xf32>
    tpu.vector_store %arg2[%c0_4, %c0_5], %7 {strides = array<i32>} : memref<1x256xf32, #tpu.memory_space<vmem>>, vector<1x256xf32>,
    %c0_6 = arith.constant 0 : index
    %c0_7 = arith.constant 0 : index
    %9 = vector.load %arg3[%c0_6, %c0_7] : memref<1x256xf32, #tpu.memory_space<vmem>>, vector<1x256xf32>
    %10 = arith.mulf %3, %3 : vector<16x256xf32>
    %cst_8 = arith.constant dense<0.000000e+00> : vector<256xf32>
    %11 = vector.multi_reduction <add>, %10, %cst_8 [0] : vector<16x256xf32> to vector<256xf32>
    %12 = vector.shape_cast %11 : vector<256xf32> to vector<1x256xf32>
    %13 = arith.addf %9, %12 : vector<1x256xf32>
    %c0_9 = arith.constant 0 : index
    %c0_10 = arith.constant 0 : index
    %14 = vector.load %arg3[%c0_9, %c0_10] : memref<1x256xf32, #tpu.memory_space<vmem>>, vector<1x256xf32>
    tpu.vector_store %arg3[%c0_9, %c0_10], %13 {strides = array<i32>} : memref<1x256xf32, #tpu.memory_space<vmem>>, vector<1x256xf32>,
    return
  }
  func.func @transform_0(%arg0: i32) -> (i32, i32) {
    %c0_i32 = arith.constant 0 : i32
    %c0_i32_0 = arith.constant 0 : i32
    return %arg0, %c0_i32 : i32, i32
  }
  func.func @transform_1(%arg0: i32) -> (i32, i32) {
    %c0_i32 = arith.constant 0 : i32
    %c0_i32_0 = arith.constant 0 : i32
    %c0_i32_1 = arith.constant 0 : i32
    return %c0_i32, %c0_i32_0 : i32, i32
  }
  func.func @transform_2(%arg0: i32) -> (i32, i32) {
    %c0_i32 = arith.constant 0 : i32
    %c0_i32_0 = arith.constant 0 : i32
    %c0_i32_1 = arith.constant 0 : i32
    return %c0_i32, %c0_i32_0 : i32, i32
  }
}

module attributes {stable_mosaic.version = 11 : i64} {
  func.func @_scale_shift_act_kernel(%arg0: i32, %arg1: memref<16x256xf32, #tpu.memory_space<vmem>>, %arg2: memref<1x256xf32, #tpu.memory_space<vmem>>, %arg3: memref<1x256xf32, #tpu.memory_space<vmem>>, %arg4: memref<16x256xf32, #tpu.memory_space<vmem>>) attributes {dimension_semantics = [#tpu.dimension_semantics<parallel>], iteration_bounds = array<i64: 1>, scalar_prefetch = 0 : i64, scratch_operands = 0 : i64, tpu.core_type = #tpu.core_type<tc>, window_params = [{transform_indices = @transform_0, window_bounds = array<i64: 16, 256>}, {pipeline_mode = #tpu.pipeline_mode<synchronous>, transform_indices = @transform_1, window_bounds = array<i64: 1, 256>}, {pipeline_mode = #tpu.pipeline_mode<synchronous>, transform_indices = @transform_2, window_bounds = array<i64: 1, 256>}, {transform_indices = @transform_3, window_bounds = array<i64: 16, 256>}]} {
    %c0 = arith.constant 0 : index
    %c0_0 = arith.constant 0 : index
    %0 = vector.load %arg1[%c0, %c0_0] : memref<16x256xf32, #tpu.memory_space<vmem>>, vector<16x256xf32>
    %c0_1 = arith.constant 0 : index
    %c0_2 = arith.constant 0 : index
    %1 = vector.load %arg2[%c0_1, %c0_2] : memref<1x256xf32, #tpu.memory_space<vmem>>, vector<1x256xf32>
    %2 = vector.broadcast %1 : vector<1x256xf32> to vector<16x256xf32>
    %3 = arith.mulf %0, %2 : vector<16x256xf32>
    %c0_3 = arith.constant 0 : index
    %c0_4 = arith.constant 0 : index
    %4 = vector.load %arg3[%c0_3, %c0_4] : memref<1x256xf32, #tpu.memory_space<vmem>>, vector<1x256xf32>
    %5 = vector.broadcast %4 : vector<1x256xf32> to vector<16x256xf32>
    %6 = arith.addf %3, %5 : vector<16x256xf32>
    %cst = arith.constant 0.000000e+00 : f32
    %7 = vector.broadcast %cst : f32 to vector<16x256xf32>
    %8 = arith.maximumf %6, %7 : vector<16x256xf32>
    %c0_5 = arith.constant 0 : index
    %c0_6 = arith.constant 0 : index
    %9 = vector.load %arg4[%c0_5, %c0_6] : memref<16x256xf32, #tpu.memory_space<vmem>>, vector<16x256xf32>
    tpu.vector_store %arg4[%c0_5, %c0_6], %8 {strides = array<i32>} : memref<16x256xf32, #tpu.memory_space<vmem>>, vector<16x256xf32>,
    return
  }
  func.func @transform_0(%arg0: i32) -> (i32, i32) {
    %c0_i32 = arith.constant 0 : i32
    %c0_i32_0 = arith.constant 0 : i32
    return %arg0, %c0_i32 : i32, i32
  }
  func.func @transform_1(%arg0: i32) -> (i32, i32) {
    %c0_i32 = arith.constant 0 : i32
    %c0_i32_0 = arith.constant 0 : i32
    %c0_i32_1 = arith.constant 0 : i32
    return %c0_i32, %c0_i32_0 : i32, i32
  }
  func.func @transform_2(%arg0: i32) -> (i32, i32) {
    %c0_i32 = arith.constant 0 : i32
    %c0_i32_0 = arith.constant 0 : i32
    %c0_i32_1 = arith.constant 0 : i32
    return %c0_i32, %c0_i32_0 : i32, i32
  }
  func.func @transform_3(%arg0: i32) -> (i32, i32) {
    %c0_i32 = arith.constant 0 : i32
    %c0_i32_0 = arith.constant 0 : i32
    return %arg0, %c0_i32 : i32, i32
  }
}

module attributes {stable_mosaic.version = 11 : i64} {
  func.func @_matmul_kernel(%arg0: i32, %arg1: i32, %arg2: memref<128x32xbf16, #tpu.memory_space<vmem>>, %arg3: memref<32x256xbf16, #tpu.memory_space<vmem>>, %arg4: memref<128x256xf32, #tpu.memory_space<vmem>>) attributes {dimension_semantics = [#tpu.dimension_semantics<parallel>, #tpu.dimension_semantics<parallel>], iteration_bounds = array<i64: 1, 1>, scalar_prefetch = 0 : i64, scratch_operands = 0 : i64, tpu.core_type = #tpu.core_type<tc>, window_params = [{transform_indices = @transform_0, window_bounds = array<i64: 128, 32>}, {transform_indices = @transform_1, window_bounds = array<i64: 32, 256>}, {transform_indices = @transform_2, window_bounds = array<i64: 128, 256>}]} {
    %c0 = arith.constant 0 : index
    %c0_0 = arith.constant 0 : index
    %0 = vector.load %arg2[%c0, %c0_0] : memref<128x32xbf16, #tpu.memory_space<vmem>>, vector<128x32xbf16>
    %c0_1 = arith.constant 0 : index
    %c0_2 = arith.constant 0 : index
    %1 = vector.load %arg3[%c0_1, %c0_2] : memref<32x256xbf16, #tpu.memory_space<vmem>>, vector<32x256xbf16>
    %cst = arith.constant dense<0.000000e+00> : vector<128x256xf32>
    %2 = tpu.matmul %0, %1, %cst {dimension_numbers = #tpu.dot_dimension_numbers<[1], [0], [0], [1], [0, 0, 1, 1], [], []>} : vector<128x32xbf16>, vector<32x256xbf16>, vector<128x256xf32> -> vector<128x256xf32>
    %c0_3 = arith.constant 0 : index
    %c0_4 = arith.constant 0 : index
    %3 = vector.load %arg4[%c0_3, %c0_4] : memref<128x256xf32, #tpu.memory_space<vmem>>, vector<128x256xf32>
    tpu.vector_store %arg4[%c0_3, %c0_4], %2 {strides = array<i32>} : memref<128x256xf32, #tpu.memory_space<vmem>>, vector<128x256xf32>,
    return
  }
  func.func @transform_0(%arg0: i32, %arg1: i32) -> (i32, i32) {
    %c0_i32 = arith.constant 0 : i32
    %c0_i32_0 = arith.constant 0 : i32
    return %arg0, %c0_i32 : i32, i32
  }
  func.func @transform_1(%arg0: i32, %arg1: i32) -> (i32, i32) {
    %c0_i32 = arith.constant 0 : i32
    %c0_i32_0 = arith.constant 0 : i32
    return %c0_i32, %arg1 : i32, i32
  }
  func.func @transform_2(%arg0: i32, %arg1: i32) -> (i32, i32) {
    %c0_i32 = arith.constant 0 : i32
    return %arg0, %arg1 : i32, i32
  }
}

module attributes {stable_mosaic.version = 11 : i64} {
  func.func @_bn_stats_kernel(%arg0: i32, %arg1: memref<32x256xf32, #tpu.memory_space<vmem>>, %arg2: memref<1x256xf32, #tpu.memory_space<vmem>>, %arg3: memref<1x256xf32, #tpu.memory_space<vmem>>) attributes {dimension_semantics = [#tpu.dimension_semantics<arbitrary>], iteration_bounds = array<i64: 1>, scalar_prefetch = 0 : i64, scratch_operands = 0 : i64, tpu.core_type = #tpu.core_type<tc>, window_params = [{transform_indices = @transform_0, window_bounds = array<i64: 32, 256>}, {pipeline_mode = #tpu.pipeline_mode<synchronous>, transform_indices = @transform_1, window_bounds = array<i64: 1, 256>}, {pipeline_mode = #tpu.pipeline_mode<synchronous>, transform_indices = @transform_2, window_bounds = array<i64: 1, 256>}]} {
    %c0_i32 = arith.constant 0 : i32
    %0 = arith.cmpi eq, %arg0, %c0_i32 : i32
    %1 = arith.extui %0 : i1 to i32
    %c0_i32_0 = arith.constant 0 : i32
    %2 = arith.cmpi ne, %1, %c0_i32_0 : i32
    scf.if %2 {
      %cst_11 = arith.constant 0.000000e+00 : f32
      %15 = vector.broadcast %cst_11 : f32 to vector<1x256xf32>
      %c0_12 = arith.constant 0 : index
      %c0_13 = arith.constant 0 : index
      %16 = vector.load %arg2[%c0_12, %c0_13] : memref<1x256xf32, #tpu.memory_space<vmem>>, vector<1x256xf32>
      tpu.vector_store %arg2[%c0_12, %c0_13], %15 {strides = array<i32>} : memref<1x256xf32, #tpu.memory_space<vmem>>, vector<1x256xf32>,
      %cst_14 = arith.constant 0.000000e+00 : f32
      %17 = vector.broadcast %cst_14 : f32 to vector<1x256xf32>
      %c0_15 = arith.constant 0 : index
      %c0_16 = arith.constant 0 : index
      %18 = vector.load %arg3[%c0_15, %c0_16] : memref<1x256xf32, #tpu.memory_space<vmem>>, vector<1x256xf32>
      tpu.vector_store %arg3[%c0_15, %c0_16], %17 {strides = array<i32>} : memref<1x256xf32, #tpu.memory_space<vmem>>, vector<1x256xf32>,
    } else {
    }
    %c0 = arith.constant 0 : index
    %c0_1 = arith.constant 0 : index
    %3 = vector.load %arg1[%c0, %c0_1] : memref<32x256xf32, #tpu.memory_space<vmem>>, vector<32x256xf32>
    %c0_2 = arith.constant 0 : index
    %c0_3 = arith.constant 0 : index
    %4 = vector.load %arg2[%c0_2, %c0_3] : memref<1x256xf32, #tpu.memory_space<vmem>>, vector<1x256xf32>
    %cst = arith.constant dense<0.000000e+00> : vector<256xf32>
    %5 = vector.multi_reduction <add>, %3, %cst [0] : vector<32x256xf32> to vector<256xf32>
    %6 = vector.shape_cast %5 : vector<256xf32> to vector<1x256xf32>
    %7 = arith.addf %4, %6 : vector<1x256xf32>
    %c0_4 = arith.constant 0 : index
    %c0_5 = arith.constant 0 : index
    %8 = vector.load %arg2[%c0_4, %c0_5] : memref<1x256xf32, #tpu.memory_space<vmem>>, vector<1x256xf32>
    tpu.vector_store %arg2[%c0_4, %c0_5], %7 {strides = array<i32>} : memref<1x256xf32, #tpu.memory_space<vmem>>, vector<1x256xf32>,
    %c0_6 = arith.constant 0 : index
    %c0_7 = arith.constant 0 : index
    %9 = vector.load %arg3[%c0_6, %c0_7] : memref<1x256xf32, #tpu.memory_space<vmem>>, vector<1x256xf32>
    %10 = arith.mulf %3, %3 : vector<32x256xf32>
    %cst_8 = arith.constant dense<0.000000e+00> : vector<256xf32>
    %11 = vector.multi_reduction <add>, %10, %cst_8 [0] : vector<32x256xf32> to vector<256xf32>
    %12 = vector.shape_cast %11 : vector<256xf32> to vector<1x256xf32>
    %13 = arith.addf %9, %12 : vector<1x256xf32>
    %c0_9 = arith.constant 0 : index
    %c0_10 = arith.constant 0 : index
    %14 = vector.load %arg3[%c0_9, %c0_10] : memref<1x256xf32, #tpu.memory_space<vmem>>, vector<1x256xf32>
    tpu.vector_store %arg3[%c0_9, %c0_10], %13 {strides = array<i32>} : memref<1x256xf32, #tpu.memory_space<vmem>>, vector<1x256xf32>,
    return
  }
  func.func @transform_0(%arg0: i32) -> (i32, i32) {
    %c0_i32 = arith.constant 0 : i32
    %c0_i32_0 = arith.constant 0 : i32
    return %arg0, %c0_i32 : i32, i32
  }
  func.func @transform_1(%arg0: i32) -> (i32, i32) {
    %c0_i32 = arith.constant 0 : i32
    %c0_i32_0 = arith.constant 0 : i32
    %c0_i32_1 = arith.constant 0 : i32
    return %c0_i32, %c0_i32_0 : i32, i32
  }
  func.func @transform_2(%arg0: i32) -> (i32, i32) {
    %c0_i32 = arith.constant 0 : i32
    %c0_i32_0 = arith.constant 0 : i32
    %c0_i32_1 = arith.constant 0 : i32
    return %c0_i32, %c0_i32_0 : i32, i32
  }
}

module attributes {stable_mosaic.version = 11 : i64} {
  func.func @_scale_shift_act_kernel(%arg0: i32, %arg1: memref<32x256xf32, #tpu.memory_space<vmem>>, %arg2: memref<1x256xf32, #tpu.memory_space<vmem>>, %arg3: memref<1x256xf32, #tpu.memory_space<vmem>>, %arg4: memref<32x256xf32, #tpu.memory_space<vmem>>) attributes {dimension_semantics = [#tpu.dimension_semantics<parallel>], iteration_bounds = array<i64: 1>, scalar_prefetch = 0 : i64, scratch_operands = 0 : i64, tpu.core_type = #tpu.core_type<tc>, window_params = [{transform_indices = @transform_0, window_bounds = array<i64: 32, 256>}, {pipeline_mode = #tpu.pipeline_mode<synchronous>, transform_indices = @transform_1, window_bounds = array<i64: 1, 256>}, {pipeline_mode = #tpu.pipeline_mode<synchronous>, transform_indices = @transform_2, window_bounds = array<i64: 1, 256>}, {transform_indices = @transform_3, window_bounds = array<i64: 32, 256>}]} {
    %c0 = arith.constant 0 : index
    %c0_0 = arith.constant 0 : index
    %0 = vector.load %arg1[%c0, %c0_0] : memref<32x256xf32, #tpu.memory_space<vmem>>, vector<32x256xf32>
    %c0_1 = arith.constant 0 : index
    %c0_2 = arith.constant 0 : index
    %1 = vector.load %arg2[%c0_1, %c0_2] : memref<1x256xf32, #tpu.memory_space<vmem>>, vector<1x256xf32>
    %2 = vector.broadcast %1 : vector<1x256xf32> to vector<32x256xf32>
    %3 = arith.mulf %0, %2 : vector<32x256xf32>
    %c0_3 = arith.constant 0 : index
    %c0_4 = arith.constant 0 : index
    %4 = vector.load %arg3[%c0_3, %c0_4] : memref<1x256xf32, #tpu.memory_space<vmem>>, vector<1x256xf32>
    %5 = vector.broadcast %4 : vector<1x256xf32> to vector<32x256xf32>
    %6 = arith.addf %3, %5 : vector<32x256xf32>
    %cst = arith.constant 0.000000e+00 : f32
    %7 = vector.broadcast %cst : f32 to vector<32x256xf32>
    %8 = arith.maximumf %6, %7 : vector<32x256xf32>
    %c0_5 = arith.constant 0 : index
    %c0_6 = arith.constant 0 : index
    %9 = vector.load %arg4[%c0_5, %c0_6] : memref<32x256xf32, #tpu.memory_space<vmem>>, vector<32x256xf32>
    tpu.vector_store %arg4[%c0_5, %c0_6], %8 {strides = array<i32>} : memref<32x256xf32, #tpu.memory_space<vmem>>, vector<32x256xf32>,
    return
  }
  func.func @transform_0(%arg0: i32) -> (i32, i32) {
    %c0_i32 = arith.constant 0 : i32
    %c0_i32_0 = arith.constant 0 : i32
    return %arg0, %c0_i32 : i32, i32
  }
  func.func @transform_1(%arg0: i32) -> (i32, i32) {
    %c0_i32 = arith.constant 0 : i32
    %c0_i32_0 = arith.constant 0 : i32
    %c0_i32_1 = arith.constant 0 : i32
    return %c0_i32, %c0_i32_0 : i32, i32
  }
  func.func @transform_2(%arg0: i32) -> (i32, i32) {
    %c0_i32 = arith.constant 0 : i32
    %c0_i32_0 = arith.constant 0 : i32
    %c0_i32_1 = arith.constant 0 : i32
    return %c0_i32, %c0_i32_0 : i32, i32
  }
  func.func @transform_3(%arg0: i32) -> (i32, i32) {
    %c0_i32 = arith.constant 0 : i32
    %c0_i32_0 = arith.constant 0 : i32
    return %arg0, %c0_i32 : i32, i32
  }
}

module attributes {stable_mosaic.version = 11 : i64} {
  func.func @_matmul_kernel(%arg0: i32, %arg1: i32, %arg2: memref<512x16xbf16, #tpu.memory_space<vmem>>, %arg3: memref<16x256xbf16, #tpu.memory_space<vmem>>, %arg4: memref<512x256xf32, #tpu.memory_space<vmem>>) attributes {dimension_semantics = [#tpu.dimension_semantics<parallel>, #tpu.dimension_semantics<parallel>], iteration_bounds = array<i64: 1, 1>, scalar_prefetch = 0 : i64, scratch_operands = 0 : i64, tpu.core_type = #tpu.core_type<tc>, window_params = [{transform_indices = @transform_0, window_bounds = array<i64: 512, 16>}, {transform_indices = @transform_1, window_bounds = array<i64: 16, 256>}, {transform_indices = @transform_2, window_bounds = array<i64: 512, 256>}]} {
    %c0 = arith.constant 0 : index
    %c0_0 = arith.constant 0 : index
    %0 = vector.load %arg2[%c0, %c0_0] : memref<512x16xbf16, #tpu.memory_space<vmem>>, vector<512x16xbf16>
    %c0_1 = arith.constant 0 : index
    %c0_2 = arith.constant 0 : index
    %1 = vector.load %arg3[%c0_1, %c0_2] : memref<16x256xbf16, #tpu.memory_space<vmem>>, vector<16x256xbf16>
    %cst = arith.constant dense<0.000000e+00> : vector<512x256xf32>
    %2 = tpu.matmul %0, %1, %cst {dimension_numbers = #tpu.dot_dimension_numbers<[1], [0], [0], [1], [0, 0, 1, 1], [], []>} : vector<512x16xbf16>, vector<16x256xbf16>, vector<512x256xf32> -> vector<512x256xf32>
    %c0_3 = arith.constant 0 : index
    %c0_4 = arith.constant 0 : index
    %3 = vector.load %arg4[%c0_3, %c0_4] : memref<512x256xf32, #tpu.memory_space<vmem>>, vector<512x256xf32>
    tpu.vector_store %arg4[%c0_3, %c0_4], %2 {strides = array<i32>} : memref<512x256xf32, #tpu.memory_space<vmem>>, vector<512x256xf32>,
    return
  }
  func.func @transform_0(%arg0: i32, %arg1: i32) -> (i32, i32) {
    %c0_i32 = arith.constant 0 : i32
    %c0_i32_0 = arith.constant 0 : i32
    return %arg0, %c0_i32 : i32, i32
  }
  func.func @transform_1(%arg0: i32, %arg1: i32) -> (i32, i32) {
    %c0_i32 = arith.constant 0 : i32
    %c0_i32_0 = arith.constant 0 : i32
    return %c0_i32, %arg1 : i32, i32
  }
  func.func @transform_2(%arg0: i32, %arg1: i32) -> (i32, i32) {
    %c0_i32 = arith.constant 0 : i32
    return %arg0, %arg1 : i32, i32
  }
}

module attributes {stable_mosaic.version = 11 : i64} {
  func.func @_bn_stats_kernel(%arg0: i32, %arg1: memref<64x512xf32, #tpu.memory_space<vmem>>, %arg2: memref<1x512xf32, #tpu.memory_space<vmem>>, %arg3: memref<1x512xf32, #tpu.memory_space<vmem>>) attributes {dimension_semantics = [#tpu.dimension_semantics<arbitrary>], iteration_bounds = array<i64: 1>, scalar_prefetch = 0 : i64, scratch_operands = 0 : i64, tpu.core_type = #tpu.core_type<tc>, window_params = [{transform_indices = @transform_0, window_bounds = array<i64: 64, 512>}, {pipeline_mode = #tpu.pipeline_mode<synchronous>, transform_indices = @transform_1, window_bounds = array<i64: 1, 512>}, {pipeline_mode = #tpu.pipeline_mode<synchronous>, transform_indices = @transform_2, window_bounds = array<i64: 1, 512>}]} {
    %c0_i32 = arith.constant 0 : i32
    %0 = arith.cmpi eq, %arg0, %c0_i32 : i32
    %1 = arith.extui %0 : i1 to i32
    %c0_i32_0 = arith.constant 0 : i32
    %2 = arith.cmpi ne, %1, %c0_i32_0 : i32
    scf.if %2 {
      %cst_11 = arith.constant 0.000000e+00 : f32
      %15 = vector.broadcast %cst_11 : f32 to vector<1x512xf32>
      %c0_12 = arith.constant 0 : index
      %c0_13 = arith.constant 0 : index
      %16 = vector.load %arg2[%c0_12, %c0_13] : memref<1x512xf32, #tpu.memory_space<vmem>>, vector<1x512xf32>
      tpu.vector_store %arg2[%c0_12, %c0_13], %15 {strides = array<i32>} : memref<1x512xf32, #tpu.memory_space<vmem>>, vector<1x512xf32>,
      %cst_14 = arith.constant 0.000000e+00 : f32
      %17 = vector.broadcast %cst_14 : f32 to vector<1x512xf32>
      %c0_15 = arith.constant 0 : index
      %c0_16 = arith.constant 0 : index
      %18 = vector.load %arg3[%c0_15, %c0_16] : memref<1x512xf32, #tpu.memory_space<vmem>>, vector<1x512xf32>
      tpu.vector_store %arg3[%c0_15, %c0_16], %17 {strides = array<i32>} : memref<1x512xf32, #tpu.memory_space<vmem>>, vector<1x512xf32>,
    } else {
    }
    %c0 = arith.constant 0 : index
    %c0_1 = arith.constant 0 : index
    %3 = vector.load %arg1[%c0, %c0_1] : memref<64x512xf32, #tpu.memory_space<vmem>>, vector<64x512xf32>
    %c0_2 = arith.constant 0 : index
    %c0_3 = arith.constant 0 : index
    %4 = vector.load %arg2[%c0_2, %c0_3] : memref<1x512xf32, #tpu.memory_space<vmem>>, vector<1x512xf32>
    %cst = arith.constant dense<0.000000e+00> : vector<512xf32>
    %5 = vector.multi_reduction <add>, %3, %cst [0] : vector<64x512xf32> to vector<512xf32>
    %6 = vector.shape_cast %5 : vector<512xf32> to vector<1x512xf32>
    %7 = arith.addf %4, %6 : vector<1x512xf32>
    %c0_4 = arith.constant 0 : index
    %c0_5 = arith.constant 0 : index
    %8 = vector.load %arg2[%c0_4, %c0_5] : memref<1x512xf32, #tpu.memory_space<vmem>>, vector<1x512xf32>
    tpu.vector_store %arg2[%c0_4, %c0_5], %7 {strides = array<i32>} : memref<1x512xf32, #tpu.memory_space<vmem>>, vector<1x512xf32>,
    %c0_6 = arith.constant 0 : index
    %c0_7 = arith.constant 0 : index
    %9 = vector.load %arg3[%c0_6, %c0_7] : memref<1x512xf32, #tpu.memory_space<vmem>>, vector<1x512xf32>
    %10 = arith.mulf %3, %3 : vector<64x512xf32>
    %cst_8 = arith.constant dense<0.000000e+00> : vector<512xf32>
    %11 = vector.multi_reduction <add>, %10, %cst_8 [0] : vector<64x512xf32> to vector<512xf32>
    %12 = vector.shape_cast %11 : vector<512xf32> to vector<1x512xf32>
    %13 = arith.addf %9, %12 : vector<1x512xf32>
    %c0_9 = arith.constant 0 : index
    %c0_10 = arith.constant 0 : index
    %14 = vector.load %arg3[%c0_9, %c0_10] : memref<1x512xf32, #tpu.memory_space<vmem>>, vector<1x512xf32>
    tpu.vector_store %arg3[%c0_9, %c0_10], %13 {strides = array<i32>} : memref<1x512xf32, #tpu.memory_space<vmem>>, vector<1x512xf32>,
    return
  }
  func.func @transform_0(%arg0: i32) -> (i32, i32) {
    %c0_i32 = arith.constant 0 : i32
    %c0_i32_0 = arith.constant 0 : i32
    return %arg0, %c0_i32 : i32, i32
  }
  func.func @transform_1(%arg0: i32) -> (i32, i32) {
    %c0_i32 = arith.constant 0 : i32
    %c0_i32_0 = arith.constant 0 : i32
    %c0_i32_1 = arith.constant 0 : i32
    return %c0_i32, %c0_i32_0 : i32, i32
  }
  func.func @transform_2(%arg0: i32) -> (i32, i32) {
    %c0_i32 = arith.constant 0 : i32
    %c0_i32_0 = arith.constant 0 : i32
    %c0_i32_1 = arith.constant 0 : i32
    return %c0_i32, %c0_i32_0 : i32, i32
  }
}

module attributes {stable_mosaic.version = 11 : i64} {
  func.func @_scale_shift_act_kernel(%arg0: i32, %arg1: memref<64x512xf32, #tpu.memory_space<vmem>>, %arg2: memref<1x512xf32, #tpu.memory_space<vmem>>, %arg3: memref<1x512xf32, #tpu.memory_space<vmem>>, %arg4: memref<64x512xf32, #tpu.memory_space<vmem>>) attributes {dimension_semantics = [#tpu.dimension_semantics<parallel>], iteration_bounds = array<i64: 1>, scalar_prefetch = 0 : i64, scratch_operands = 0 : i64, tpu.core_type = #tpu.core_type<tc>, window_params = [{transform_indices = @transform_0, window_bounds = array<i64: 64, 512>}, {pipeline_mode = #tpu.pipeline_mode<synchronous>, transform_indices = @transform_1, window_bounds = array<i64: 1, 512>}, {pipeline_mode = #tpu.pipeline_mode<synchronous>, transform_indices = @transform_2, window_bounds = array<i64: 1, 512>}, {transform_indices = @transform_3, window_bounds = array<i64: 64, 512>}]} {
    %c0 = arith.constant 0 : index
    %c0_0 = arith.constant 0 : index
    %0 = vector.load %arg1[%c0, %c0_0] : memref<64x512xf32, #tpu.memory_space<vmem>>, vector<64x512xf32>
    %c0_1 = arith.constant 0 : index
    %c0_2 = arith.constant 0 : index
    %1 = vector.load %arg2[%c0_1, %c0_2] : memref<1x512xf32, #tpu.memory_space<vmem>>, vector<1x512xf32>
    %2 = vector.broadcast %1 : vector<1x512xf32> to vector<64x512xf32>
    %3 = arith.mulf %0, %2 : vector<64x512xf32>
    %c0_3 = arith.constant 0 : index
    %c0_4 = arith.constant 0 : index
    %4 = vector.load %arg3[%c0_3, %c0_4] : memref<1x512xf32, #tpu.memory_space<vmem>>, vector<1x512xf32>
    %5 = vector.broadcast %4 : vector<1x512xf32> to vector<64x512xf32>
    %6 = arith.addf %3, %5 : vector<64x512xf32>
    %cst = arith.constant 0.000000e+00 : f32
    %7 = vector.broadcast %cst : f32 to vector<64x512xf32>
    %8 = arith.maximumf %6, %7 : vector<64x512xf32>
    %c0_5 = arith.constant 0 : index
    %c0_6 = arith.constant 0 : index
    %9 = vector.load %arg4[%c0_5, %c0_6] : memref<64x512xf32, #tpu.memory_space<vmem>>, vector<64x512xf32>
    tpu.vector_store %arg4[%c0_5, %c0_6], %8 {strides = array<i32>} : memref<64x512xf32, #tpu.memory_space<vmem>>, vector<64x512xf32>,
    return
  }
  func.func @transform_0(%arg0: i32) -> (i32, i32) {
    %c0_i32 = arith.constant 0 : i32
    %c0_i32_0 = arith.constant 0 : i32
    return %arg0, %c0_i32 : i32, i32
  }
  func.func @transform_1(%arg0: i32) -> (i32, i32) {
    %c0_i32 = arith.constant 0 : i32
    %c0_i32_0 = arith.constant 0 : i32
    %c0_i32_1 = arith.constant 0 : i32
    return %c0_i32, %c0_i32_0 : i32, i32
  }
  func.func @transform_2(%arg0: i32) -> (i32, i32) {
    %c0_i32 = arith.constant 0 : i32
    %c0_i32_0 = arith.constant 0 : i32
    %c0_i32_1 = arith.constant 0 : i32
    return %c0_i32, %c0_i32_0 : i32, i32
  }
  func.func @transform_3(%arg0: i32) -> (i32, i32) {
    %c0_i32 = arith.constant 0 : i32
    %c0_i32_0 = arith.constant 0 : i32
    return %arg0, %c0_i32 : i32, i32
  }
}

module attributes {stable_mosaic.version = 11 : i64} {
  func.func @_matmul_kernel(%arg0: i32, %arg1: i32, %arg2: memref<512x16xbf16, #tpu.memory_space<vmem>>, %arg3: memref<16x16xbf16, #tpu.memory_space<vmem>>, %arg4: memref<512x16xf32, #tpu.memory_space<vmem>>) attributes {dimension_semantics = [#tpu.dimension_semantics<parallel>, #tpu.dimension_semantics<parallel>], iteration_bounds = array<i64: 4, 1>, scalar_prefetch = 0 : i64, scratch_operands = 0 : i64, tpu.core_type = #tpu.core_type<tc>, window_params = [{transform_indices = @transform_0, window_bounds = array<i64: 512, 16>}, {transform_indices = @transform_1, window_bounds = array<i64: 16, 16>}, {transform_indices = @transform_2, window_bounds = array<i64: 512, 16>}]} {
    %c0 = arith.constant 0 : index
    %c0_0 = arith.constant 0 : index
    %0 = vector.load %arg2[%c0, %c0_0] : memref<512x16xbf16, #tpu.memory_space<vmem>>, vector<512x16xbf16>
    %c0_1 = arith.constant 0 : index
    %c0_2 = arith.constant 0 : index
    %1 = vector.load %arg3[%c0_1, %c0_2] : memref<16x16xbf16, #tpu.memory_space<vmem>>, vector<16x16xbf16>
    %cst = arith.constant dense<0.000000e+00> : vector<512x16xf32>
    %2 = tpu.matmul %0, %1, %cst {dimension_numbers = #tpu.dot_dimension_numbers<[1], [0], [0], [1], [0, 0, 1, 1], [], []>} : vector<512x16xbf16>, vector<16x16xbf16>, vector<512x16xf32> -> vector<512x16xf32>
    %c0_3 = arith.constant 0 : index
    %c0_4 = arith.constant 0 : index
    %3 = vector.load %arg4[%c0_3, %c0_4] : memref<512x16xf32, #tpu.memory_space<vmem>>, vector<512x16xf32>
    tpu.vector_store %arg4[%c0_3, %c0_4], %2 {strides = array<i32>} : memref<512x16xf32, #tpu.memory_space<vmem>>, vector<512x16xf32>,
    return
  }
  func.func @transform_0(%arg0: i32, %arg1: i32) -> (i32, i32) {
    %c0_i32 = arith.constant 0 : i32
    %c0_i32_0 = arith.constant 0 : i32
    return %arg0, %c0_i32 : i32, i32
  }
  func.func @transform_1(%arg0: i32, %arg1: i32) -> (i32, i32) {
    %c0_i32 = arith.constant 0 : i32
    %c0_i32_0 = arith.constant 0 : i32
    return %c0_i32, %arg1 : i32, i32
  }
  func.func @transform_2(%arg0: i32, %arg1: i32) -> (i32, i32) {
    %c0_i32 = arith.constant 0 : i32
    return %arg0, %arg1 : i32, i32
  }
}

module attributes {stable_mosaic.version = 11 : i64} {
  func.func @_scale_shift_act_kernel(%arg0: i32, %arg1: memref<16x512xf32, #tpu.memory_space<vmem>>, %arg2: memref<1x512xf32, #tpu.memory_space<vmem>>, %arg3: memref<1x512xf32, #tpu.memory_space<vmem>>, %arg4: memref<16x512xf32, #tpu.memory_space<vmem>>) attributes {dimension_semantics = [#tpu.dimension_semantics<parallel>], iteration_bounds = array<i64: 1>, scalar_prefetch = 0 : i64, scratch_operands = 0 : i64, tpu.core_type = #tpu.core_type<tc>, window_params = [{transform_indices = @transform_0, window_bounds = array<i64: 16, 512>}, {pipeline_mode = #tpu.pipeline_mode<synchronous>, transform_indices = @transform_1, window_bounds = array<i64: 1, 512>}, {pipeline_mode = #tpu.pipeline_mode<synchronous>, transform_indices = @transform_2, window_bounds = array<i64: 1, 512>}, {transform_indices = @transform_3, window_bounds = array<i64: 16, 512>}]} {
    %c0 = arith.constant 0 : index
    %c0_0 = arith.constant 0 : index
    %0 = vector.load %arg1[%c0, %c0_0] : memref<16x512xf32, #tpu.memory_space<vmem>>, vector<16x512xf32>
    %c0_1 = arith.constant 0 : index
    %c0_2 = arith.constant 0 : index
    %1 = vector.load %arg2[%c0_1, %c0_2] : memref<1x512xf32, #tpu.memory_space<vmem>>, vector<1x512xf32>
    %2 = vector.broadcast %1 : vector<1x512xf32> to vector<16x512xf32>
    %3 = arith.mulf %0, %2 : vector<16x512xf32>
    %c0_3 = arith.constant 0 : index
    %c0_4 = arith.constant 0 : index
    %4 = vector.load %arg3[%c0_3, %c0_4] : memref<1x512xf32, #tpu.memory_space<vmem>>, vector<1x512xf32>
    %5 = vector.broadcast %4 : vector<1x512xf32> to vector<16x512xf32>
    %6 = arith.addf %3, %5 : vector<16x512xf32>
    %7 = arith.negf %6 : vector<16x512xf32>
    %8 = math.exp %7 : vector<16x512xf32>
    %cst = arith.constant 1.000000e+00 : f32
    %9 = vector.broadcast %cst : f32 to vector<16x512xf32>
    %10 = arith.addf %9, %8 : vector<16x512xf32>
    %11 = arith.divf %9, %10 : vector<16x512xf32>
    %c0_5 = arith.constant 0 : index
    %c0_6 = arith.constant 0 : index
    %12 = vector.load %arg4[%c0_5, %c0_6] : memref<16x512xf32, #tpu.memory_space<vmem>>, vector<16x512xf32>
    tpu.vector_store %arg4[%c0_5, %c0_6], %11 {strides = array<i32>} : memref<16x512xf32, #tpu.memory_space<vmem>>, vector<16x512xf32>,
    return
  }
  func.func @transform_0(%arg0: i32) -> (i32, i32) {
    %c0_i32 = arith.constant 0 : i32
    %c0_i32_0 = arith.constant 0 : i32
    return %arg0, %c0_i32 : i32, i32
  }
  func.func @transform_1(%arg0: i32) -> (i32, i32) {
    %c0_i32 = arith.constant 0 : i32
    %c0_i32_0 = arith.constant 0 : i32
    %c0_i32_1 = arith.constant 0 : i32
    return %c0_i32, %c0_i32_0 : i32, i32
  }
  func.func @transform_2(%arg0: i32) -> (i32, i32) {
    %c0_i32 = arith.constant 0 : i32
    %c0_i32_0 = arith.constant 0 : i32
    %c0_i32_1 = arith.constant 0 : i32
    return %c0_i32, %c0_i32_0 : i32, i32
  }
  func.func @transform_3(%arg0: i32) -> (i32, i32) {
    %c0_i32 = arith.constant 0 : i32
    %c0_i32_0 = arith.constant 0 : i32
    return %arg0, %c0_i32 : i32, i32
  }
}

</mosaic_0001>

<bundles_post_ra>
// kernel: tile.43
= control target key start
LH: loop header
LB: loop body
LE: loop exit
PB: predicated region body
PF: predicated region fallthrough
CT: control target
= control target key end

     0   :  { %s22_s0 = inlined_call_operand.vmem [shape: f32[64], index: 0, kind: input, shape index: {}]   ;;  %s23_s1 = inlined_call_operand.vmem [shape: f32[4,64], index: 1, kind: output, shape index: {}]  }
   0x1   :  { %v4_v0 = vld [vmem:[%s22_s0] ss:$0 sm:$0xff] }
   0x2   :  { %5 = vst [vmem:[%s23_s1] sm:$0xf] %v4_v0 }

// kernel: tile.48
= control target key start
LH: loop header
LB: loop body
LE: loop exit
PB: predicated region body
PF: predicated region fallthrough
CT: control target
= control target key end

     0   :  { %s6_s8 = smov 3  ;;  %vm8_vm0 = vcmask 523264   ;;  %s30_s9 = smov 64   ;;  %vm15_vm1 = vcmask 1048064   ;;  %s50_s0 = inlined_call_operand.vmem [shape: f32[4,64], index: 0, kind: input, shape index: {}]   ;;  %s51_s1 = inlined_call_operand.vmem [shape: f32[1,256], index: 1, kind: output, shape index: {}]  }
   0x1   :  { %v4_v0 = vld [vmem:[%s50_s0] sm:$0xf]  ;;  %s11_s0 = smov 3 }
   0x2   :  { %5 = vst [vmem:[#allocation1] sm:$0xf] %v4_v0 }
   0x9   :  { %v12_v1 = vld [vmem:[#allocation1 + $0x1] ss:$2 sm:%s11_s0]   ;;  %v7_v2 = vld [vmem:[#allocation1] ss:$2 sm:%s6_s8]  }
   0xa   :  { %13 = vrot.lane.b32.xlu0 %v12_v1, %s30_s9  ;;  %9 = vst.msk [vmem:[#allocation0] ss:$8 sm:$0x3] %vm8_vm0, %v7_v2  }
  0x7c   :  { %v14_v3 = vpop.permute.xlu0 %13  }
  0x7d   :  { %16 = vst.msk [vmem:[#allocation0] ss:$8 sm:$0x3] %vm15_vm1, %v14_v3  }
  0x84   :  { %v20_v4 = vld [vmem:[#allocation0] sm:$0x1]  ;;  %v24_v5 = vld [vmem:[#allocation0 + $0x8] sm:$0x1] }
  0x85   :  { %22 = vst [vmem:[%s51_s1] sm:$0x1] %v20_v4  ;;  %28 = vst [vmem:[%s51_s1 + $0x1] sm:$0x1] %v24_v5 }

// kernel: generator_forward.14
= control target key start
LH: loop header
LB: loop body
LE: loop exit
PB: predicated region body
PF: predicated region fallthrough
CT: control target
= control target key end

     0   :  { %s595_s9 = smov 0   ;;  %s597_s10 = smov 0   ;;  %s663_s0 = inlined_call_operand.vmem [shape: bf16[8,32], index: 0, kind: input, shape index: {}]   ;;  %s664_s1 = inlined_call_operand.vmem [shape: bf16[32,1024], index: 1, kind: input, shape index: {}]   ;;  %s665_s2 = inlined_call_operand.vmem [shape: f32[8,1024], index: 2, kind: output, shape index: {}]  }
   0x1   :  { %s599_s11 = smov 0   ;;  %s601_s12 = smov 0  }
   0x2   :  { %s603_s13 = smov 0  }
   0x3 LB: > { %s21_s14 = sadd.s32 1, %s573_s12  ;;  %p64_p1 = scmp.ne.s32.totalorder %s565_s10, %s561_s9  ;;  %s577_s13 = sphi %s603_s13, %s12_s13   ;;  %s573_s12 = sphi %s601_s12, %s669_s12   ;;  %s569_s11 = sphi %s599_s11, %s668_s11   ;;  %s565_s10 = sphi %s597_s10, %s667_s10   ;;  %s561_s9 = sphi %s595_s9, %s666_s9  }
   0x4   : > { %p22_p0 = scmp.ge.s32.totalorder %s21_s14, 2  ;;  %p65_p2 = scmp.eq.s32.totalorder %s577_s13, 0 }
   0x5   : > { %s57_s16 = sadd.s32 1, %s565_s10  ;;  %p465_p5 = scmp.ge.s32.totalorder %s577_s13, 2 }
   0x6   : > { %s671_s14 = smov (%p22_p0, %s21_s14), 0  ;;  %p66_p3 = por %p65_p2, %p64_p1 }
   0x7   : > { %s54_s15 = ssub.s32 %s573_s12, %s671_s14  ;;  %125 = sbr.rel (%p465_p5) target bundleno = 22 (0x16), region = 20 }
   0x8   : > { %p55_p4 = scmp.eq.s32.totalorder %s54_s15, 0 }
   0xa   : > { %s630_s17 = scalar_select %p55_p4, %s565_s10, %s57_s16  }
   0xe   : > { %128 = sbr.rel (!%p66_p3) target bundleno = 22 (0x16), region = 24  ;;  %s130_s18 = sand.u32 (%p66_p3), 1, %s565_s10  }
   0xf   : > { %s485_s19 = sshll.u32 (%p66_p3), %s573_s12, 4  ;;  %s466_s20 = sshll.u32 (%p66_p3), %s130_s18, 6 }
  0x10   : > { %s135_s23 = scalar_lea.vmem (%p66_p3), %s664_s1, %s485_s19  ;;  %s132_s24 = scalar_lea.vmem (%p66_p3), [#allocation2], %s466_s20 }
  0x11   : > { %v148_v0 = vld [vmem:[%s135_s23] sm:$0xff] (%p66_p3)  ;;  %v150_v1 = vld [vmem:[%s135_s23 + $0x8] sm:$0xff] (%p66_p3) }
  0x12   : > { %v152_v2 = vld [vmem:[%s135_s23 + $0x20] sm:$0xff] (%p66_p3)  ;;  %149 = vst [vmem:[%s132_s24] sm:$0xff] (%p66_p3), %v148_v0  ;;  %151 = vst [vmem:[%s132_s24 + $0x8] sm:$0xff] (%p66_p3), %v150_v1  ;;  %v154_v3 = vld [vmem:[%s135_s23 + $0x28] sm:$0xff] (%p66_p3) }
  0x13   : > { %153 = vst [vmem:[%s132_s24 + $0x10] sm:$0xff] (%p66_p3), %v152_v2  ;;  %v156_v4 = vld [vmem:[%s135_s23 + $0x40] sm:$0xff] (%p66_p3)  ;;  %v158_v5 = vld [vmem:[%s135_s23 + $0x48] sm:$0xff] (%p66_p3)  ;;  %155 = vst [vmem:[%s132_s24 + $0x18] sm:$0xff] (%p66_p3), %v154_v3 }
  0x14   : > { %157 = vst [vmem:[%s132_s24 + $0x20] sm:$0xff] (%p66_p3), %v156_v4  ;;  %159 = vst [vmem:[%s132_s24 + $0x28] sm:$0xff] (%p66_p3), %v158_v5  ;;  %v160_v6 = vld [vmem:[%s135_s23 + $0x60] sm:$0xff] (%p66_p3)  ;;  %v162_v7 = vld [vmem:[%s135_s23 + $0x68] sm:$0xff] (%p66_p3) }
  0x15   : > { %161 = vst [vmem:[%s132_s24 + $0x30] sm:$0xff] %v160_v6  ;;  %163 = vst [vmem:[%s132_s24 + $0x38] sm:$0xff] %v162_v7 }
  0x16 PF: > { %p469_p6 = scmp.ge.s32.totalorder %s577_s13, 1  ;;  %p168_p7 = scmp.lt.s32.totalorder %s577_s13, 3 }
  0x18   : > { %p169_p8 = pnand %p469_p6, %p168_p7 }
  0x19   : > { %s175_s25 = sand.u32 (!%p169_p8), 1, %s561_s9   ;;  %v579_v8 = vmov (!%p169_p8), 0   ;;  %v220_v17 = vld [vmem:[%s663_s0] sm:$0xf] (!%p169_p8)  ;;  %vm269_vm0 = vcmask (!%p169_p8), 261120   ;;  %s471_s30 = sshll.u32 (!%p169_p8), %s569_s11, 2 }
  0x1a   : > { %172 = sbr.rel (%p169_p8) target bundleno = 252 (0xfc), region = 47  ;;  %s470_s26 = sshll.u32 (!%p169_p8), %s175_s25, 6  ;;  %305 = vmatprep.mubr.bf16.mxu0 (!%p169_p8), %v579_v8  ;;  %346 = vmatprep.mubr.bf16.mxu1 (!%p169_p8), %v579_v8 }
  0x1b   : > { %s177_s27 = scalar_lea.vmem (!%p169_p8), [#allocation2], %s470_s26  ;;  %p212_p9 = scmp.lt.s32.totalorder (!%p169_p8), %s471_s30, 7 }
  0x1c   : > { %v527_v9 = vld [vmem:[%s177_s27 + $0x4] ss:$16 sps:$4 sm:$0xff] (!%p169_p8)   ;;  %v529_v10 = vld [vmem:[%s177_s27 + $0xc] ss:$16 sps:$4 sm:$0xff] (!%p169_p8)   ;;  %v531_v11 = vld [vmem:[%s177_s27] ss:$16 sps:$4 sm:$0xff] (!%p169_p8)  }
  0x1d   : > { %273 = vmatprep.subr.bf16.mxu0 (!%p169_p8), %v527_v9  ;;  %v532_v12 = vld [vmem:[%s177_s27 + $0x8] ss:$16 sps:$4 sm:$0xff] (!%p169_p8)   ;;  %314 = vmatprep.subr.bf16.mxu1 (!%p169_p8), %v529_v10  ;;  %v533_v13 = vld [vmem:[%s177_s27 + $0x24] ss:$16 sps:$4 sm:$0xff] (!%p169_p8)   ;;  %v535_v14 = vld [vmem:[%s177_s27 + $0x2c] ss:$16 sps:$4 sm:$0xff] (!%p169_p8)  }
  0x1e   : > { %274 = vmatpush1.bf16.msra.mxu0 (!%p169_p8), %v531_v11  ;;  %315 = vmatpush1.bf16.msra.mxu1 (!%p169_p8), %v532_v12  ;;  %v537_v15 = vld [vmem:[%s177_s27 + $0x20] ss:$16 sps:$4 sm:$0xff] (!%p169_p8)   ;;  %v538_v16 = vld [vmem:[%s177_s27 + $0x28] ss:$16 sps:$4 sm:$0xff] (!%p169_p8)  }
  0x1f   : > { %275 = vmatprep.subr.bf16.mxu0 (!%p169_p8), %v533_v13  ;;  %316 = vmatprep.subr.bf16.mxu1 (!%p169_p8), %v535_v14 }
  0x21   : > { %s673_s30 = smov (!%p212_p9, %s471_s30), 7 }
  0x22   : > { %276 = vmatpush1.bf16.msra.mxu0 %v537_v15  ;;  %317 = vmatpush1.bf16.msra.mxu1 %v538_v16  ;;  %s472_s3 = sshll.u32 %s673_s30, 3 }
  0x23   : > { %s217_s6 = scalar_lea.vmem %s665_s2, %s472_s3 }
  0x25   : > { %481 = vmatmul.mubr.msk.bf16.vlgmr.msra.gmra.mrb[0].mxu0 %vm269_vm0, %v220_v17  ;;  %482 = vmatmul.mubr.msk.bf16.vlgmr.msra.gmra.mrb[0].mxu1 %vm269_vm0, %v220_v17 }
  0xf8   : > { %v307_v18 = vpop.f32.mrb[0].mxu0  ;;  %v348_v19 = vpop.f32.mrb[0].mxu1 }
  0xf9   : > { %355 = vst [vmem:[%s217_s6] sm:$0xff] %v307_v18  ;;  %v309_v20 = vpop.f32.mrb[1].mxu0  ;;  %v350_v21 = vpop.f32.mrb[1].mxu1  ;;  %357 = vst [vmem:[%s217_s6 + $0x10] sm:$0xff] %v348_v19 }
  0xfa   : > { %356 = vst [vmem:[%s217_s6 + $0x8] sm:$0xff] %v309_v20  ;;  %v311_v22 = vpop.f32.mrb[2].mxu0  ;;  %v352_v23 = vpop.f32.mrb[2].mxu1  ;;  %358 = vst [vmem:[%s217_s6 + $0x18] sm:$0xff] %v350_v21 }
  0xfb   : > { %v312_v24 = vpop.f32.mrb[3].mxu0  ;;  %v353_v25 = vpop.f32.mrb[3].mxu1 }
  0xfc PF: > { %s12_s13 = sadd.s32 1, %s577_s13   ;;  %s666_s9 = smov %s565_s10 }
  0xfd   : > { %p9_p10 = scmp.ge.s32.totalorder %s12_s13, 4   ;;  %s667_s10 = smov %s630_s17 }
  0xfe   : > { %s668_s11 = smov %s573_s12  ;;  %s669_s12 = smov %s671_s14 }
  0xff   :  { %11 = sbr.rel (!%p9_p10) target bundleno = 3 (0x3), region = 89 }

// kernel: generator_forward.15
= control target key start
LH: loop header
LB: loop body
LE: loop exit
PB: predicated region body
PF: predicated region fallthrough
CT: control target
= control target key end

     0   :  { %v14_v0 = vlaneseq  ;;  %v104_v6 = vmov 0.0   ;;  %v105_v11 = vmov 1966171168   ;;  %s157_s0 = inlined_call_operand.vmem [shape: f32[8,256], index: 0, kind: input, shape index: {}]   ;;  %s158_s1 = inlined_call_operand.vmem [shape: f32[1,256], index: 1, kind: output, shape index: {0}]   ;;  %s159_s2 = inlined_call_operand.vmem [shape: f32[1,256], index: 2, kind: output, shape index: {1}]  }
   0x1   :  { %v20_v1 = vld [vmem:[%s157_s0] sm:$0xff]  ;;  %v21_v2 = vld [vmem:[%s157_s0 + $0x8] sm:$0xff]  ;;  %v39_v12 = vunpack.c.l.s4 %v105_v11 }
   0x2   :  { %vm127_vm0 = vcmp.lt.s32.totalorder %v14_v0, 256  ;;  %v23_v4 = vrot.slane %v20_v1, 4  ;;  %v29_v5 = vrot.slane %v21_v2, 4  ;;  %v60_v7 = vmul.f32 %v20_v1, %v20_v1 }
   0x3   :  { %18 = vst.msk [vmem:[%s158_s1] sm:$0x3] %vm127_vm0, %v104_v6  ;;  %19 = vst.msk [vmem:[%s159_s2] sm:$0x3] %vm127_vm0, %v104_v6  ;;  %v61_v8 = vmul.f32 %v21_v2, %v21_v2  ;;  %v40_v21 = vunpack.c.0.s8 %v39_v12  ;;  %v42_v22 = vshrl.u32 %v14_v0, 7 }
   0x4   :  { %v24_v9 = vadd.f32 %v23_v4, %v20_v1  ;;  %v30_v10 = vadd.f32 %v29_v5, %v21_v2  ;;  %v62_v13 = vrot.slane %v60_v7, 4 }
   0x5   :  { %v68_v14 = vrot.slane %v61_v8, 4  ;;  %v43_v31 = vsub.s32 %v40_v21, %v42_v22 }
   0x6   :  { %v25_v15 = vrot.slane %v24_v9, 2  ;;  %v31_v16 = vrot.slane %v30_v10, 2  ;;  %v63_v17 = vadd.f32 %v62_v13, %v60_v7 }
   0x7   :  { %v69_v18 = vadd.f32 %v68_v14, %v61_v8 }
   0x8   :  { %v26_v19 = vadd.f32 %v25_v15, %v24_v9  ;;  %v32_v20 = vadd.f32 %v31_v16, %v30_v10  ;;  %v64_v23 = vrot.slane %v63_v17, 2 }
   0x9   :  { %v70_v24 = vrot.slane %v69_v18, 2 }
   0xa   :  { %v27_v25 = vrot.slane %v26_v19, 1  ;;  %v33_v26 = vrot.slane %v32_v20, 1  ;;  %v65_v27 = vadd.f32 %v64_v23, %v63_v17  ;;  %v22_v38 = vld [vmem:[%s158_s1] sm:$0x3] }
   0xb   :  { %v71_v28 = vadd.f32 %v70_v24, %v69_v18  ;;  %v59_v43 = vld [vmem:[%s159_s2] sm:$0x3] }
   0xc   :  { %v28_v29 = vadd.f32 %v27_v25, %v26_v19  ;;  %v34_v30 = vadd.f32 %v33_v26, %v32_v20  ;;  %v66_v32 = vrot.slane %v65_v27, 1 }
   0xd   :  { %v72_v33 = vrot.slane %v71_v28, 1 }
   0xe   :  { %v37_v34 = vcombine.low %v28_v29, %v34_v30  ;;  %v67_v35 = vadd.f32 %v66_v32, %v65_v27 }
   0xf   :  { %v73_v36 = vadd.f32 %v72_v33, %v71_v28 }
  0x10   :  { %v44_v37 = vrot.slane %v37_v34, %v43_v31 }
  0x11   :  { %v76_v39 = vcombine.low %v67_v35, %v73_v36 }
  0x12   :  { %v51_v40 = vrot.slane %v44_v37, %v43_v31 }
  0x13   :  { %v83_v41 = vrot.slane %v76_v39, %v43_v31 }
  0x14   :  { %v53_v42 = vadd.f32 %v51_v40, %v22_v38 }
  0x15   :  { %v90_v44 = vrot.slane %v83_v41, %v43_v31 }
  0x16   :  { %58 = vst.msk [vmem:[%s158_s1] sm:$0x3] %vm127_vm0, %v53_v42 }
  0x17   :  { %v92_v45 = vadd.f32 %v90_v44, %v59_v43 }
  0x19   :  { %93 = vst.msk [vmem:[%s159_s2] sm:$0x3] %vm127_vm0, %v92_v45 }

// kernel: generator_forward.16
= control target key start
LH: loop header
LB: loop body
LE: loop exit
PB: predicated region body
PF: predicated region fallthrough
CT: control target
= control target key end

     0   :  { %v18_v0 = vlaneseq  ;;  %s90_s1 = inlined_call_operand.vmem [shape: f32[1,256], index: 1, kind: input, shape index: {}]   ;;  %s91_s2 = inlined_call_operand.vmem [shape: f32[1,256], index: 2, kind: input, shape index: {}]   ;;  %s92_s0 = inlined_call_operand.vmem [shape: f32[8,256], index: 0, kind: input, shape index: {}]   ;;  %s93_s3 = inlined_call_operand.vmem [shape: f32[8,256], index: 3, kind: output, shape index: {}]  }
   0x1   :  { %v16_v2 = vld [vmem:[%s90_s1] sm:$0x3]  ;;  %v15_v7 = vld [vmem:[%s92_s0 + $0x8] sm:$0xff] }
   0x2   :  { %v19_v1 = vshrl.u32 %v18_v0, 7  ;;  %v30_v3 = vld [vmem:[%s91_s2] sm:$0x3] }
   0x3   :  { %v14_v6 = vld [vmem:[%s92_s0] sm:$0xff] }
   0x4   :  { %v20_v4 = vsub.s32 0, %v19_v1  ;;  %v24_v5 = vsub.s32 1, %v19_v1 }
   0x6   :  { %v21_v8 = vrot.slane %v16_v2, %v20_v4  ;;  %v35_v9 = vrot.slane %v30_v3, %v20_v4  ;;  %v25_v10 = vrot.slane %v16_v2, %v24_v5  ;;  %v39_v11 = vrot.slane %v30_v3, %v24_v5 }
   0x8   :  { %v28_v12 = vmul.f32 %v21_v8, %v14_v6  ;;  %v29_v13 = vmul.f32 %v25_v10, %v15_v7 }
   0xa   :  { %v42_v14 = vadd.f32 %v35_v9, %v28_v12  ;;  %v43_v15 = vadd.f32 %v39_v11, %v29_v13 }
   0xc   :  { %v44_v16 = vmax.f32 %v42_v14, 0.0  ;;  %v45_v17 = vmax.f32 %v43_v15, 0.0 }
   0xe   :  { %46 = vst [vmem:[%s93_s3] sm:$0xff] %v44_v16  ;;  %47 = vst [vmem:[%s93_s3 + $0x8] sm:$0xff] %v45_v17 }

// kernel: generator_forward.17
= control target key start
LH: loop header
LB: loop body
LE: loop exit
PB: predicated region body
PF: predicated region fallthrough
CT: control target
= control target key end

     0   :  { %v304_v1 = vmov 0   ;;  %vm122_vm0 = vcmask 523264   ;;  %s422_s1 = inlined_call_operand.vmem [shape: bf16[64,512], index: 1, kind: input, shape index: {}]   ;;  %s423_s0 = inlined_call_operand.vmem [shape: bf16[32,64], index: 0, kind: input, shape index: {}]   ;;  %s424_s2 = inlined_call_operand.vmem [shape: f32[32,512], index: 2, kind: output, shape index: {}]  }
   0x1   :  { %v278_v0 = vld [vmem:[%s422_s1 + $0x4] ss:$16 sps:$4 sm:$0xff]   ;;  %161 = vmatprep.mubr.bf16.mxu0 %v304_v1  ;;  %214 = vmatprep.mubr.bf16.mxu1 %v304_v1  ;;  %v280_v2 = vld [vmem:[%s422_s1 + $0xc] ss:$16 sps:$4 sm:$0xff]   ;;  %v282_v3 = vld [vmem:[%s422_s1] ss:$16 sps:$4 sm:$0xff]  }
   0x2   :  { %129 = vmatprep.subr.bf16.mxu0 %v278_v0  ;;  %v283_v4 = vld [vmem:[%s422_s1 + $0x8] ss:$16 sps:$4 sm:$0xff]   ;;  %182 = vmatprep.subr.bf16.mxu1 %v280_v2  ;;  %v284_v5 = vld [vmem:[%s422_s1 + $0x24] ss:$16 sps:$4 sm:$0xff]   ;;  %v286_v6 = vld [vmem:[%s422_s1 + $0x2c] ss:$16 sps:$4 sm:$0xff]  }
   0x3   :  { %130 = vmatpush1.bf16.msra.mxu0 %v282_v3  ;;  %183 = vmatpush1.bf16.msra.mxu1 %v283_v4  ;;  %v288_v7 = vld [vmem:[%s422_s1 + $0x20] ss:$16 sps:$4 sm:$0xff]   ;;  %v289_v8 = vld [vmem:[%s422_s1 + $0x28] ss:$16 sps:$4 sm:$0xff]   ;;  %v290_v9 = vld [vmem:[%s422_s1 + $0x44] ss:$16 sps:$4 sm:$0xff]  }
   0x4   :  { %131 = vmatprep.subr.bf16.mxu0 %v284_v5  ;;  %184 = vmatprep.subr.bf16.mxu1 %v286_v6  ;;  %v292_v10 = vld [vmem:[%s422_s1 + $0x4c] ss:$16 sps:$4 sm:$0xff]   ;;  %v294_v11 = vld [vmem:[%s422_s1 + $0x40] ss:$16 sps:$4 sm:$0xff]   ;;  %v295_v12 = vld [vmem:[%s422_s1 + $0x48] ss:$16 sps:$4 sm:$0xff]  }
   0x5   :  { %v296_v13 = vld [vmem:[%s422_s1 + $0x64] ss:$16 sps:$4 sm:$0xff]   ;;  %v298_v14 = vld [vmem:[%s422_s1 + $0x6c] ss:$16 sps:$4 sm:$0xff]   ;;  %v300_v15 = vld [vmem:[%s422_s1 + $0x60] ss:$16 sps:$4 sm:$0xff]  }
   0x6   :  { %v301_v16 = vld [vmem:[%s422_s1 + $0x68] ss:$16 sps:$4 sm:$0xff]   ;;  %v302_v17 = vld [vmem:[%s423_s0] sm:$0xff]  }
   0x7   :  { %132 = vmatpush1.bf16.msra.mxu0 %v288_v7  ;;  %185 = vmatpush1.bf16.msra.mxu1 %v289_v8  ;;  %v303_v18 = vld [vmem:[%s423_s0 + $0x8] sm:$0xff]  }
   0x8   :  { %133 = vmatprep.subr.bf16.mxu0 %v290_v9  ;;  %186 = vmatprep.subr.bf16.mxu1 %v292_v10 }
   0xb   :  { %134 = vmatpush1.bf16.msra.mxu0 %v294_v11  ;;  %187 = vmatpush1.bf16.msra.mxu1 %v295_v12 }
   0xc   :  { %135 = vmatprep.subr.bf16.mxu0 %v296_v13  ;;  %188 = vmatprep.subr.bf16.mxu1 %v298_v14 }
   0xf   :  { %136 = vmatpush1.bf16.msra.mxu0 %v300_v15  ;;  %189 = vmatpush1.bf16.msra.mxu1 %v301_v16 }
  0x12   :  { %273 = vmatmul.mubr.msk.bf16.vlgmr.msra.gmra.mrb[0].mxu0 %vm122_vm0, %v302_v17  ;;  %275 = vmatmul.mubr.msk.bf16.vlgmr.msra.gmra.mrb[0].mxu1 %vm122_vm0, %v302_v17 }
  0x13   :  { %171 = vmatprep.mubr.bf16.mxu0 %v304_v1  ;;  %224 = vmatprep.mubr.bf16.mxu1 %v304_v1 }
  0x1a   :  { %274 = vmatmul.mubr.msk.bf16.gmra.mrb[4].mxu0 %vm122_vm0, %v303_v18  ;;  %276 = vmatmul.mubr.msk.bf16.gmra.mrb[4].mxu1 %vm122_vm0, %v303_v18 }
  0xe5   :  { %v163_v19 = vpop.f32.mrb[0].mxu0  ;;  %v216_v20 = vpop.f32.mrb[0].mxu1 }
  0xe6   :  { %235 = vst [vmem:[%s424_s2] sm:$0xff] %v163_v19  ;;  %237 = vst [vmem:[%s424_s2 + $0x10] sm:$0xff] %v216_v20  ;;  %v165_v21 = vpop.f32.mrb[1].mxu0  ;;  %v218_v22 = vpop.f32.mrb[1].mxu1 }
  0xe7   :  { %236 = vst [vmem:[%s424_s2 + $0x8] sm:$0xff] %v165_v21  ;;  %238 = vst [vmem:[%s424_s2 + $0x18] sm:$0xff] %v218_v22  ;;  %v167_v23 = vpop.f32.mrb[2].mxu0  ;;  %v220_v24 = vpop.f32.mrb[2].mxu1 }
  0xe8   :  { %239 = vst [vmem:[%s424_s2 + $0x20] sm:$0xff] %v167_v23  ;;  %241 = vst [vmem:[%s424_s2 + $0x30] sm:$0xff] %v220_v24  ;;  %v169_v25 = vpop.f32.mrb[3].mxu0  ;;  %v222_v26 = vpop.f32.mrb[3].mxu1 }
  0xe9   :  { %240 = vst [vmem:[%s424_s2 + $0x28] sm:$0xff] %v169_v25  ;;  %242 = vst [vmem:[%s424_s2 + $0x38] sm:$0xff] %v222_v26 }
  0xed   :  { %v173_v27 = vpop.f32.mrb[4].mxu0  ;;  %v226_v28 = vpop.f32.mrb[4].mxu1 }
  0xee   :  { %243 = vst [vmem:[%s424_s2 + $0x40] sm:$0xff] %v173_v27  ;;  %245 = vst [vmem:[%s424_s2 + $0x50] sm:$0xff] %v226_v28  ;;  %v175_v29 = vpop.f32.mrb[5].mxu0  ;;  %v228_v30 = vpop.f32.mrb[5].mxu1 }
  0xef   :  { %244 = vst [vmem:[%s424_s2 + $0x48] sm:$0xff] %v175_v29  ;;  %246 = vst [vmem:[%s424_s2 + $0x58] sm:$0xff] %v228_v30  ;;  %v177_v31 = vpop.f32.mrb[6].mxu0  ;;  %v230_v32 = vpop.f32.mrb[6].mxu1 }
  0xf0   :  { %247 = vst [vmem:[%s424_s2 + $0x60] sm:$0xff] %v177_v31  ;;  %249 = vst [vmem:[%s424_s2 + $0x70] sm:$0xff] %v230_v32  ;;  %v179_v33 = vpop.f32.mrb[7].mxu0  ;;  %v232_v34 = vpop.f32.mrb[7].mxu1 }
  0xf1   :  { %248 = vst [vmem:[%s424_s2 + $0x68] sm:$0xff] %v179_v33  ;;  %250 = vst [vmem:[%s424_s2 + $0x78] sm:$0xff] %v232_v34 }

// kernel: tile.53
= control target key start
LH: loop header
LB: loop body
LE: loop exit
PB: predicated region body
PF: predicated region fallthrough
CT: control target
= control target key end

     0   :  { %s22_s0 = inlined_call_operand.vmem [shape: f32[32], index: 0, kind: input, shape index: {}]   ;;  %s23_s1 = inlined_call_operand.vmem [shape: f32[8,32], index: 1, kind: output, shape index: {}]  }
   0x1   :  { %v4_v0 = vld [vmem:[%s22_s0] ss:$0 sm:$0xff] }
   0x2   :  { %5 = vst [vmem:[%s23_s1] sm:$0xff] %v4_v0 }

// kernel: tile.58
= control target key start
LH: loop header
LB: loop body
LE: loop exit
PB: predicated region body
PF: predicated region fallthrough
CT: control target
= control target key end

     0   :  { %s7_s6 = smov 3  ;;  %s14_s9 = smov 3  ;;  %vm4_vm0 = vcmask 261120   ;;  %vm11_vm1 = vcmask 1048320   ;;  %vm18_vm2 = vcmask 785920   ;;  %vm25_vm3 = vcmask 523520   ;;  %s76_s0 = inlined_call_operand.vmem [shape: f32[8,32], index: 0, kind: input, shape index: {}]   ;;  %s77_s1 = inlined_call_operand.vmem [shape: f32[1,256], index: 1, kind: output, shape index: {}]  }
   0x1   :  { %v38_v0 = vld [vmem:[%s76_s0 + $0x3] ss:$4 sm:%s7_s6]   ;;  %s45_s10 = smov 96   ;;  %s21_s11 = smov 3  ;;  %v39_v1 = vld [vmem:[%s76_s0 + $0x2] ss:$4 sm:%s14_s9]  }
   0x2   :  { %9 = vrot.lane.b32.xlu0 %v38_v0, %s45_s10  ;;  %v40_v2 = vld [vmem:[%s76_s0 + $0x1] ss:$4 sm:%s21_s11]   ;;  %s2_s16 = smov 3  ;;  %s46_s17 = smov 32  }
   0x3   :  { %23 = vrot.lane.b32.xlu1 %v40_v2, %s46_s17  ;;  %v3_v3 = vld [vmem:[%s76_s0] ss:$4 sm:%s2_s16]   ;;  %s47_s0 = smov 64  }
   0x4   :  { %5 = vst.msk [vmem:[#allocation0] ss:$8 sm:$0x3] %vm4_vm0, %v3_v3  }
   0x6   :  { %16 = vrot.lane.b32.xlu0 %v39_v1, %s47_s0 }
  0x74   :  { %v10_v4 = vpop.permute.xlu0 %9  }
  0x75   :  { %12 = vst.msk [vmem:[#allocation0] ss:$8 sm:$0x3] %vm11_vm1, %v10_v4   ;;  %v24_v5 = vpop.permute.xlu1 %23  }
  0x78   :  { %v17_v6 = vpop.permute.xlu0 %16  }
  0x79   :  { %19 = vst.msk [vmem:[#allocation0] ss:$8 sm:$0x3] %vm18_vm2, %v17_v6  }
  0x7a   :  { %26 = vst.msk [vmem:[#allocation0] ss:$8 sm:$0x3] %vm25_vm3, %v24_v5  }
  0x81   :  { %v30_v7 = vld [vmem:[#allocation0] sm:$0x1]  ;;  %v34_v8 = vld [vmem:[#allocation0 + $0x8] sm:$0x1] }
  0x82   :  { %32 = vst [vmem:[%s77_s1] sm:$0x1] %v30_v7  ;;  %41 = vst [vmem:[%s77_s1 + $0x1] sm:$0x1] %v34_v8 }

// kernel: generator_forward.18
= control target key start
LH: loop header
LB: loop body
LE: loop exit
PB: predicated region body
PF: predicated region fallthrough
CT: control target
= control target key end

     0   :  { %v14_v0 = vlaneseq  ;;  %v112_v8 = vmov 0.0   ;;  %v113_v19 = vmov 1966171168   ;;  %s171_s0 = inlined_call_operand.vmem [shape: f32[16,256], index: 0, kind: input, shape index: {}]   ;;  %s172_s1 = inlined_call_operand.vmem [shape: f32[1,256], index: 1, kind: output, shape index: {0}]   ;;  %s173_s2 = inlined_call_operand.vmem [shape: f32[1,256], index: 2, kind: output, shape index: {1}]  }
   0x1   :  { %v20_v1 = vld [vmem:[%s171_s0] sm:$0xff]  ;;  %v21_v2 = vld [vmem:[%s171_s0 + $0x8] sm:$0xff]  ;;  %v22_v3 = vld [vmem:[%s171_s0 + $0x10] sm:$0xff]  ;;  %v43_v20 = vunpack.c.l.s4 %v113_v19 }
   0x2   :  { %vm138_vm0 = vcmp.lt.s32.totalorder %v14_v0, 256  ;;  %v23_v5 = vld [vmem:[%s171_s0 + $0x18] sm:$0xff]  ;;  %v25_v6 = vadd.f32 %v22_v3, %v20_v1  ;;  %v64_v7 = vmul.f32 %v20_v1, %v20_v1  ;;  %v65_v10 = vmul.f32 %v21_v2, %v21_v2 }
   0x3   :  { %18 = vst.msk [vmem:[%s172_s1] sm:$0x3] %vm138_vm0, %v112_v8  ;;  %v32_v9 = vadd.f32 %v23_v5, %v21_v2  ;;  %19 = vst.msk [vmem:[%s173_s2] sm:$0x3] %vm138_vm0, %v112_v8  ;;  %v66_v11 = vmul.f32 %v22_v3, %v22_v3  ;;  %v67_v13 = vmul.f32 %v23_v5, %v23_v5  ;;  %v44_v29 = vunpack.c.0.s8 %v43_v20 }
   0x4   :  { %v26_v12 = vrot.slane %v25_v6, 4  ;;  %v46_v30 = vshrl.u32 %v14_v0, 7 }
   0x5   :  { %v33_v14 = vrot.slane %v32_v9, 4  ;;  %v68_v15 = vadd.f32 %v66_v11, %v64_v7  ;;  %v75_v17 = vadd.f32 %v67_v13, %v65_v10 }
   0x6   :  { %v27_v16 = vadd.f32 %v26_v12, %v25_v6  ;;  %v47_v39 = vsub.s32 %v44_v29, %v46_v30 }
   0x7   :  { %v34_v18 = vadd.f32 %v33_v14, %v32_v9  ;;  %v69_v21 = vrot.slane %v68_v15, 4  ;;  %v76_v23 = vrot.slane %v75_v17, 4 }
   0x8   :  { %v28_v22 = vrot.slane %v27_v16, 2 }
   0x9   :  { %v35_v24 = vrot.slane %v34_v18, 2  ;;  %v70_v25 = vadd.f32 %v69_v21, %v68_v15  ;;  %v77_v27 = vadd.f32 %v76_v23, %v75_v17 }
   0xa   :  { %v29_v26 = vadd.f32 %v28_v22, %v27_v16  ;;  %v24_v46 = vld [vmem:[%s172_s1] sm:$0x3] }
   0xb   :  { %v36_v28 = vadd.f32 %v35_v24, %v34_v18  ;;  %v71_v31 = vrot.slane %v70_v25, 2  ;;  %v78_v33 = vrot.slane %v77_v27, 2  ;;  %v63_v51 = vld [vmem:[%s173_s2] sm:$0x3] }
   0xc   :  { %v30_v32 = vrot.slane %v29_v26, 1 }
   0xd   :  { %v37_v34 = vrot.slane %v36_v28, 1  ;;  %v72_v35 = vadd.f32 %v71_v31, %v70_v25  ;;  %v79_v37 = vadd.f32 %v78_v33, %v77_v27 }
   0xe   :  { %v31_v36 = vadd.f32 %v30_v32, %v29_v26 }
   0xf   :  { %v38_v38 = vadd.f32 %v37_v34, %v36_v28  ;;  %v73_v40 = vrot.slane %v72_v35, 1  ;;  %v80_v41 = vrot.slane %v79_v37, 1 }
  0x11   :  { %v41_v42 = vcombine.low %v31_v36, %v38_v38  ;;  %v74_v43 = vadd.f32 %v73_v40, %v72_v35  ;;  %v81_v44 = vadd.f32 %v80_v41, %v79_v37 }
  0x13   :  { %v48_v45 = vrot.slane %v41_v42, %v47_v39  ;;  %v84_v47 = vcombine.low %v74_v43, %v81_v44 }
  0x15   :  { %v55_v48 = vrot.slane %v48_v45, %v47_v39  ;;  %v91_v49 = vrot.slane %v84_v47, %v47_v39 }
  0x17   :  { %v57_v50 = vadd.f32 %v55_v48, %v24_v46  ;;  %v98_v52 = vrot.slane %v91_v49, %v47_v39 }
  0x19   :  { %62 = vst.msk [vmem:[%s172_s1] sm:$0x3] %vm138_vm0, %v57_v50  ;;  %v100_v53 = vadd.f32 %v98_v52, %v63_v51 }
  0x1b   :  { %101 = vst.msk [vmem:[%s173_s2] sm:$0x3] %vm138_vm0, %v100_v53 }

// kernel: generator_forward.19
= control target key start
LH: loop header
LB: loop body
LE: loop exit
PB: predicated region body
PF: predicated region fallthrough
CT: control target
= control target key end

     0   :  { %v20_v0 = vlaneseq  ;;  %s112_s1 = inlined_call_operand.vmem [shape: f32[1,256], index: 1, kind: input, shape index: {}]   ;;  %s113_s2 = inlined_call_operand.vmem [shape: f32[1,256], index: 2, kind: input, shape index: {}]   ;;  %s114_s0 = inlined_call_operand.vmem [shape: f32[16,256], index: 0, kind: input, shape index: {}]   ;;  %s115_s3 = inlined_call_operand.vmem [shape: f32[16,256], index: 3, kind: output, shape index: {}]  }
   0x1   :  { %v18_v2 = vld [vmem:[%s112_s1] sm:$0x3]  ;;  %v15_v7 = vld [vmem:[%s114_s0 + $0x8] sm:$0xff]  ;;  %v16_v8 = vld [vmem:[%s114_s0 + $0x10] sm:$0xff] }
   0x2   :  { %v21_v1 = vshrl.u32 %v20_v0, 7  ;;  %v34_v3 = vld [vmem:[%s113_s2] sm:$0x3]  ;;  %v17_v9 = vld [vmem:[%s114_s0 + $0x18] sm:$0xff] }
   0x3   :  { %v14_v4 = vld [vmem:[%s114_s0] sm:$0xff] }
   0x4   :  { %v22_v5 = vsub.s32 0, %v21_v1  ;;  %v26_v6 = vsub.s32 1, %v21_v1 }
   0x6   :  { %v23_v10 = vrot.slane %v18_v2, %v22_v5  ;;  %v39_v11 = vrot.slane %v34_v3, %v22_v5  ;;  %v27_v12 = vrot.slane %v18_v2, %v26_v6  ;;  %v43_v13 = vrot.slane %v34_v3, %v26_v6 }
   0x8   :  { %v30_v14 = vmul.f32 %v23_v10, %v14_v4  ;;  %v31_v15 = vmul.f32 %v27_v12, %v15_v7  ;;  %v32_v16 = vmul.f32 %v23_v10, %v16_v8  ;;  %v33_v17 = vmul.f32 %v27_v12, %v17_v9 }
   0xa   :  { %v46_v18 = vadd.f32 %v39_v11, %v30_v14  ;;  %v47_v19 = vadd.f32 %v43_v13, %v31_v15  ;;  %v48_v20 = vadd.f32 %v39_v11, %v32_v16  ;;  %v49_v21 = vadd.f32 %v43_v13, %v33_v17 }
   0xc   :  { %v50_v22 = vmax.f32 %v46_v18, 0.0  ;;  %v51_v23 = vmax.f32 %v47_v19, 0.0  ;;  %v52_v24 = vmax.f32 %v48_v20, 0.0  ;;  %v53_v25 = vmax.f32 %v49_v21, 0.0 }
   0xe   :  { %54 = vst [vmem:[%s115_s3] sm:$0xff] %v50_v22  ;;  %55 = vst [vmem:[%s115_s3 + $0x8] sm:$0xff] %v51_v23 }
   0xf   :  { %56 = vst [vmem:[%s115_s3 + $0x10] sm:$0xff] %v52_v24  ;;  %57 = vst [vmem:[%s115_s3 + $0x18] sm:$0xff] %v53_v25 }

// kernel: generator_forward.20
= control target key start
LH: loop header
LB: loop body
LE: loop exit
PB: predicated region body
PF: predicated region fallthrough
CT: control target
= control target key end

     0   :  { %v305_v1 = vmov 0   ;;  %vm92_vm0 = vcmask 261120   ;;  %s461_s1 = inlined_call_operand.vmem [shape: bf16[32,256], index: 1, kind: input, shape index: {}]   ;;  %s462_s0 = inlined_call_operand.vmem [shape: bf16[128,32], index: 0, kind: input, shape index: {}]   ;;  %s463_s2 = inlined_call_operand.vmem [shape: f32[128,256], index: 2, kind: output, shape index: {}]  }
   0x1   :  { %v291_v0 = vld [vmem:[%s461_s1 + $0x4] ss:$8 sps:$4 sm:$0xff]   ;;  %149 = vmatprep.mubr.bf16.mxu0 %v305_v1  ;;  %189 = vmatprep.mubr.bf16.mxu1 %v305_v1  ;;  %v293_v2 = vld [vmem:[%s461_s1] ss:$8 sps:$4 sm:$0xff]   ;;  %v294_v3 = vld [vmem:[%s461_s1 + $0x14] ss:$8 sps:$4 sm:$0xff]  }
   0x2   :  { %117 = vmatprep.subr.bf16.mxu0 %v291_v0  ;;  %286 = vmatprep.subr.bf16.mxu1 %v291_v0  ;;  %v296_v4 = vld [vmem:[%s461_s1 + $0x10] ss:$8 sps:$4 sm:$0xff]   ;;  %v297_v5 = vld [vmem:[%s462_s0] sm:$0xff]   ;;  %v299_v7 = vld [vmem:[%s462_s0 + $0x8] sm:$0xff]  }
   0x3   :  { %118 = vmatpush1.bf16.msra.mxu0 %v293_v2  ;;  %288 = vmatpush1.bf16.msra.mxu1 %v293_v2  ;;  %v298_v6 = vld [vmem:[%s462_s0 + $0x20] sm:$0xff]   ;;  %v300_v8 = vld [vmem:[%s462_s0 + $0x28] sm:$0xff]   ;;  %v301_v9 = vld [vmem:[%s462_s0 + $0x10] sm:$0xff]  }
   0x4   :  { %119 = vmatprep.subr.bf16.mxu0 %v294_v3  ;;  %287 = vmatprep.subr.bf16.mxu1 %v294_v3  ;;  %v302_v10 = vld [vmem:[%s462_s0 + $0x30] sm:$0xff]   ;;  %v303_v11 = vld [vmem:[%s462_s0 + $0x18] sm:$0xff]  }
   0x5   :  { %v304_v12 = vld [vmem:[%s462_s0 + $0x38] sm:$0xff]  }
   0x7   :  { %120 = vmatpush1.bf16.msra.mxu0 %v296_v4  ;;  %289 = vmatpush1.bf16.msra.mxu1 %v296_v4 }
   0xa   :  { %278 = vmatmul.mubr.msk.bf16.vlgmr.msra.gmra.mrb[0].mxu0 %vm92_vm0, %v297_v5  ;;  %282 = vmatmul.mubr.msk.bf16.vlgmr.msra.gmra.mrb[0].mxu1 %vm92_vm0, %v298_v6 }
   0xb   :  { %159 = vmatprep.mubr.bf16.mxu0 %v305_v1  ;;  %199 = vmatprep.mubr.bf16.mxu1 %v305_v1 }
  0x12   :  { %279 = vmatmul.mubr.msk.bf16.gmra.mrb[4].mxu0 %vm92_vm0, %v299_v7  ;;  %283 = vmatmul.mubr.msk.bf16.gmra.mrb[4].mxu1 %vm92_vm0, %v300_v8 }
  0x13   :  { %169 = vmatprep.mubr.bf16.mxu0 %v305_v1  ;;  %209 = vmatprep.mubr.bf16.mxu1 %v305_v1 }
  0x1a   :  { %280 = vmatmul.mubr.msk.bf16.gmra.mrb[8].mxu0 %vm92_vm0, %v301_v9  ;;  %284 = vmatmul.mubr.msk.bf16.gmra.mrb[8].mxu1 %vm92_vm0, %v302_v10 }
  0x1b   :  { %179 = vmatprep.mubr.bf16.mxu0 %v305_v1  ;;  %219 = vmatprep.mubr.bf16.mxu1 %v305_v1 }
  0x22   :  { %281 = vmatmul.mubr.msk.bf16.gmra.mrb[12].mxu0 %vm92_vm0, %v303_v11  ;;  %285 = vmatmul.mubr.msk.bf16.gmra.mrb[12].mxu1 %vm92_vm0, %v304_v12 }
  0xdd   :  { %v151_v13 = vpop.f32.mrb[0].mxu0  ;;  %v191_v14 = vpop.f32.mrb[0].mxu1 }
  0xde   :  { %230 = vst [vmem:[%s463_s2] sm:$0xff] %v151_v13  ;;  %246 = vst [vmem:[%s463_s2 + $0x80] sm:$0xff] %v191_v14  ;;  %v153_v15 = vpop.f32.mrb[1].mxu0  ;;  %v193_v16 = vpop.f32.mrb[1].mxu1 }
  0xdf   :  { %231 = vst [vmem:[%s463_s2 + $0x8] sm:$0xff] %v153_v15  ;;  %247 = vst [vmem:[%s463_s2 + $0x88] sm:$0xff] %v193_v16  ;;  %v155_v17 = vpop.f32.mrb[2].mxu0  ;;  %v195_v18 = vpop.f32.mrb[2].mxu1 }
  0xe0   :  { %232 = vst [vmem:[%s463_s2 + $0x10] sm:$0xff] %v155_v17  ;;  %248 = vst [vmem:[%s463_s2 + $0x90] sm:$0xff] %v195_v18  ;;  %v157_v19 = vpop.f32.mrb[3].mxu0  ;;  %v197_v20 = vpop.f32.mrb[3].mxu1 }
  0xe1   :  { %233 = vst [vmem:[%s463_s2 + $0x18] sm:$0xff] %v157_v19  ;;  %249 = vst [vmem:[%s463_s2 + $0x98] sm:$0xff] %v197_v20 }
  0xe5   :  { %v161_v21 = vpop.f32.mrb[4].mxu0  ;;  %v201_v22 = vpop.f32.mrb[4].mxu1 }
  0xe6   :  { %234 = vst [vmem:[%s463_s2 + $0x20] sm:$0xff] %v161_v21  ;;  %250 = vst [vmem:[%s463_s2 + $0xa0] sm:$0xff] %v201_v22  ;;  %v163_v23 = vpop.f32.mrb[5].mxu0  ;;  %v203_v24 = vpop.f32.mrb[5].mxu1 }
  0xe7   :  { %235 = vst [vmem:[%s463_s2 + $0x28] sm:$0xff] %v163_v23  ;;  %251 = vst [vmem:[%s463_s2 + $0xa8] sm:$0xff] %v203_v24  ;;  %v165_v25 = vpop.f32.mrb[6].mxu0  ;;  %v205_v26 = vpop.f32.mrb[6].mxu1 }
  0xe8   :  { %236 = vst [vmem:[%s463_s2 + $0x30] sm:$0xff] %v165_v25  ;;  %252 = vst [vmem:[%s463_s2 + $0xb0] sm:$0xff] %v205_v26  ;;  %v167_v27 = vpop.f32.mrb[7].mxu0  ;;  %v207_v28 = vpop.f32.mrb[7].mxu1 }
  0xe9   :  { %237 = vst [vmem:[%s463_s2 + $0x38] sm:$0xff] %v167_v27  ;;  %253 = vst [vmem:[%s463_s2 + $0xb8] sm:$0xff] %v207_v28 }
  0xed   :  { %v171_v29 = vpop.f32.mrb[8].mxu0  ;;  %v211_v30 = vpop.f32.mrb[8].mxu1 }
  0xee   :  { %238 = vst [vmem:[%s463_s2 + $0x40] sm:$0xff] %v171_v29  ;;  %254 = vst [vmem:[%s463_s2 + $0xc0] sm:$0xff] %v211_v30  ;;  %v173_v31 = vpop.f32.mrb[9].mxu0  ;;  %v213_v32 = vpop.f32.mrb[9].mxu1 }
  0xef   :  { %239 = vst [vmem:[%s463_s2 + $0x48] sm:$0xff] %v173_v31  ;;  %255 = vst [vmem:[%s463_s2 + $0xc8] sm:$0xff] %v213_v32  ;;  %v175_v33 = vpop.f32.mrb[10].mxu0  ;;  %v215_v34 = vpop.f32.mrb[10].mxu1 }
  0xf0   :  { %240 = vst [vmem:[%s463_s2 + $0x50] sm:$0xff] %v175_v33  ;;  %256 = vst [vmem:[%s463_s2 + $0xd0] sm:$0xff] %v215_v34  ;;  %v177_v35 = vpop.f32.mrb[11].mxu0  ;;  %v217_v36 = vpop.f32.mrb[11].mxu1 }
  0xf1   :  { %241 = vst [vmem:[%s463_s2 + $0x58] sm:$0xff] %v177_v35  ;;  %257 = vst [vmem:[%s463_s2 + $0xd8] sm:$0xff] %v217_v36 }
  0xf5   :  { %v181_v37 = vpop.f32.mrb[12].mxu0  ;;  %v221_v38 = vpop.f32.mrb[12].mxu1 }
  0xf6   :  { %242 = vst [vmem:[%s463_s2 + $0x60] sm:$0xff] %v181_v37  ;;  %258 = vst [vmem:[%s463_s2 + $0xe0] sm:$0xff] %v221_v38  ;;  %v183_v39 = vpop.f32.mrb[13].mxu0  ;;  %v223_v40 = vpop.f32.mrb[13].mxu1 }
  0xf7   :  { %243 = vst [vmem:[%s463_s2 + $0x68] sm:$0xff] %v183_v39  ;;  %259 = vst [vmem:[%s463_s2 + $0xe8] sm:$0xff] %v223_v40  ;;  %v185_v41 = vpop.f32.mrb[14].mxu0  ;;  %v225_v42 = vpop.f32.mrb[14].mxu1 }
  0xf8   :  { %244 = vst [vmem:[%s463_s2 + $0x70] sm:$0xff] %v185_v41  ;;  %260 = vst [vmem:[%s463_s2 + $0xf0] sm:$0xff] %v225_v42  ;;  %v187_v43 = vpop.f32.mrb[15].mxu0  ;;  %v227_v44 = vpop.f32.mrb[15].mxu1 }
  0xf9   :  { %245 = vst [vmem:[%s463_s2 + $0x78] sm:$0xff] %v187_v43  ;;  %261 = vst [vmem:[%s463_s2 + $0xf8] sm:$0xff] %v227_v44 }

// kernel: tile.63
= control target key start
LH: loop header
LB: loop body
LE: loop exit
PB: predicated region body
PF: predicated region fallthrough
CT: control target
= control target key end

     0   :  { %s28_s0 = inlined_call_operand.vmem [shape: f32[16], index: 0, kind: input, shape index: {}]   ;;  %s29_s1 = inlined_call_operand.vmem [shape: f32[16,16], index: 1, kind: output, shape index: {}]  }
   0x1   :  { %v4_v0 = vld [vmem:[%s28_s0] ss:$0 sm:$0xff] }
   0x2   :  { %5 = vst [vmem:[%s29_s1] sm:$0xff] %v4_v0  ;;  %8 = vst [vmem:[%s29_s1 + $0x8] sm:$0xff] %v4_v0 }

// kernel: tile.68
= control target key start
LH: loop header
LB: loop body
LE: loop exit
PB: predicated region body
PF: predicated region fallthrough
CT: control target
= control target key end

     0   :  { %s7_s6 = smov 3  ;;  %s21_s9 = smov 3  ;;  %vm4_vm0 = vcmask 130048   ;;  %vm11_vm1 = vcmask 1048448   ;;  %vm18_vm2 = vcmask 917248   ;;  %vm25_vm3 = vcmask 786048   ;;  %s128_s0 = inlined_call_operand.vmem [shape: f32[16,16], index: 0, kind: input, shape index: {}]   ;;  %s129_s1 = inlined_call_operand.vmem [shape: f32[1,256], index: 1, kind: output, shape index: {}]  }
   0x1   :  { %v66_v0 = vld [vmem:[%s128_s0 + $0x7] ss:$8 sm:%s7_s6]   ;;  %s81_s10 = smov 112   ;;  %v68_v1 = vld [vmem:[%s128_s0 + $0x5] ss:$8 sm:%s21_s9]   ;;  %s14_s13 = smov 3 }
   0x2   :  { %9 = vrot.lane.b32.xlu0 %v66_v0, %s81_s10  ;;  %s82_s14 = smov 80   ;;  %v67_v2 = vld [vmem:[%s128_s0 + $0x6] ss:$8 sm:%s14_s13]   ;;  %s28_s17 = smov 3  ;;  %vm32_vm4 = vcmask 654848   ;;  %vm39_vm5 = vcmask 523648  }
   0x3   :  { %23 = vrot.lane.b32.xlu1 %v68_v1, %s82_s14  ;;  %v69_v3 = vld [vmem:[%s128_s0 + $0x4] ss:$8 sm:%s28_s17]   ;;  %s35_s20 = smov 3  ;;  %s42_s21 = smov 3  ;;  %vm46_vm6 = vcmask 392448   ;;  %vm53_vm7 = vcmask 261248  }
   0x4   :  { %s83_s22 = smov 96   ;;  %s84_s23 = smov 64   ;;  %v70_v4 = vld [vmem:[%s128_s0 + $0x3] ss:$8 sm:%s35_s20]   ;;  %v71_v5 = vld [vmem:[%s128_s0 + $0x2] ss:$8 sm:%s42_s21]  }
   0x5   :  { %s2_s26 = smov 3  ;;  %s49_s29 = smov 3 }
   0x6   :  { %16 = vrot.lane.b32.xlu0 %v67_v2, %s83_s22  ;;  %v3_v6 = vld [vmem:[%s128_s0] ss:$8 sm:%s2_s26]   ;;  %s85_s3 = smov 48   ;;  %s86_s4 = smov 32  }
   0x7   :  { %30 = vrot.lane.b32.xlu1 %v69_v3, %s84_s23  ;;  %5 = vst.msk [vmem:[#allocation0] ss:$8 sm:$0x3] %vm4_vm0, %v3_v6   ;;  %v72_v7 = vld [vmem:[%s128_s0 + $0x1] ss:$8 sm:%s49_s29]   ;;  %s87_s0 = smov 16  }
   0xa   :  { %37 = vrot.lane.b32.xlu0 %v70_v4, %s85_s3 }
   0xb   :  { %44 = vrot.lane.b32.xlu1 %v71_v5, %s86_s4 }
   0xe   :  { %51 = vrot.lane.b32.xlu0 %v72_v7, %s87_s0 }
  0x74   :  { %v10_v8 = vpop.permute.xlu0 %9  }
  0x75   :  { %12 = vst.msk [vmem:[#allocation0] ss:$8 sm:$0x3] %vm11_vm1, %v10_v8   ;;  %v24_v9 = vpop.permute.xlu1 %23  }
  0x78   :  { %v17_v10 = vpop.permute.xlu0 %16  }
  0x79   :  { %19 = vst.msk [vmem:[#allocation0] ss:$8 sm:$0x3] %vm18_vm2, %v17_v10   ;;  %v31_v11 = vpop.permute.xlu1 %30  }
  0x7a   :  { %26 = vst.msk [vmem:[#allocation0] ss:$8 sm:$0x3] %vm25_vm3, %v24_v9  }
  0x7b   :  { %33 = vst.msk [vmem:[#allocation0] ss:$8 sm:$0x3] %vm32_vm4, %v31_v11  }
  0x7c   :  { %v38_v12 = vpop.permute.xlu0 %37  }
  0x7d   :  { %40 = vst.msk [vmem:[#allocation0] ss:$8 sm:$0x3] %vm39_vm5, %v38_v12   ;;  %v45_v13 = vpop.permute.xlu1 %44  }
  0x7e   :  { %47 = vst.msk [vmem:[#allocation0] ss:$8 sm:$0x3] %vm46_vm6, %v45_v13  }
  0x80   :  { %v52_v14 = vpop.permute.xlu0 %51  }
  0x81   :  { %54 = vst.msk [vmem:[#allocation0] ss:$8 sm:$0x3] %vm53_vm7, %v52_v14  }
  0x88   :  { %v58_v15 = vld [vmem:[#allocation0] sm:$0x1]  ;;  %v62_v16 = vld [vmem:[#allocation0 + $0x8] sm:$0x1] }
  0x89   :  { %60 = vst [vmem:[%s129_s1] sm:$0x1] %v58_v15  ;;  %73 = vst [vmem:[%s129_s1 + $0x1] sm:$0x1] %v62_v16 }

// kernel: generator_forward.21
= control target key start
LH: loop header
LB: loop body
LE: loop exit
PB: predicated region body
PF: predicated region fallthrough
CT: control target
= control target key end

     0   :  { %v14_v0 = vlaneseq  ;;  %v128_v10 = vmov 0.0   ;;  %v129_v35 = vmov 1966171168   ;;  %s199_s0 = inlined_call_operand.vmem [shape: f32[32,256], index: 0, kind: input, shape index: {}]   ;;  %s200_s1 = inlined_call_operand.vmem [shape: f32[1,256], index: 1, kind: output, shape index: {0}]   ;;  %s201_s2 = inlined_call_operand.vmem [shape: f32[1,256], index: 2, kind: output, shape index: {1}]  }
   0x1   :  { %v20_v1 = vld [vmem:[%s199_s0] sm:$0xff]  ;;  %v21_v2 = vld [vmem:[%s199_s0 + $0x8] sm:$0xff]  ;;  %v22_v3 = vld [vmem:[%s199_s0 + $0x10] sm:$0xff]  ;;  %v51_v36 = vunpack.c.l.s4 %v129_v35 }
   0x2   :  { %vm154_vm0 = vcmp.lt.s32.totalorder %v14_v0, 256  ;;  %v23_v5 = vld [vmem:[%s199_s0 + $0x18] sm:$0xff]  ;;  %v24_v6 = vld [vmem:[%s199_s0 + $0x20] sm:$0xff]  ;;  %v25_v7 = vld [vmem:[%s199_s0 + $0x28] sm:$0xff]  ;;  %v29_v8 = vadd.f32 %v22_v3, %v20_v1  ;;  %v72_v9 = vmul.f32 %v20_v1, %v20_v1  ;;  %v73_v14 = vmul.f32 %v21_v2, %v21_v2 }
   0x3   :  { %18 = vst.msk [vmem:[%s200_s1] sm:$0x3] %vm154_vm0, %v128_v10  ;;  %v26_v11 = vld [vmem:[%s199_s0 + $0x30] sm:$0xff]  ;;  %v27_v12 = vld [vmem:[%s199_s0 + $0x38] sm:$0xff]  ;;  %v38_v13 = vadd.f32 %v23_v5, %v21_v2  ;;  %19 = vst.msk [vmem:[%s201_s2] sm:$0x3] %vm154_vm0, %v128_v10  ;;  %v74_v15 = vmul.f32 %v22_v3, %v22_v3  ;;  %v75_v17 = vmul.f32 %v23_v5, %v23_v5  ;;  %v52_v45 = vunpack.c.0.s8 %v51_v36 }
   0x4   :  { %v30_v16 = vadd.f32 %v29_v8, %v24_v6  ;;  %v76_v18 = vmul.f32 %v24_v6, %v24_v6  ;;  %v77_v19 = vmul.f32 %v25_v7, %v25_v7  ;;  %v78_v21 = vmul.f32 %v26_v11, %v26_v11 }
   0x5   :  { %v39_v20 = vadd.f32 %v38_v13, %v25_v7  ;;  %v79_v23 = vmul.f32 %v27_v12, %v27_v12  ;;  %v80_v24 = vadd.f32 %v74_v15, %v72_v9  ;;  %v89_v25 = vadd.f32 %v75_v17, %v73_v14 }
   0x6   :  { %v31_v22 = vadd.f32 %v30_v16, %v26_v11  ;;  %v54_v46 = vshrl.u32 %v14_v0, 7 }
   0x7   :  { %v40_v26 = vadd.f32 %v39_v20, %v27_v12  ;;  %v81_v28 = vadd.f32 %v80_v24, %v76_v18  ;;  %v90_v29 = vadd.f32 %v89_v25, %v77_v19 }
   0x8   :  { %v32_v27 = vrot.slane %v31_v22, 4  ;;  %v55_v55 = vsub.s32 %v52_v45, %v54_v46 }
   0x9   :  { %v41_v30 = vrot.slane %v40_v26, 4  ;;  %v82_v32 = vadd.f32 %v81_v28, %v78_v21  ;;  %v91_v33 = vadd.f32 %v90_v29, %v79_v23 }
   0xa   :  { %v33_v31 = vadd.f32 %v32_v27, %v31_v22  ;;  %v28_v62 = vld [vmem:[%s200_s1] sm:$0x3] }
   0xb   :  { %v42_v34 = vadd.f32 %v41_v30, %v40_v26  ;;  %v83_v38 = vrot.slane %v82_v32, 4  ;;  %v92_v39 = vrot.slane %v91_v33, 4  ;;  %v71_v3 = vld [vmem:[%s201_s2] sm:$0x3] }
   0xc   :  { %v34_v37 = vrot.slane %v33_v31, 2 }
   0xd   :  { %v43_v40 = vrot.slane %v42_v34, 2  ;;  %v84_v42 = vadd.f32 %v83_v38, %v82_v32  ;;  %v93_v43 = vadd.f32 %v92_v39, %v91_v33 }
   0xe   :  { %v35_v41 = vadd.f32 %v34_v37, %v33_v31 }
   0xf   :  { %v44_v44 = vadd.f32 %v43_v40, %v42_v34  ;;  %v85_v48 = vrot.slane %v84_v42, 2  ;;  %v94_v49 = vrot.slane %v93_v43, 2 }
  0x10   :  { %v36_v47 = vrot.slane %v35_v41, 1 }
  0x11   :  { %v45_v50 = vrot.slane %v44_v44, 1  ;;  %v86_v52 = vadd.f32 %v85_v48, %v84_v42  ;;  %v95_v53 = vadd.f32 %v94_v49, %v93_v43 }
  0x12   :  { %v37_v51 = vadd.f32 %v36_v47, %v35_v41 }
  0x13   :  { %v46_v54 = vadd.f32 %v45_v50, %v44_v44  ;;  %v87_v56 = vrot.slane %v86_v52, 1  ;;  %v96_v57 = vrot.slane %v95_v53, 1 }
  0x15   :  { %v49_v58 = vcombine.low %v37_v51, %v46_v54  ;;  %v88_v59 = vadd.f32 %v87_v56, %v86_v52  ;;  %v97_v60 = vadd.f32 %v96_v57, %v95_v53 }
  0x17   :  { %v56_v61 = vrot.slane %v49_v58, %v55_v55  ;;  %v100_v63 = vcombine.low %v88_v59, %v97_v60 }
  0x19   :  { %v63_v0 = vrot.slane %v56_v61, %v55_v55  ;;  %v107_v1 = vrot.slane %v100_v63, %v55_v55 }
  0x1b   :  { %v65_v2 = vadd.f32 %v63_v0, %v28_v62  ;;  %v114_v5 = vrot.slane %v107_v1, %v55_v55 }
  0x1d   :  { %70 = vst.msk [vmem:[%s200_s1] sm:$0x3] %vm154_vm0, %v65_v2  ;;  %v116_v6 = vadd.f32 %v114_v5, %v71_v3 }
  0x1f   :  { %117 = vst.msk [vmem:[%s201_s2] sm:$0x3] %vm154_vm0, %v116_v6 }

// kernel: generator_forward.22
= control target key start
LH: loop header
LB: loop body
LE: loop exit
PB: predicated region body
PF: predicated region fallthrough
CT: control target
= control target key end

     0   :  { %v24_v0 = vlaneseq  ;;  %s156_s1 = inlined_call_operand.vmem [shape: f32[1,256], index: 1, kind: input, shape index: {}]   ;;  %s157_s2 = inlined_call_operand.vmem [shape: f32[1,256], index: 2, kind: input, shape index: {}]   ;;  %s158_s0 = inlined_call_operand.vmem [shape: f32[32,256], index: 0, kind: input, shape index: {}]   ;;  %s159_s3 = inlined_call_operand.vmem [shape: f32[32,256], index: 3, kind: output, shape index: {}]  }
   0x1   :  { %v22_v2 = vld [vmem:[%s156_s1] sm:$0x3]  ;;  %v15_v6 = vld [vmem:[%s158_s0 + $0x8] sm:$0xff]  ;;  %v16_v8 = vld [vmem:[%s158_s0 + $0x10] sm:$0xff] }
   0x2   :  { %v25_v1 = vshrl.u32 %v24_v0, 7  ;;  %v42_v3 = vld [vmem:[%s157_s2] sm:$0x3]  ;;  %v17_v9 = vld [vmem:[%s158_s0 + $0x18] sm:$0xff]  ;;  %v19_v15 = vld [vmem:[%s158_s0 + $0x28] sm:$0xff] }
   0x3   :  { %v14_v4 = vld [vmem:[%s158_s0] sm:$0xff]  ;;  %v20_v16 = vld [vmem:[%s158_s0 + $0x30] sm:$0xff]  ;;  %v21_v17 = vld [vmem:[%s158_s0 + $0x38] sm:$0xff] }
   0x4   :  { %v26_v5 = vsub.s32 0, %v25_v1  ;;  %v30_v7 = vsub.s32 1, %v25_v1  ;;  %v18_v10 = vld [vmem:[%s158_s0 + $0x20] sm:$0xff] }
   0x6   :  { %v27_v11 = vrot.slane %v22_v2, %v26_v5  ;;  %v47_v12 = vrot.slane %v42_v3, %v26_v5  ;;  %v31_v13 = vrot.slane %v22_v2, %v30_v7  ;;  %v51_v14 = vrot.slane %v42_v3, %v30_v7 }
   0x8   :  { %v34_v18 = vmul.f32 %v27_v11, %v14_v4  ;;  %v35_v19 = vmul.f32 %v31_v13, %v15_v6  ;;  %v36_v20 = vmul.f32 %v27_v11, %v16_v8  ;;  %v37_v21 = vmul.f32 %v31_v13, %v17_v9 }
   0x9   :  { %v38_v22 = vmul.f32 %v27_v11, %v18_v10  ;;  %v39_v23 = vmul.f32 %v31_v13, %v19_v15  ;;  %v40_v24 = vmul.f32 %v27_v11, %v20_v16  ;;  %v41_v25 = vmul.f32 %v31_v13, %v21_v17 }
   0xa   :  { %v54_v26 = vadd.f32 %v47_v12, %v34_v18  ;;  %v55_v27 = vadd.f32 %v51_v14, %v35_v19  ;;  %v56_v28 = vadd.f32 %v47_v12, %v36_v20  ;;  %v57_v29 = vadd.f32 %v51_v14, %v37_v21 }
   0xb   :  { %v58_v30 = vadd.f32 %v47_v12, %v38_v22  ;;  %v59_v31 = vadd.f32 %v51_v14, %v39_v23  ;;  %v60_v32 = vadd.f32 %v47_v12, %v40_v24  ;;  %v61_v33 = vadd.f32 %v51_v14, %v41_v25 }
   0xc   :  { %v62_v34 = vmax.f32 %v54_v26, 0.0  ;;  %v63_v35 = vmax.f32 %v55_v27, 0.0  ;;  %v64_v36 = vmax.f32 %v56_v28, 0.0  ;;  %v65_v37 = vmax.f32 %v57_v29, 0.0 }
   0xd   :  { %v66_v38 = vmax.f32 %v58_v30, 0.0  ;;  %v67_v39 = vmax.f32 %v59_v31, 0.0  ;;  %v68_v40 = vmax.f32 %v60_v32, 0.0  ;;  %v69_v41 = vmax.f32 %v61_v33, 0.0 }
   0xe   :  { %70 = vst [vmem:[%s159_s3] sm:$0xff] %v62_v34  ;;  %71 = vst [vmem:[%s159_s3 + $0x8] sm:$0xff] %v63_v35 }
   0xf   :  { %72 = vst [vmem:[%s159_s3 + $0x10] sm:$0xff] %v64_v36  ;;  %73 = vst [vmem:[%s159_s3 + $0x18] sm:$0xff] %v65_v37 }
  0x10   :  { %74 = vst [vmem:[%s159_s3 + $0x20] sm:$0xff] %v66_v38  ;;  %75 = vst [vmem:[%s159_s3 + $0x28] sm:$0xff] %v67_v39 }
  0x11   :  { %76 = vst [vmem:[%s159_s3 + $0x30] sm:$0xff] %v68_v40  ;;  %77 = vst [vmem:[%s159_s3 + $0x38] sm:$0xff] %v69_v41 }

// kernel: generator_forward.23
= control target key start
LH: loop header
LB: loop body
LE: loop exit
PB: predicated region body
PF: predicated region fallthrough
CT: control target
= control target key end

     0   :  { %v934_v1 = vmov 0   ;;  %vm248_vm0 = vcmask 130048   ;;  %s1500_s1 = inlined_call_operand.vmem [shape: bf16[16,256], index: 1, kind: input, shape index: {}]   ;;  %s1501_s0 = inlined_call_operand.vmem [shape: bf16[512,16], index: 0, kind: input, shape index: {}]   ;;  %s1502_s2 = inlined_call_operand.vmem [shape: f32[512,256], index: 2, kind: output, shape index: {}]  }
   0x1   :  { %v899_v0 = vld [vmem:[%s1500_s1 + $0x4] ss:$8 sps:$4 sm:$0xff]   ;;  %377 = vmatprep.mubr.bf16.mxu0 %v934_v1  ;;  %537 = vmatprep.mubr.bf16.mxu1 %v934_v1  ;;  %v901_v2 = vld [vmem:[%s1500_s1] ss:$8 sps:$4 sm:$0xff]   ;;  %v906_v7 = vld [vmem:[%s1501_s0 + $0x10] sm:$0xff]  }
   0x2   :  { %345 = vmatprep.subr.bf16.mxu0 %v899_v0  ;;  %896 = vmatprep.subr.bf16.mxu1 %v899_v0  ;;  %v902_v3 = vld [vmem:[%s1501_s0] sm:$0xff]   ;;  %v904_v5 = vld [vmem:[%s1501_s0 + $0x8] sm:$0xff]   ;;  %v907_v8 = vld [vmem:[%s1501_s0 + $0x90] sm:$0xff]  }
   0x3   :  { %346 = vmatpush1.bf16.msra.mxu0 %v901_v2  ;;  %897 = vmatpush1.bf16.msra.mxu1 %v901_v2  ;;  %v903_v4 = vld [vmem:[%s1501_s0 + $0x80] sm:$0xff]   ;;  %v905_v6 = vld [vmem:[%s1501_s0 + $0x88] sm:$0xff]   ;;  %v908_v9 = vld [vmem:[%s1501_s0 + $0x18] sm:$0xff]  }
   0x4   :  { %v909_v10 = vld [vmem:[%s1501_s0 + $0x98] sm:$0xff]   ;;  %v910_v11 = vld [vmem:[%s1501_s0 + $0x20] sm:$0xff]   ;;  %v912_v13 = vld [vmem:[%s1501_s0 + $0x28] sm:$0xff]  }
   0x5   :  { %v911_v12 = vld [vmem:[%s1501_s0 + $0xa0] sm:$0xff]   ;;  %v913_v14 = vld [vmem:[%s1501_s0 + $0xa8] sm:$0xff]   ;;  %v914_v15 = vld [vmem:[%s1501_s0 + $0x30] sm:$0xff]  }
   0x6   :  { %864 = vmatmul.mubr.msk.bf16.vlgmr.msra.gmra.mrb[0].mxu0 %vm248_vm0, %v902_v3  ;;  %880 = vmatmul.mubr.msk.bf16.vlgmr.msra.gmra.mrb[0].mxu1 %vm248_vm0, %v903_v4  ;;  %v915_v16 = vld [vmem:[%s1501_s0 + $0xb0] sm:$0xff]   ;;  %v916_v17 = vld [vmem:[%s1501_s0 + $0x38] sm:$0xff]   ;;  %v918_v19 = vld [vmem:[%s1501_s0 + $0x40] sm:$0xff]  }
   0x7   :  { %387 = vmatprep.mubr.bf16.mxu0 %v934_v1  ;;  %547 = vmatprep.mubr.bf16.mxu1 %v934_v1  ;;  %v917_v18 = vld [vmem:[%s1501_s0 + $0xb8] sm:$0xff]   ;;  %v919_v20 = vld [vmem:[%s1501_s0 + $0xc0] sm:$0xff]   ;;  %v920_v21 = vld [vmem:[%s1501_s0 + $0x48] sm:$0xff]  }
   0x8   :  { %v921_v22 = vld [vmem:[%s1501_s0 + $0xc8] sm:$0xff]   ;;  %v922_v23 = vld [vmem:[%s1501_s0 + $0x50] sm:$0xff]   ;;  %v924_v25 = vld [vmem:[%s1501_s0 + $0x58] sm:$0xff]  }
   0x9   :  { %v923_v24 = vld [vmem:[%s1501_s0 + $0xd0] sm:$0xff]   ;;  %v925_v26 = vld [vmem:[%s1501_s0 + $0xd8] sm:$0xff]   ;;  %v926_v27 = vld [vmem:[%s1501_s0 + $0x60] sm:$0xff]  }
   0xa   :  { %v927_v28 = vld [vmem:[%s1501_s0 + $0xe0] sm:$0xff]   ;;  %v928_v29 = vld [vmem:[%s1501_s0 + $0x68] sm:$0xff]   ;;  %v930_v31 = vld [vmem:[%s1501_s0 + $0x70] sm:$0xff]  }
   0xb   :  { %v929_v30 = vld [vmem:[%s1501_s0 + $0xe8] sm:$0xff]   ;;  %v931_v32 = vld [vmem:[%s1501_s0 + $0xf0] sm:$0xff]   ;;  %v932_v33 = vld [vmem:[%s1501_s0 + $0x78] sm:$0xff]  }
   0xc   :  { %v933_v34 = vld [vmem:[%s1501_s0 + $0xf8] sm:$0xff]  }
   0xe   :  { %865 = vmatmul.mubr.msk.bf16.gmra.mrb[4].mxu0 %vm248_vm0, %v904_v5  ;;  %881 = vmatmul.mubr.msk.bf16.gmra.mrb[4].mxu1 %vm248_vm0, %v905_v6 }
   0xf   :  { %397 = vmatprep.mubr.bf16.mxu0 %v934_v1  ;;  %557 = vmatprep.mubr.bf16.mxu1 %v934_v1 }
  0x16   :  { %866 = vmatmul.mubr.msk.bf16.gmra.mrb[8].mxu0 %vm248_vm0, %v906_v7  ;;  %882 = vmatmul.mubr.msk.bf16.gmra.mrb[8].mxu1 %vm248_vm0, %v907_v8 }
  0x17   :  { %407 = vmatprep.mubr.bf16.mxu0 %v934_v1  ;;  %567 = vmatprep.mubr.bf16.mxu1 %v934_v1 }
  0x1e   :  { %867 = vmatmul.mubr.msk.bf16.gmra.mrb[12].mxu0 %vm248_vm0, %v908_v9  ;;  %883 = vmatmul.mubr.msk.bf16.gmra.mrb[12].mxu1 %vm248_vm0, %v909_v10 }
  0x1f   :  { %417 = vmatprep.mubr.bf16.mxu0 %v934_v1  ;;  %577 = vmatprep.mubr.bf16.mxu1 %v934_v1 }
  0x26   :  { %868 = vmatmul.mubr.msk.bf16.gmra.mrb[16].mxu0 %vm248_vm0, %v910_v11  ;;  %884 = vmatmul.mubr.msk.bf16.gmra.mrb[16].mxu1 %vm248_vm0, %v911_v12 }
  0x27   :  { %427 = vmatprep.mubr.bf16.mxu0 %v934_v1  ;;  %587 = vmatprep.mubr.bf16.mxu1 %v934_v1 }
  0x2e   :  { %869 = vmatmul.mubr.msk.bf16.gmra.mrb[20].mxu0 %vm248_vm0, %v912_v13  ;;  %885 = vmatmul.mubr.msk.bf16.gmra.mrb[20].mxu1 %vm248_vm0, %v913_v14 }
  0x2f   :  { %437 = vmatprep.mubr.bf16.mxu0 %v934_v1  ;;  %597 = vmatprep.mubr.bf16.mxu1 %v934_v1 }
  0x36   :  { %870 = vmatmul.mubr.msk.bf16.gmra.mrb[24].mxu0 %vm248_vm0, %v914_v15  ;;  %886 = vmatmul.mubr.msk.bf16.gmra.mrb[24].mxu1 %vm248_vm0, %v915_v16 }
  0x37   :  { %447 = vmatprep.mubr.bf16.mxu0 %v934_v1  ;;  %607 = vmatprep.mubr.bf16.mxu1 %v934_v1 }
  0x3e   :  { %871 = vmatmul.mubr.msk.bf16.gmra.mrb[28].mxu0 %vm248_vm0, %v916_v17  ;;  %887 = vmatmul.mubr.msk.bf16.gmra.mrb[28].mxu1 %vm248_vm0, %v917_v18 }
  0x3f   :  { %457 = vmatprep.mubr.bf16.mxu0 %v934_v1  ;;  %617 = vmatprep.mubr.bf16.mxu1 %v934_v1 }
  0x46   :  { %872 = vmatmul.mubr.msk.bf16.gmra.mrb[32].mxu0 %vm248_vm0, %v918_v19  ;;  %888 = vmatmul.mubr.msk.bf16.gmra.mrb[32].mxu1 %vm248_vm0, %v919_v20 }
  0x47   :  { %467 = vmatprep.mubr.bf16.mxu0 %v934_v1  ;;  %627 = vmatprep.mubr.bf16.mxu1 %v934_v1 }
  0x4e   :  { %873 = vmatmul.mubr.msk.bf16.gmra.mrb[36].mxu0 %vm248_vm0, %v920_v21  ;;  %889 = vmatmul.mubr.msk.bf16.gmra.mrb[36].mxu1 %vm248_vm0, %v921_v22 }
  0x4f   :  { %477 = vmatprep.mubr.bf16.mxu0 %v934_v1  ;;  %637 = vmatprep.mubr.bf16.mxu1 %v934_v1 }
  0x56   :  { %874 = vmatmul.mubr.msk.bf16.gmra.mrb[40].mxu0 %vm248_vm0, %v922_v23  ;;  %890 = vmatmul.mubr.msk.bf16.gmra.mrb[40].mxu1 %vm248_vm0, %v923_v24 }
  0x57   :  { %487 = vmatprep.mubr.bf16.mxu0 %v934_v1  ;;  %647 = vmatprep.mubr.bf16.mxu1 %v934_v1 }
  0x5e   :  { %875 = vmatmul.mubr.msk.bf16.gmra.mrb[44].mxu0 %vm248_vm0, %v924_v25  ;;  %891 = vmatmul.mubr.msk.bf16.gmra.mrb[44].mxu1 %vm248_vm0, %v925_v26 }
  0x5f   :  { %497 = vmatprep.mubr.bf16.mxu0 %v934_v1  ;;  %657 = vmatprep.mubr.bf16.mxu1 %v934_v1 }
  0x66   :  { %876 = vmatmul.mubr.msk.bf16.gmra.mrb[48].mxu0 %vm248_vm0, %v926_v27  ;;  %892 = vmatmul.mubr.msk.bf16.gmra.mrb[48].mxu1 %vm248_vm0, %v927_v28 }
  0x67   :  { %507 = vmatprep.mubr.bf16.mxu0 %v934_v1  ;;  %667 = vmatprep.mubr.bf16.mxu1 %v934_v1 }
  0x6e   :  { %877 = vmatmul.mubr.msk.bf16.gmra.mrb[52].mxu0 %vm248_vm0, %v928_v29  ;;  %893 = vmatmul.mubr.msk.bf16.gmra.mrb[52].mxu1 %vm248_vm0, %v929_v30 }
  0x6f   :  { %517 = vmatprep.mubr.bf16.mxu0 %v934_v1  ;;  %677 = vmatprep.mubr.bf16.mxu1 %v934_v1 }
  0x76   :  { %878 = vmatmul.mubr.msk.bf16.gmra.mrb[56].mxu0 %vm248_vm0, %v930_v31  ;;  %894 = vmatmul.mubr.msk.bf16.gmra.mrb[56].mxu1 %vm248_vm0, %v931_v32 }
  0x77   :  { %527 = vmatprep.mubr.bf16.mxu0 %v934_v1  ;;  %687 = vmatprep.mubr.bf16.mxu1 %v934_v1 }
  0x7e   :  { %879 = vmatmul.mubr.msk.bf16.gmra.mrb[60].mxu0 %vm248_vm0, %v932_v33  ;;  %895 = vmatmul.mubr.msk.bf16.gmra.mrb[60].mxu1 %vm248_vm0, %v933_v34 }
  0xd9   :  { %v379_v35 = vpop.f32.mrb[0].mxu0  ;;  %v539_v36 = vpop.f32.mrb[0].mxu1 }
  0xda   :  { %698 = vst [vmem:[%s1502_s2] sm:$0xff] %v379_v35  ;;  %762 = vst [vmem:[%s1502_s2 + $0x200] sm:$0xff] %v539_v36  ;;  %v381_v37 = vpop.f32.mrb[1].mxu0  ;;  %v541_v38 = vpop.f32.mrb[1].mxu1 }
  0xdb   :  { %699 = vst [vmem:[%s1502_s2 + $0x8] sm:$0xff] %v381_v37  ;;  %763 = vst [vmem:[%s1502_s2 + $0x208] sm:$0xff] %v541_v38  ;;  %v383_v39 = vpop.f32.mrb[2].mxu0  ;;  %v543_v40 = vpop.f32.mrb[2].mxu1 }
  0xdc   :  { %700 = vst [vmem:[%s1502_s2 + $0x10] sm:$0xff] %v383_v39  ;;  %764 = vst [vmem:[%s1502_s2 + $0x210] sm:$0xff] %v543_v40  ;;  %v385_v41 = vpop.f32.mrb[3].mxu0  ;;  %v545_v42 = vpop.f32.mrb[3].mxu1 }
  0xdd   :  { %701 = vst [vmem:[%s1502_s2 + $0x18] sm:$0xff] %v385_v41  ;;  %765 = vst [vmem:[%s1502_s2 + $0x218] sm:$0xff] %v545_v42 }
  0xe1   :  { %v389_v43 = vpop.f32.mrb[4].mxu0  ;;  %v549_v44 = vpop.f32.mrb[4].mxu1 }
  0xe2   :  { %702 = vst [vmem:[%s1502_s2 + $0x20] sm:$0xff] %v389_v43  ;;  %766 = vst [vmem:[%s1502_s2 + $0x220] sm:$0xff] %v549_v44  ;;  %v391_v45 = vpop.f32.mrb[5].mxu0  ;;  %v551_v46 = vpop.f32.mrb[5].mxu1 }
  0xe3   :  { %703 = vst [vmem:[%s1502_s2 + $0x28] sm:$0xff] %v391_v45  ;;  %767 = vst [vmem:[%s1502_s2 + $0x228] sm:$0xff] %v551_v46  ;;  %v393_v47 = vpop.f32.mrb[6].mxu0  ;;  %v553_v48 = vpop.f32.mrb[6].mxu1 }
  0xe4   :  { %704 = vst [vmem:[%s1502_s2 + $0x30] sm:$0xff] %v393_v47  ;;  %768 = vst [vmem:[%s1502_s2 + $0x230] sm:$0xff] %v553_v48  ;;  %v395_v49 = vpop.f32.mrb[7].mxu0  ;;  %v555_v50 = vpop.f32.mrb[7].mxu1 }
  0xe5   :  { %705 = vst [vmem:[%s1502_s2 + $0x38] sm:$0xff] %v395_v49  ;;  %769 = vst [vmem:[%s1502_s2 + $0x238] sm:$0xff] %v555_v50 }
  0xe9   :  { %v399_v51 = vpop.f32.mrb[8].mxu0  ;;  %v559_v52 = vpop.f32.mrb[8].mxu1 }
  0xea   :  { %706 = vst [vmem:[%s1502_s2 + $0x40] sm:$0xff] %v399_v51  ;;  %770 = vst [vmem:[%s1502_s2 + $0x240] sm:$0xff] %v559_v52  ;;  %v401_v53 = vpop.f32.mrb[9].mxu0  ;;  %v561_v54 = vpop.f32.mrb[9].mxu1 }
  0xeb   :  { %707 = vst [vmem:[%s1502_s2 + $0x48] sm:$0xff] %v401_v53  ;;  %771 = vst [vmem:[%s1502_s2 + $0x248] sm:$0xff] %v561_v54  ;;  %v403_v55 = vpop.f32.mrb[10].mxu0  ;;  %v563_v56 = vpop.f32.mrb[10].mxu1 }
  0xec   :  { %708 = vst [vmem:[%s1502_s2 + $0x50] sm:$0xff] %v403_v55  ;;  %772 = vst [vmem:[%s1502_s2 + $0x250] sm:$0xff] %v563_v56  ;;  %v405_v57 = vpop.f32.mrb[11].mxu0  ;;  %v565_v58 = vpop.f32.mrb[11].mxu1 }
  0xed   :  { %709 = vst [vmem:[%s1502_s2 + $0x58] sm:$0xff] %v405_v57  ;;  %773 = vst [vmem:[%s1502_s2 + $0x258] sm:$0xff] %v565_v58 }
  0xf1   :  { %v409_v59 = vpop.f32.mrb[12].mxu0  ;;  %v569_v60 = vpop.f32.mrb[12].mxu1 }
  0xf2   :  { %710 = vst [vmem:[%s1502_s2 + $0x60] sm:$0xff] %v409_v59  ;;  %774 = vst [vmem:[%s1502_s2 + $0x260] sm:$0xff] %v569_v60  ;;  %v411_v61 = vpop.f32.mrb[13].mxu0  ;;  %v571_v62 = vpop.f32.mrb[13].mxu1 }
  0xf3   :  { %711 = vst [vmem:[%s1502_s2 + $0x68] sm:$0xff] %v411_v61  ;;  %775 = vst [vmem:[%s1502_s2 + $0x268] sm:$0xff] %v571_v62  ;;  %v413_v63 = vpop.f32.mrb[14].mxu0  ;;  %v573_v0 = vpop.f32.mrb[14].mxu1 }
  0xf4   :  { %712 = vst [vmem:[%s1502_s2 + $0x70] sm:$0xff] %v413_v63  ;;  %776 = vst [vmem:[%s1502_s2 + $0x270] sm:$0xff] %v573_v0  ;;  %v415_v1 = vpop.f32.mrb[15].mxu0  ;;  %v575_v2 = vpop.f32.mrb[15].mxu1 }
  0xf5   :  { %713 = vst [vmem:[%s1502_s2 + $0x78] sm:$0xff] %v415_v1  ;;  %777 = vst [vmem:[%s1502_s2 + $0x278] sm:$0xff] %v575_v2 }
  0xf9   :  { %v419_v3 = vpop.f32.mrb[16].mxu0  ;;  %v579_v4 = vpop.f32.mrb[16].mxu1 }
  0xfa   :  { %714 = vst [vmem:[%s1502_s2 + $0x80] sm:$0xff] %v419_v3  ;;  %778 = vst [vmem:[%s1502_s2 + $0x280] sm:$0xff] %v579_v4  ;;  %v421_v5 = vpop.f32.mrb[17].mxu0  ;;  %v581_v6 = vpop.f32.mrb[17].mxu1 }
  0xfb   :  { %715 = vst [vmem:[%s1502_s2 + $0x88] sm:$0xff] %v421_v5  ;;  %779 = vst [vmem:[%s1502_s2 + $0x288] sm:$0xff] %v581_v6  ;;  %v423_v7 = vpop.f32.mrb[18].mxu0  ;;  %v583_v8 = vpop.f32.mrb[18].mxu1 }
  0xfc   :  { %716 = vst [vmem:[%s1502_s2 + $0x90] sm:$0xff] %v423_v7  ;;  %780 = vst [vmem:[%s1502_s2 + $0x290] sm:$0xff] %v583_v8  ;;  %v425_v9 = vpop.f32.mrb[19].mxu0  ;;  %v585_v10 = vpop.f32.mrb[19].mxu1 }
  0xfd   :  { %717 = vst [vmem:[%s1502_s2 + $0x98] sm:$0xff] %v425_v9  ;;  %781 = vst [vmem:[%s1502_s2 + $0x298] sm:$0xff] %v585_v10 }
 0x101   :  { %v429_v11 = vpop.f32.mrb[20].mxu0  ;;  %v589_v12 = vpop.f32.mrb[20].mxu1 }
 0x102   :  { %718 = vst [vmem:[%s1502_s2 + $0xa0] sm:$0xff] %v429_v11  ;;  %782 = vst [vmem:[%s1502_s2 + $0x2a0] sm:$0xff] %v589_v12  ;;  %v431_v13 = vpop.f32.mrb[21].mxu0  ;;  %v591_v14 = vpop.f32.mrb[21].mxu1 }
 0x103   :  { %719 = vst [vmem:[%s1502_s2 + $0xa8] sm:$0xff] %v431_v13  ;;  %783 = vst [vmem:[%s1502_s2 + $0x2a8] sm:$0xff] %v591_v14  ;;  %v433_v15 = vpop.f32.mrb[22].mxu0  ;;  %v593_v16 = vpop.f32.mrb[22].mxu1 }
 0x104   :  { %720 = vst [vmem:[%s1502_s2 + $0xb0] sm:$0xff] %v433_v15  ;;  %784 = vst [vmem:[%s1502_s2 + $0x2b0] sm:$0xff] %v593_v16  ;;  %v435_v17 = vpop.f32.mrb[23].mxu0  ;;  %v595_v18 = vpop.f32.mrb[23].mxu1 }
 0x105   :  { %721 = vst [vmem:[%s1502_s2 + $0xb8] sm:$0xff] %v435_v17  ;;  %785 = vst [vmem:[%s1502_s2 + $0x2b8] sm:$0xff] %v595_v18 }
 0x109   :  { %v439_v19 = vpop.f32.mrb[24].mxu0  ;;  %v599_v20 = vpop.f32.mrb[24].mxu1 }
 0x10a   :  { %722 = vst [vmem:[%s1502_s2 + $0xc0] sm:$0xff] %v439_v19  ;;  %786 = vst [vmem:[%s1502_s2 + $0x2c0] sm:$0xff] %v599_v20  ;;  %v441_v21 = vpop.f32.mrb[25].mxu0  ;;  %v601_v22 = vpop.f32.mrb[25].mxu1 }
 0x10b   :  { %723 = vst [vmem:[%s1502_s2 + $0xc8] sm:$0xff] %v441_v21  ;;  %787 = vst [vmem:[%s1502_s2 + $0x2c8] sm:$0xff] %v601_v22  ;;  %v443_v23 = vpop.f32.mrb[26].mxu0  ;;  %v603_v24 = vpop.f32.mrb[26].mxu1 }
 0x10c   :  { %724 = vst [vmem:[%s1502_s2 + $0xd0] sm:$0xff] %v443_v23  ;;  %788 = vst [vmem:[%s1502_s2 + $0x2d0] sm:$0xff] %v603_v24  ;;  %v445_v25 = vpop.f32.mrb[27].mxu0  ;;  %v605_v26 = vpop.f32.mrb[27].mxu1 }
 0x10d   :  { %725 = vst [vmem:[%s1502_s2 + $0xd8] sm:$0xff] %v445_v25  ;;  %789 = vst [vmem:[%s1502_s2 + $0x2d8] sm:$0xff] %v605_v26 }
 0x111   :  { %v449_v27 = vpop.f32.mrb[28].mxu0  ;;  %v609_v28 = vpop.f32.mrb[28].mxu1 }
 0x112   :  { %726 = vst [vmem:[%s1502_s2 + $0xe0] sm:$0xff] %v449_v27  ;;  %790 = vst [vmem:[%s1502_s2 + $0x2e0] sm:$0xff] %v609_v28  ;;  %v451_v29 = vpop.f32.mrb[29].mxu0  ;;  %v611_v30 = vpop.f32.mrb[29].mxu1 }
 0x113   :  { %727 = vst [vmem:[%s1502_s2 + $0xe8] sm:$0xff] %v451_v29  ;;  %791 = vst [vmem:[%s1502_s2 + $0x2e8] sm:$0xff] %v611_v30  ;;  %v453_v31 = vpop.f32.mrb[30].mxu0  ;;  %v613_v32 = vpop.f32.mrb[30].mxu1 }
 0x114   :  { %728 = vst [vmem:[%s1502_s2 + $0xf0] sm:$0xff] %v453_v31  ;;  %792 = vst [vmem:[%s1502_s2 + $0x2f0] sm:$0xff] %v613_v32  ;;  %v455_v33 = vpop.f32.mrb[31].mxu0  ;;  %v615_v34 = vpop.f32.mrb[31].mxu1 }
 0x115   :  { %729 = vst [vmem:[%s1502_s2 + $0xf8] sm:$0xff] %v455_v33  ;;  %793 = vst [vmem:[%s1502_s2 + $0x2f8] sm:$0xff] %v615_v34 }
 0x119   :  { %v459_v35 = vpop.f32.mrb[32].mxu0  ;;  %v619_v36 = vpop.f32.mrb[32].mxu1 }
 0x11a   :  { %730 = vst [vmem:[%s1502_s2 + $0x100] sm:$0xff] %v459_v35  ;;  %794 = vst [vmem:[%s1502_s2 + $0x300] sm:$0xff] %v619_v36  ;;  %v461_v37 = vpop.f32.mrb[33].mxu0  ;;  %v621_v38 = vpop.f32.mrb[33].mxu1 }
 0x11b   :  { %731 = vst [vmem:[%s1502_s2 + $0x108] sm:$0xff] %v461_v37  ;;  %795 = vst [vmem:[%s1502_s2 + $0x308] sm:$0xff] %v621_v38  ;;  %v463_v39 = vpop.f32.mrb[34].mxu0  ;;  %v623_v40 = vpop.f32.mrb[34].mxu1 }
 0x11c   :  { %732 = vst [vmem:[%s1502_s2 + $0x110] sm:$0xff] %v463_v39  ;;  %796 = vst [vmem:[%s1502_s2 + $0x310] sm:$0xff] %v623_v40  ;;  %v465_v41 = vpop.f32.mrb[35].mxu0  ;;  %v625_v42 = vpop.f32.mrb[35].mxu1 }
 0x11d   :  { %733 = vst [vmem:[%s1502_s2 + $0x118] sm:$0xff] %v465_v41  ;;  %797 = vst [vmem:[%s1502_s2 + $0x318] sm:$0xff] %v625_v42 }
 0x121   :  { %v469_v43 = vpop.f32.mrb[36].mxu0  ;;  %v629_v44 = vpop.f32.mrb[36].mxu1 }
 0x122   :  { %734 = vst [vmem:[%s1502_s2 + $0x120] sm:$0xff] %v469_v43  ;;  %798 = vst [vmem:[%s1502_s2 + $0x320] sm:$0xff] %v629_v44  ;;  %v471_v45 = vpop.f32.mrb[37].mxu0  ;;  %v631_v46 = vpop.f32.mrb[37].mxu1 }
 0x123   :  { %735 = vst [vmem:[%s1502_s2 + $0x128] sm:$0xff] %v471_v45  ;;  %799 = vst [vmem:[%s1502_s2 + $0x328] sm:$0xff] %v631_v46  ;;  %v473_v47 = vpop.f32.mrb[38].mxu0  ;;  %v633_v48 = vpop.f32.mrb[38].mxu1 }
 0x124   :  { %736 = vst [vmem:[%s1502_s2 + $0x130] sm:$0xff] %v473_v47  ;;  %800 = vst [vmem:[%s1502_s2 + $0x330] sm:$0xff] %v633_v48  ;;  %v475_v49 = vpop.f32.mrb[39].mxu0  ;;  %v635_v50 = vpop.f32.mrb[39].mxu1 }
 0x125   :  { %737 = vst [vmem:[%s1502_s2 + $0x138] sm:$0xff] %v475_v49  ;;  %801 = vst [vmem:[%s1502_s2 + $0x338] sm:$0xff] %v635_v50 }
 0x129   :  { %v479_v51 = vpop.f32.mrb[40].mxu0  ;;  %v639_v52 = vpop.f32.mrb[40].mxu1 }
 0x12a   :  { %738 = vst [vmem:[%s1502_s2 + $0x140] sm:$0xff] %v479_v51  ;;  %802 = vst [vmem:[%s1502_s2 + $0x340] sm:$0xff] %v639_v52  ;;  %v481_v53 = vpop.f32.mrb[41].mxu0  ;;  %v641_v54 = vpop.f32.mrb[41].mxu1 }
 0x12b   :  { %739 = vst [vmem:[%s1502_s2 + $0x148] sm:$0xff] %v481_v53  ;;  %803 = vst [vmem:[%s1502_s2 + $0x348] sm:$0xff] %v641_v54  ;;  %v483_v55 = vpop.f32.mrb[42].mxu0  ;;  %v643_v56 = vpop.f32.mrb[42].mxu1 }
 0x12c   :  { %740 = vst [vmem:[%s1502_s2 + $0x150] sm:$0xff] %v483_v55  ;;  %804 = vst [vmem:[%s1502_s2 + $0x350] sm:$0xff] %v643_v56  ;;  %v485_v57 = vpop.f32.mrb[43].mxu0  ;;  %v645_v58 = vpop.f32.mrb[43].mxu1 }
 0x12d   :  { %741 = vst [vmem:[%s1502_s2 + $0x158] sm:$0xff] %v485_v57  ;;  %805 = vst [vmem:[%s1502_s2 + $0x358] sm:$0xff] %v645_v58 }
 0x131   :  { %v489_v59 = vpop.f32.mrb[44].mxu0  ;;  %v649_v60 = vpop.f32.mrb[44].mxu1 }
 0x132   :  { %742 = vst [vmem:[%s1502_s2 + $0x160] sm:$0xff] %v489_v59  ;;  %806 = vst [vmem:[%s1502_s2 + $0x360] sm:$0xff] %v649_v60  ;;  %v491_v61 = vpop.f32.mrb[45].mxu0  ;;  %v651_v62 = vpop.f32.mrb[45].mxu1 }
 0x133   :  { %743 = vst [vmem:[%s1502_s2 + $0x168] sm:$0xff] %v491_v61  ;;  %807 = vst [vmem:[%s1502_s2 + $0x368] sm:$0xff] %v651_v62  ;;  %v493_v63 = vpop.f32.mrb[46].mxu0  ;;  %v653_v0 = vpop.f32.mrb[46].mxu1 }
 0x134   :  { %744 = vst [vmem:[%s1502_s2 + $0x170] sm:$0xff] %v493_v63  ;;  %808 = vst [vmem:[%s1502_s2 + $0x370] sm:$0xff] %v653_v0  ;;  %v495_v1 = vpop.f32.mrb[47].mxu0  ;;  %v655_v2 = vpop.f32.mrb[47].mxu1 }
 0x135   :  { %745 = vst [vmem:[%s1502_s2 + $0x178] sm:$0xff] %v495_v1  ;;  %809 = vst [vmem:[%s1502_s2 + $0x378] sm:$0xff] %v655_v2 }
 0x139   :  { %v499_v3 = vpop.f32.mrb[48].mxu0  ;;  %v659_v4 = vpop.f32.mrb[48].mxu1 }
 0x13a   :  { %746 = vst [vmem:[%s1502_s2 + $0x180] sm:$0xff] %v499_v3  ;;  %810 = vst [vmem:[%s1502_s2 + $0x380] sm:$0xff] %v659_v4  ;;  %v501_v5 = vpop.f32.mrb[49].mxu0  ;;  %v661_v6 = vpop.f32.mrb[49].mxu1 }
 0x13b   :  { %747 = vst [vmem:[%s1502_s2 + $0x188] sm:$0xff] %v501_v5  ;;  %811 = vst [vmem:[%s1502_s2 + $0x388] sm:$0xff] %v661_v6  ;;  %v503_v7 = vpop.f32.mrb[50].mxu0  ;;  %v663_v8 = vpop.f32.mrb[50].mxu1 }
 0x13c   :  { %748 = vst [vmem:[%s1502_s2 + $0x190] sm:$0xff] %v503_v7  ;;  %812 = vst [vmem:[%s1502_s2 + $0x390] sm:$0xff] %v663_v8  ;;  %v505_v9 = vpop.f32.mrb[51].mxu0  ;;  %v665_v10 = vpop.f32.mrb[51].mxu1 }
 0x13d   :  { %749 = vst [vmem:[%s1502_s2 + $0x198] sm:$0xff] %v505_v9  ;;  %813 = vst [vmem:[%s1502_s2 + $0x398] sm:$0xff] %v665_v10 }
 0x141   :  { %v509_v11 = vpop.f32.mrb[52].mxu0  ;;  %v669_v12 = vpop.f32.mrb[52].mxu1 }
 0x142   :  { %750 = vst [vmem:[%s1502_s2 + $0x1a0] sm:$0xff] %v509_v11  ;;  %814 = vst [vmem:[%s1502_s2 + $0x3a0] sm:$0xff] %v669_v12  ;;  %v511_v13 = vpop.f32.mrb[53].mxu0  ;;  %v671_v14 = vpop.f32.mrb[53].mxu1 }
 0x143   :  { %751 = vst [vmem:[%s1502_s2 + $0x1a8] sm:$0xff] %v511_v13  ;;  %815 = vst [vmem:[%s1502_s2 + $0x3a8] sm:$0xff] %v671_v14  ;;  %v513_v15 = vpop.f32.mrb[54].mxu0  ;;  %v673_v16 = vpop.f32.mrb[54].mxu1 }
 0x144   :  { %752 = vst [vmem:[%s1502_s2 + $0x1b0] sm:$0xff] %v513_v15  ;;  %816 = vst [vmem:[%s1502_s2 + $0x3b0] sm:$0xff] %v673_v16  ;;  %v515_v17 = vpop.f32.mrb[55].mxu0  ;;  %v675_v18 = vpop.f32.mrb[55].mxu1 }
 0x145   :  { %753 = vst [vmem:[%s1502_s2 + $0x1b8] sm:$0xff] %v515_v17  ;;  %817 = vst [vmem:[%s1502_s2 + $0x3b8] sm:$0xff] %v675_v18 }
 0x149   :  { %v519_v19 = vpop.f32.mrb[56].mxu0  ;;  %v679_v20 = vpop.f32.mrb[56].mxu1 }
 0x14a   :  { %754 = vst [vmem:[%s1502_s2 + $0x1c0] sm:$0xff] %v519_v19  ;;  %818 = vst [vmem:[%s1502_s2 + $0x3c0] sm:$0xff] %v679_v20  ;;  %v521_v21 = vpop.f32.mrb[57].mxu0  ;;  %v681_v22 = vpop.f32.mrb[57].mxu1 }
 0x14b   :  { %755 = vst [vmem:[%s1502_s2 + $0x1c8] sm:$0xff] %v521_v21  ;;  %819 = vst [vmem:[%s1502_s2 + $0x3c8] sm:$0xff] %v681_v22  ;;  %v523_v23 = vpop.f32.mrb[58].mxu0  ;;  %v683_v24 = vpop.f32.mrb[58].mxu1 }
 0x14c   :  { %756 = vst [vmem:[%s1502_s2 + $0x1d0] sm:$0xff] %v523_v23  ;;  %820 = vst [vmem:[%s1502_s2 + $0x3d0] sm:$0xff] %v683_v24  ;;  %v525_v25 = vpop.f32.mrb[59].mxu0  ;;  %v685_v26 = vpop.f32.mrb[59].mxu1 }
 0x14d   :  { %757 = vst [vmem:[%s1502_s2 + $0x1d8] sm:$0xff] %v525_v25  ;;  %821 = vst [vmem:[%s1502_s2 + $0x3d8] sm:$0xff] %v685_v26 }
 0x151   :  { %v529_v27 = vpop.f32.mrb[60].mxu0  ;;  %v689_v28 = vpop.f32.mrb[60].mxu1 }
 0x152   :  { %758 = vst [vmem:[%s1502_s2 + $0x1e0] sm:$0xff] %v529_v27  ;;  %822 = vst [vmem:[%s1502_s2 + $0x3e0] sm:$0xff] %v689_v28  ;;  %v531_v29 = vpop.f32.mrb[61].mxu0  ;;  %v691_v30 = vpop.f32.mrb[61].mxu1 }
 0x153   :  { %759 = vst [vmem:[%s1502_s2 + $0x1e8] sm:$0xff] %v531_v29  ;;  %823 = vst [vmem:[%s1502_s2 + $0x3e8] sm:$0xff] %v691_v30  ;;  %v533_v31 = vpop.f32.mrb[62].mxu0  ;;  %v693_v32 = vpop.f32.mrb[62].mxu1 }
 0x154   :  { %760 = vst [vmem:[%s1502_s2 + $0x1f0] sm:$0xff] %v533_v31  ;;  %824 = vst [vmem:[%s1502_s2 + $0x3f0] sm:$0xff] %v693_v32  ;;  %v535_v33 = vpop.f32.mrb[63].mxu0  ;;  %v695_v34 = vpop.f32.mrb[63].mxu1 }
 0x155   :  { %761 = vst [vmem:[%s1502_s2 + $0x1f8] sm:$0xff] %v535_v33  ;;  %825 = vst [vmem:[%s1502_s2 + $0x3f8] sm:$0xff] %v695_v34 }

// kernel: generator_forward.24
= control target key start
LH: loop header
LB: loop body
LE: loop exit
PB: predicated region body
PF: predicated region fallthrough
CT: control target
= control target key end

     0   :  { %v14_v0 = vlaneseq  ;;  %v266_v4 = vmov 1966171168   ;;  %v267_v13 = vmov 0.0   ;;  %s471_s0 = inlined_call_operand.vmem [shape: f32[64,512], index: 0, kind: input, shape index: {}]   ;;  %s472_s1 = inlined_call_operand.vmem [shape: f32[1,512], index: 1, kind: output, shape index: {0}]   ;;  %s473_s2 = inlined_call_operand.vmem [shape: f32[1,512], index: 2, kind: output, shape index: {1}]  }
   0x1   :  { %v20_v1 = vld [vmem:[%s471_s0] sm:$0xff]  ;;  %v21_v2 = vld [vmem:[%s471_s0 + $0x8] sm:$0xff]  ;;  %v22_v3 = vld [vmem:[%s471_s0 + $0x10] sm:$0xff]  ;;  %v112_v5 = vunpack.c.l.s4 %v266_v4 }
   0x2   :  { %vm292_vm0 = vcmp.lt.s32.totalorder %v14_v0, 512  ;;  %v23_v7 = vld [vmem:[%s471_s0 + $0x18] sm:$0xff]  ;;  %v24_v8 = vld [vmem:[%s471_s0 + $0x20] sm:$0xff]  ;;  %v25_v9 = vld [vmem:[%s471_s0 + $0x28] sm:$0xff]  ;;  %v115_v10 = vshrl.u32 %v14_v0, 7  ;;  %v305_v11 = vmul.f32 %v20_v1, %v20_v1  ;;  %v307_v12 = vmul.f32 %v21_v2, %v21_v2 }
   0x3   :  { %18 = vst.msk [vmem:[%s472_s1] sm:$0xf] %vm292_vm0, %v267_v13  ;;  %v26_v14 = vld [vmem:[%s471_s0 + $0x30] sm:$0xff]  ;;  %v27_v15 = vld [vmem:[%s471_s0 + $0x38] sm:$0xff]  ;;  %v53_v16 = vadd.f32 %v24_v8, %v20_v1  ;;  %v66_v17 = vadd.f32 %v25_v9, %v21_v2  ;;  %v113_v18 = vunpack.c.0.s8 %v112_v5  ;;  %19 = vst.msk [vmem:[%s473_s2] sm:$0xf] %vm292_vm0, %v267_v13  ;;  %v325_v19 = vmul.f32 %v22_v3, %v22_v3 }
   0x4   :  { %v28_v20 = vld [vmem:[%s471_s0 + $0x40] sm:$0xff]  ;;  %v29_v21 = vld [vmem:[%s471_s0 + $0x48] sm:$0xff]  ;;  %v79_v22 = vadd.f32 %v26_v14, %v22_v3  ;;  %v92_v23 = vadd.f32 %v27_v15, %v23_v7  ;;  %v333_v24 = vmul.f32 %v23_v7, %v23_v7  ;;  %v335_v25 = vmul.f32 %v24_v8, %v24_v8  ;;  %v30_v26 = vld [vmem:[%s471_s0 + $0x50] sm:$0xff] }
   0x5   :  { %v31_v27 = vld [vmem:[%s471_s0 + $0x58] sm:$0xff]  ;;  %v54_v28 = vadd.f32 %v53_v16, %v28_v20  ;;  %v67_v29 = vadd.f32 %v66_v17, %v29_v21  ;;  %v343_v30 = vsub.s32 %v113_v18, %v115_v10  ;;  %v345_v31 = vmul.f32 %v25_v9, %v25_v9  ;;  %v32_v32 = vld [vmem:[%s471_s0 + $0x60] sm:$0xff]  ;;  %v33_v33 = vld [vmem:[%s471_s0 + $0x68] sm:$0xff] }
   0x6   :  { %v80_v34 = vadd.f32 %v79_v22, %v30_v26  ;;  %v93_v35 = vadd.f32 %v92_v23, %v31_v27  ;;  %v353_v36 = vmul.f32 %v26_v14, %v26_v14  ;;  %v355_v37 = vmul.f32 %v27_v15, %v27_v15  ;;  %v34_v38 = vld [vmem:[%s471_s0 + $0x70] sm:$0xff]  ;;  %v35_v39 = vld [vmem:[%s471_s0 + $0x78] sm:$0xff]  ;;  %v36_v44 = vld [vmem:[%s471_s0 + $0x80] sm:$0xff] }
   0x7   :  { %v55_v40 = vadd.f32 %v54_v28, %v32_v32  ;;  %v68_v41 = vadd.f32 %v67_v29, %v33_v33  ;;  %v363_v42 = vmul.f32 %v28_v20, %v28_v20  ;;  %v365_v43 = vmul.f32 %v29_v21, %v29_v21  ;;  %v37_v45 = vld [vmem:[%s471_s0 + $0x88] sm:$0xff]  ;;  %v38_v50 = vld [vmem:[%s471_s0 + $0x90] sm:$0xff]  ;;  %v39_v51 = vld [vmem:[%s471_s0 + $0x98] sm:$0xff] }
   0x8   :  { %v81_v46 = vadd.f32 %v80_v34, %v34_v38  ;;  %v94_v47 = vadd.f32 %v93_v35, %v35_v39  ;;  %v373_v48 = vmul.f32 %v30_v26, %v30_v26  ;;  %v375_v49 = vmul.f32 %v31_v27, %v31_v27  ;;  %v40_v56 = vld [vmem:[%s471_s0 + $0xa0] sm:$0xff]  ;;  %v41_v57 = vld [vmem:[%s471_s0 + $0xa8] sm:$0xff]  ;;  %v42_v62 = vld [vmem:[%s471_s0 + $0xb0] sm:$0xff] }
   0x9   :  { %v56_v52 = vadd.f32 %v55_v40, %v36_v44  ;;  %v69_v53 = vadd.f32 %v68_v41, %v37_v45  ;;  %v383_v54 = vmul.f32 %v32_v32, %v32_v32  ;;  %v385_v55 = vmul.f32 %v33_v33, %v33_v33  ;;  %v43_v63 = vld [vmem:[%s471_s0 + $0xb8] sm:$0xff]  ;;  %v44_v4 = vld [vmem:[%s471_s0 + $0xc0] sm:$0xff]  ;;  %v45_v5 = vld [vmem:[%s471_s0 + $0xc8] sm:$0xff] }
   0xa   :  { %v82_v58 = vadd.f32 %v81_v46, %v38_v50  ;;  %v95_v59 = vadd.f32 %v94_v47, %v39_v51  ;;  %v393_v60 = vmul.f32 %v34_v38, %v34_v38  ;;  %v395_v61 = vmul.f32 %v35_v39, %v35_v39  ;;  %v46_v13 = vld [vmem:[%s471_s0 + $0xd0] sm:$0xff]  ;;  %v47_v14 = vld [vmem:[%s471_s0 + $0xd8] sm:$0xff]  ;;  %v48_v20 = vld [vmem:[%s471_s0 + $0xe0] sm:$0xff] }
   0xb   :  { %v57_v0 = vadd.f32 %v56_v52, %v40_v56  ;;  %v70_v1 = vadd.f32 %v69_v53, %v41_v57  ;;  %v403_v2 = vmul.f32 %v36_v44, %v36_v44  ;;  %v405_v3 = vmul.f32 %v37_v45, %v37_v45  ;;  %v49_v21 = vld [vmem:[%s471_s0 + $0xe8] sm:$0xff]  ;;  %v50_v28 = vld [vmem:[%s471_s0 + $0xf0] sm:$0xff]  ;;  %v51_v29 = vld [vmem:[%s471_s0 + $0xf8] sm:$0xff] }
   0xc   :  { %v83_v7 = vadd.f32 %v82_v58, %v42_v62  ;;  %v96_v8 = vadd.f32 %v95_v59, %v43_v63  ;;  %v159_v9 = vmul.f32 %v38_v50, %v38_v50  ;;  %v160_v10 = vmul.f32 %v39_v51, %v39_v51 }
   0xd   :  { %v58_v15 = vadd.f32 %v57_v0, %v44_v4  ;;  %v71_v16 = vadd.f32 %v70_v1, %v45_v5  ;;  %v161_v17 = vmul.f32 %v40_v56, %v40_v56  ;;  %v162_v18 = vmul.f32 %v41_v57, %v41_v57 }
   0xe   :  { %v84_v22 = vadd.f32 %v83_v7, %v46_v13  ;;  %v97_v23 = vadd.f32 %v96_v8, %v47_v14  ;;  %v163_v26 = vmul.f32 %v42_v62, %v42_v62  ;;  %v164_v27 = vmul.f32 %v43_v63, %v43_v63 }
   0xf   :  { %v59_v32 = vadd.f32 %v58_v15, %v48_v20  ;;  %v72_v33 = vadd.f32 %v71_v16, %v49_v21  ;;  %v165_v34 = vmul.f32 %v44_v4, %v44_v4  ;;  %v166_v35 = vmul.f32 %v45_v5, %v45_v5 }
  0x10   :  { %v85_v38 = vadd.f32 %v84_v22, %v50_v28  ;;  %v98_v39 = vadd.f32 %v97_v23, %v51_v29  ;;  %v167_v40 = vmul.f32 %v46_v13, %v46_v13  ;;  %v168_v41 = vmul.f32 %v47_v14, %v47_v14 }
  0x11   :  { %v60_v44 = vrot.slane %v59_v32, 4  ;;  %v73_v45 = vrot.slane %v72_v33, 4  ;;  %v169_v46 = vmul.f32 %v48_v20, %v48_v20  ;;  %v170_v47 = vmul.f32 %v49_v21, %v49_v21 }
  0x12   :  { %v86_v50 = vrot.slane %v85_v38, 4  ;;  %v99_v51 = vrot.slane %v98_v39, 4  ;;  %v171_v52 = vmul.f32 %v50_v28, %v50_v28  ;;  %v172_v53 = vmul.f32 %v51_v29, %v51_v29 }
  0x13   :  { %v61_v56 = vadd.f32 %v60_v44, %v59_v32  ;;  %v74_v57 = vadd.f32 %v73_v45, %v72_v33  ;;  %v173_v58 = vadd.f32 %v335_v25, %v305_v11  ;;  %v186_v59 = vadd.f32 %v345_v31, %v307_v12 }
  0x14   :  { %v87_v62 = vadd.f32 %v86_v50, %v85_v38  ;;  %v100_v63 = vadd.f32 %v99_v51, %v98_v39  ;;  %v199_v0 = vadd.f32 %v353_v36, %v325_v19  ;;  %v212_v1 = vadd.f32 %v355_v37, %v333_v24 }
  0x15   :  { %v62_v4 = vrot.slane %v61_v56, 2  ;;  %v75_v5 = vrot.slane %v74_v57, 2  ;;  %v174_v7 = vadd.f32 %v173_v58, %v363_v42  ;;  %v187_v8 = vadd.f32 %v186_v59, %v365_v43 }
  0x16   :  { %v88_v13 = vrot.slane %v87_v62, 2  ;;  %v101_v14 = vrot.slane %v100_v63, 2  ;;  %v200_v11 = vadd.f32 %v199_v0, %v373_v48  ;;  %v213_v12 = vadd.f32 %v212_v1, %v375_v49 }
  0x17   :  { %v63_v25 = vadd.f32 %v62_v4, %v61_v56  ;;  %v76_v31 = vadd.f32 %v75_v5, %v74_v57  ;;  %v175_v15 = vadd.f32 %v174_v7, %v383_v54  ;;  %v188_v19 = vadd.f32 %v187_v8, %v385_v55 }
  0x18   :  { %v89_v36 = vadd.f32 %v88_v13, %v87_v62  ;;  %v102_v24 = vadd.f32 %v101_v14, %v100_v63  ;;  %v201_v37 = vadd.f32 %v200_v11, %v393_v60  ;;  %v214_v42 = vadd.f32 %v213_v12, %v395_v61 }
  0x19   :  { %v64_v16 = vrot.slane %v63_v25, 1  ;;  %v77_v43 = vrot.slane %v76_v31, 1  ;;  %v176_v20 = vadd.f32 %v175_v15, %v403_v2  ;;  %v189_v48 = vadd.f32 %v188_v19, %v405_v3 }
  0x1a   :  { %v90_v21 = vrot.slane %v89_v36, 1  ;;  %v103_v49 = vrot.slane %v102_v24, 1  ;;  %v202_v22 = vadd.f32 %v201_v37, %v159_v9  ;;  %v215_v23 = vadd.f32 %v214_v42, %v160_v10  ;;  %v140_v42 = vld [vmem:[%s473_s2] sm:$0xf] }
  0x1b   :  { %v65_v28 = vadd.f32 %v64_v16, %v63_v25  ;;  %v78_v54 = vadd.f32 %v77_v43, %v76_v31  ;;  %v177_v29 = vadd.f32 %v176_v20, %v161_v17  ;;  %v190_v55 = vadd.f32 %v189_v48, %v162_v18 }
  0x1c   :  { %v91_v32 = vadd.f32 %v90_v21, %v89_v36  ;;  %v104_v33 = vadd.f32 %v103_v49, %v102_v24  ;;  %v203_v38 = vadd.f32 %v202_v22, %v163_v26  ;;  %v216_v60 = vadd.f32 %v215_v23, %v164_v27  ;;  %v52_v27 = vld [vmem:[%s472_s1] sm:$0xf] }
  0x1d   :  { %v109_v39 = vcombine.low %v65_v28, %v78_v54  ;;  %v178_v61 = vadd.f32 %v177_v29, %v165_v34  ;;  %v191_v44 = vadd.f32 %v190_v55, %v166_v35 }
  0x1e   :  { %v110_v45 = vcombine.low %v91_v32, %v104_v33  ;;  %v204_v50 = vadd.f32 %v203_v38, %v167_v40  ;;  %v217_v2 = vadd.f32 %v216_v60, %v168_v41 }
  0x1f   :  { %v117_v3 = vrot.slane %v109_v39, %v343_v30  ;;  %v179_v51 = vadd.f32 %v178_v61, %v169_v46  ;;  %v192_v56 = vadd.f32 %v191_v44, %v170_v47 }
  0x20   :  { %v124_v9 = vrot.slane %v110_v45, %v343_v30  ;;  %v205_v10 = vadd.f32 %v204_v50, %v171_v52  ;;  %v218_v57 = vadd.f32 %v217_v2, %v172_v53 }
  0x21   :  { %v180_v17 = vrot.slane %v179_v51, 4  ;;  %v193_v18 = vrot.slane %v192_v56, 4 }
  0x22   :  { %v125_v58 = vcombine.low %v117_v3, %v124_v9  ;;  %v206_v59 = vrot.slane %v205_v10, 4  ;;  %v219_v26 = vrot.slane %v218_v57, 4 }
  0x23   :  { %v181_v34 = vadd.f32 %v180_v17, %v179_v51  ;;  %v194_v35 = vadd.f32 %v193_v18, %v192_v56 }
  0x24   :  { %v132_v40 = vrot.slane %v125_v58, %v343_v30  ;;  %v207_v41 = vadd.f32 %v206_v59, %v205_v10  ;;  %v220_v46 = vadd.f32 %v219_v26, %v218_v57 }
  0x25   :  { %v182_v47 = vrot.slane %v181_v34, 2  ;;  %v195_v62 = vrot.slane %v194_v35, 2 }
  0x26   :  { %v134_v63 = vadd.f32 %v132_v40, %v52_v27  ;;  %v208_v52 = vrot.slane %v207_v41, 2  ;;  %v221_v53 = vrot.slane %v220_v46, 2 }
  0x27   :  { %v183_v0 = vadd.f32 %v182_v47, %v181_v34  ;;  %v196_v1 = vadd.f32 %v195_v62, %v194_v35 }
  0x28   :  { %139 = vst.msk [vmem:[%s472_s1] sm:$0xf] %vm292_vm0, %v134_v63  ;;  %v209_v4 = vadd.f32 %v208_v52, %v207_v41  ;;  %v222_v5 = vadd.f32 %v221_v53, %v220_v46 }
  0x29   :  { %v184_v7 = vrot.slane %v183_v0, 1  ;;  %v197_v8 = vrot.slane %v196_v1, 1 }
  0x2a   :  { %v210_v13 = vrot.slane %v209_v4, 1  ;;  %v223_v14 = vrot.slane %v222_v5, 1 }
  0x2b   :  { %v185_v11 = vadd.f32 %v184_v7, %v183_v0  ;;  %v198_v12 = vadd.f32 %v197_v8, %v196_v1 }
  0x2c   :  { %v211_v25 = vadd.f32 %v210_v13, %v209_v4  ;;  %v224_v31 = vadd.f32 %v223_v14, %v222_v5 }
  0x2d   :  { %v229_v15 = vcombine.low %v185_v11, %v198_v12 }
  0x2e   :  { %v230_v19 = vcombine.low %v211_v25, %v224_v31 }
  0x2f   :  { %v237_v36 = vrot.slane %v229_v15, %v343_v30 }
  0x30   :  { %v244_v24 = vrot.slane %v230_v19, %v343_v30 }
  0x32   :  { %v245_v37 = vcombine.low %v237_v36, %v244_v24 }
  0x34   :  { %v252_v16 = vrot.slane %v245_v37, %v343_v30 }
  0x36   :  { %v254_v43 = vadd.f32 %v252_v16, %v140_v42 }
  0x38   :  { %255 = vst.msk [vmem:[%s473_s2] sm:$0xf] %vm292_vm0, %v254_v43 }

// kernel: tile.73
= control target key start
LH: loop header
LB: loop body
LE: loop exit
PB: predicated region body
PF: predicated region fallthrough
CT: control target
= control target key end

     0   :  { %s40_s0 = inlined_call_operand.vmem [shape: f32[16], index: 0, kind: input, shape index: {}]   ;;  %s41_s1 = inlined_call_operand.vmem [shape: f32[32,16], index: 1, kind: output, shape index: {}]  }
   0x1   :  { %v4_v0 = vld [vmem:[%s40_s0] ss:$0 sm:$0xff] }
   0x2   :  { %5 = vst [vmem:[%s41_s1] sm:$0xff] %v4_v0  ;;  %12 = vst [vmem:[%s41_s1 + $0x8] sm:$0xff] %v4_v0 }
   0x3   :  { %13 = vst [vmem:[%s41_s1 + $0x10] sm:$0xff] %v4_v0  ;;  %14 = vst [vmem:[%s41_s1 + $0x18] sm:$0xff] %v4_v0 }

// kernel: tile.78
= control target key start
LH: loop header
LB: loop body
LE: loop exit
PB: predicated region body
PF: predicated region fallthrough
CT: control target
= control target key end

     0   :  { %s89_s8 = smov 112   ;;  %s90_s11 = smov 80   ;;  %vm3_vm0 = vcmask 130048   ;;  %vm9_vm1 = vcmask 1048448   ;;  %vm15_vm2 = vcmask 917248   ;;  %vm21_vm3 = vcmask 786048   ;;  %s142_s0 = inlined_call_operand.vmem [shape: f32[32,16], index: 0, kind: input, shape index: {}]   ;;  %s143_s1 = inlined_call_operand.vmem [shape: f32[1,512], index: 1, kind: output, shape index: {}]  }
   0x1   :  { %v72_v0 = vld [vmem:[%s142_s0 + $0x7] ss:$8 sm:$0xf]   ;;  %v74_v1 = vld [vmem:[%s142_s0 + $0x5] ss:$8 sm:$0xf]  }
   0x2   :  { %7 = vrot.lane.b32.xlu0 %v72_v0, %s89_s8  ;;  %19 = vrot.lane.b32.xlu1 %v74_v1, %s90_s11  ;;  %v73_v2 = vld [vmem:[%s142_s0 + $0x6] ss:$8 sm:$0xf]   ;;  %v75_v3 = vld [vmem:[%s142_s0 + $0x4] ss:$8 sm:$0xf]  }
   0x3   :  { %s91_s16 = smov 96   ;;  %v2_v4 = vld [vmem:[%s142_s0] ss:$8 sm:$0xf]   ;;  %s92_s19 = smov 64   ;;  %vm27_vm4 = vcmask 654848  }
   0x4   :  { %v76_v5 = vld [vmem:[%s142_s0 + $0x3] ss:$8 sm:$0xf]   ;;  %4 = vst.msk [vmem:[#allocation0] ss:$8 sm:$0xf] %vm3_vm0, %v2_v4  }
   0x5   :  { %v77_v6 = vld [vmem:[%s142_s0 + $0x2] ss:$8 sm:$0xf]   ;;  %s93_s24 = smov 48   ;;  %s94_s25 = smov 32   ;;  %vm33_vm5 = vcmask 523648  }
   0x6   :  { %13 = vrot.lane.b32.xlu0 %v73_v2, %s91_s16  ;;  %25 = vrot.lane.b32.xlu1 %v75_v3, %s92_s19  ;;  %v78_v7 = vld [vmem:[%s142_s0 + $0x1] ss:$8 sm:$0xf]   ;;  %s95_s0 = smov 16   ;;  %vm39_vm6 = vcmask 392448   ;;  %vm45_vm7 = vcmask 261248  }
   0xa   :  { %31 = vrot.lane.b32.xlu0 %v76_v5, %s93_s24  ;;  %37 = vrot.lane.b32.xlu1 %v77_v6, %s94_s25 }
   0xe   :  { %43 = vrot.lane.b32.xlu0 %v78_v7, %s95_s0 }
  0x74   :  { %v8_v8 = vpop.permute.xlu0 %7   ;;  %v20_v9 = vpop.permute.xlu1 %19  }
  0x75   :  { %10 = vst.msk [vmem:[#allocation0] ss:$8 sm:$0xf] %vm9_vm1, %v8_v8  }
  0x78   :  { %v14_v10 = vpop.permute.xlu0 %13   ;;  %v26_v11 = vpop.permute.xlu1 %25  }
  0x79   :  { %16 = vst.msk [vmem:[#allocation0] ss:$8 sm:$0xf] %vm15_vm2, %v14_v10  }
  0x7a   :  { %22 = vst.msk [vmem:[#allocation0] ss:$8 sm:$0xf] %vm21_vm3, %v20_v9  }
  0x7b   :  { %28 = vst.msk [vmem:[#allocation0] ss:$8 sm:$0xf] %vm27_vm4, %v26_v11  }
  0x7c   :  { %v32_v12 = vpop.permute.xlu0 %31   ;;  %v38_v13 = vpop.permute.xlu1 %37  }
  0x7d   :  { %34 = vst.msk [vmem:[#allocation0] ss:$8 sm:$0xf] %vm33_vm5, %v32_v12  }
  0x7e   :  { %40 = vst.msk [vmem:[#allocation0] ss:$8 sm:$0xf] %vm39_vm6, %v38_v13  }
  0x80   :  { %v44_v14 = vpop.permute.xlu0 %43  }
  0x81   :  { %46 = vst.msk [vmem:[#allocation0] ss:$8 sm:$0xf] %vm45_vm7, %v44_v14  }
  0x88   :  { %v50_v15 = vld [vmem:[#allocation0] sm:$0x1]  ;;  %v54_v16 = vld [vmem:[#allocation0 + $0x8] sm:$0x1]  ;;  %v59_v17 = vld [vmem:[#allocation0 + $0x10] sm:$0x1] }
  0x89   :  { %52 = vst [vmem:[%s143_s1] sm:$0x1] %v50_v15  ;;  %79 = vst [vmem:[%s143_s1 + $0x1] sm:$0x1] %v54_v16  ;;  %v65_v18 = vld [vmem:[#allocation0 + $0x18] sm:$0x1] }
  0x8a   :  { %80 = vst [vmem:[%s143_s1 + $0x2] sm:$0x1] %v59_v17  ;;  %81 = vst [vmem:[%s143_s1 + $0x3] sm:$0x1] %v65_v18 }

// kernel: generator_forward.25
= control target key start
LH: loop header
LB: loop body
LE: loop exit
PB: predicated region body
PF: predicated region fallthrough
CT: control target
= control target key end

     0   :  { %v48_v0 = vlaneseq  ;;  %s520_s1 = inlined_call_operand.vmem [shape: f32[1,512], index: 1, kind: input, shape index: {}]   ;;  %s521_s2 = inlined_call_operand.vmem [shape: f32[1,512], index: 2, kind: input, shape index: {}]   ;;  %s522_s0 = inlined_call_operand.vmem [shape: f32[64,512], index: 0, kind: input, shape index: {}]   ;;  %s523_s3 = inlined_call_operand.vmem [shape: f32[64,512], index: 3, kind: output, shape index: {}]  }
   0x1   :  { %v46_v2 = vld [vmem:[%s520_s1] sm:$0xf]  ;;  %v15_v6 = vld [vmem:[%s522_s0 + $0x8] sm:$0xff]  ;;  %v16_v10 = vld [vmem:[%s522_s0 + $0x10] sm:$0xff] }
   0x2   :  { %v49_v1 = vshrl.u32 %v48_v0, 7  ;;  %v100_v3 = vld [vmem:[%s521_s2] sm:$0xf]  ;;  %v19_v12 = vld [vmem:[%s522_s0 + $0x28] sm:$0xff]  ;;  %v17_v17 = vld [vmem:[%s522_s0 + $0x18] sm:$0xff] }
   0x3   :  { %v14_v4 = vld [vmem:[%s522_s0] sm:$0xff]  ;;  %v20_v18 = vld [vmem:[%s522_s0 + $0x30] sm:$0xff]  ;;  %v21_v19 = vld [vmem:[%s522_s0 + $0x38] sm:$0xff] }
   0x4   :  { %v50_v5 = vsub.s32 0, %v49_v1  ;;  %v54_v7 = vsub.s32 1, %v49_v1  ;;  %v58_v8 = vsub.s32 2, %v49_v1  ;;  %v62_v9 = vsub.s32 3, %v49_v1  ;;  %v18_v11 = vld [vmem:[%s522_s0 + $0x20] sm:$0xff]  ;;  %v23_v37 = vld [vmem:[%s522_s0 + $0x48] sm:$0xff] }
   0x5   :  { %v22_v36 = vld [vmem:[%s522_s0 + $0x40] sm:$0xff]  ;;  %v24_v38 = vld [vmem:[%s522_s0 + $0x50] sm:$0xff]  ;;  %v25_v43 = vld [vmem:[%s522_s0 + $0x58] sm:$0xff] }
   0x6   :  { %v263_v13 = vrot.slane %v46_v2, %v50_v5  ;;  %v265_v14 = vrot.slane %v100_v3, %v50_v5  ;;  %v267_v15 = vrot.slane %v46_v2, %v54_v7  ;;  %v269_v16 = vrot.slane %v100_v3, %v54_v7  ;;  %v26_v44 = vld [vmem:[%s522_s0 + $0x60] sm:$0xff]  ;;  %v27_v45 = vld [vmem:[%s522_s0 + $0x68] sm:$0xff]  ;;  %v28_v50 = vld [vmem:[%s522_s0 + $0x70] sm:$0xff] }
   0x7   :  { %v280_v20 = vrot.slane %v46_v2, %v58_v8  ;;  %v282_v21 = vrot.slane %v100_v3, %v58_v8  ;;  %v284_v22 = vrot.slane %v46_v2, %v62_v9  ;;  %v286_v23 = vrot.slane %v100_v3, %v62_v9  ;;  %v29_v51 = vld [vmem:[%s522_s0 + $0x78] sm:$0xff]  ;;  %v31_v5 = vld [vmem:[%s522_s0 + $0x88] sm:$0xff] }
   0x8   :  { %v68_v24 = vmul.f32 %v263_v13, %v14_v4  ;;  %v69_v25 = vmul.f32 %v267_v15, %v15_v6  ;;  %v72_v26 = vmul.f32 %v263_v13, %v18_v11  ;;  %v73_v27 = vmul.f32 %v267_v15, %v19_v12  ;;  %v30_v4 = vld [vmem:[%s522_s0 + $0x80] sm:$0xff]  ;;  %v32_v6 = vld [vmem:[%s522_s0 + $0x90] sm:$0xff]  ;;  %v33_v11 = vld [vmem:[%s522_s0 + $0x98] sm:$0xff] }
   0x9   :  { %v70_v28 = vmul.f32 %v280_v20, %v16_v10  ;;  %v71_v29 = vmul.f32 %v284_v22, %v17_v17  ;;  %v74_v30 = vmul.f32 %v280_v20, %v20_v18  ;;  %v75_v31 = vmul.f32 %v284_v22, %v21_v19  ;;  %v34_v12 = vld [vmem:[%s522_s0 + $0xa0] sm:$0xff]  ;;  %v35_v17 = vld [vmem:[%s522_s0 + $0xa8] sm:$0xff] }
   0xa   :  { %v122_v32 = vadd.f32 %v265_v14, %v68_v24  ;;  %v123_v33 = vadd.f32 %v269_v16, %v69_v25  ;;  %v126_v34 = vadd.f32 %v265_v14, %v72_v26  ;;  %v127_v35 = vadd.f32 %v269_v16, %v73_v27  ;;  %v36_v26 = vld [vmem:[%s522_s0 + $0xb0] sm:$0xff]  ;;  %v37_v27 = vld [vmem:[%s522_s0 + $0xb8] sm:$0xff] }
   0xb   :  { %v124_v39 = vadd.f32 %v282_v21, %v70_v28  ;;  %v125_v40 = vadd.f32 %v286_v23, %v71_v29  ;;  %v128_v41 = vadd.f32 %v282_v21, %v74_v30  ;;  %v129_v42 = vadd.f32 %v286_v23, %v75_v31 }
   0xc   :  { %v154_v46 = vmax.f32 %v122_v32, 0.0  ;;  %v155_v47 = vmax.f32 %v123_v33, 0.0  ;;  %v158_v48 = vmax.f32 %v126_v34, 0.0  ;;  %v159_v49 = vmax.f32 %v127_v35, 0.0 }
   0xd   :  { %v156_v52 = vmax.f32 %v124_v39, 0.0  ;;  %v157_v53 = vmax.f32 %v125_v40, 0.0  ;;  %v160_v54 = vmax.f32 %v128_v41, 0.0  ;;  %v161_v55 = vmax.f32 %v129_v42, 0.0 }
   0xe   :  { %186 = vst [vmem:[%s523_s3] sm:$0xff] %v154_v46  ;;  %187 = vst [vmem:[%s523_s3 + $0x8] sm:$0xff] %v155_v47  ;;  %v76_v56 = vmul.f32 %v263_v13, %v22_v36  ;;  %v77_v57 = vmul.f32 %v267_v15, %v23_v37  ;;  %v78_v58 = vmul.f32 %v280_v20, %v24_v38  ;;  %v40_v46 = vld [vmem:[%s522_s0 + $0xd0] sm:$0xff] }
   0xf   :  { %190 = vst [vmem:[%s523_s3 + $0x20] sm:$0xff] %v158_v48  ;;  %191 = vst [vmem:[%s523_s3 + $0x28] sm:$0xff] %v159_v49  ;;  %v79_v59 = vmul.f32 %v284_v22, %v25_v43  ;;  %v80_v60 = vmul.f32 %v263_v13, %v26_v44  ;;  %v81_v61 = vmul.f32 %v267_v15, %v27_v45  ;;  %v38_v44 = vld [vmem:[%s522_s0 + $0xc0] sm:$0xff]  ;;  %v39_v45 = vld [vmem:[%s522_s0 + $0xc8] sm:$0xff] }
  0x10   :  { %188 = vst [vmem:[%s523_s3 + $0x10] sm:$0xff] %v156_v52  ;;  %189 = vst [vmem:[%s523_s3 + $0x18] sm:$0xff] %v157_v53  ;;  %v82_v62 = vmul.f32 %v280_v20, %v28_v50  ;;  %v83_v63 = vmul.f32 %v284_v22, %v29_v51  ;;  %v130_v0 = vadd.f32 %v265_v14, %v76_v56  ;;  %v41_v51 = vld [vmem:[%s522_s0 + $0xd8] sm:$0xff]  ;;  %v42_v52 = vld [vmem:[%s522_s0 + $0xe0] sm:$0xff] }
  0x11   :  { %192 = vst [vmem:[%s523_s3 + $0x30] sm:$0xff] %v160_v54  ;;  %193 = vst [vmem:[%s523_s3 + $0x38] sm:$0xff] %v161_v55  ;;  %v131_v1 = vadd.f32 %v269_v16, %v77_v57  ;;  %v132_v2 = vadd.f32 %v282_v21, %v78_v58  ;;  %v133_v3 = vadd.f32 %v286_v23, %v79_v59  ;;  %v43_v53 = vld [vmem:[%s522_s0 + $0xe8] sm:$0xff]  ;;  %v44_v58 = vld [vmem:[%s522_s0 + $0xf0] sm:$0xff] }
  0x12   :  { %v134_v7 = vadd.f32 %v265_v14, %v80_v60  ;;  %v135_v8 = vadd.f32 %v269_v16, %v81_v61  ;;  %v136_v9 = vadd.f32 %v282_v21, %v82_v62  ;;  %v137_v10 = vadd.f32 %v286_v23, %v83_v63  ;;  %v45_v59 = vld [vmem:[%s522_s0 + $0xf8] sm:$0xff] }
  0x13   :  { %v162_v18 = vmax.f32 %v130_v0, 0.0  ;;  %v163_v19 = vmax.f32 %v131_v1, 0.0  ;;  %v164_v24 = vmax.f32 %v132_v2, 0.0  ;;  %v165_v25 = vmax.f32 %v133_v3, 0.0 }
  0x14   :  { %v166_v28 = vmax.f32 %v134_v7, 0.0  ;;  %v167_v29 = vmax.f32 %v135_v8, 0.0  ;;  %v168_v30 = vmax.f32 %v136_v9, 0.0  ;;  %v169_v31 = vmax.f32 %v137_v10, 0.0 }
  0x15   :  { %194 = vst [vmem:[%s523_s3 + $0x40] sm:$0xff] %v162_v18  ;;  %195 = vst [vmem:[%s523_s3 + $0x48] sm:$0xff] %v163_v19  ;;  %v84_v32 = vmul.f32 %v263_v13, %v30_v4  ;;  %v85_v33 = vmul.f32 %v267_v15, %v31_v5  ;;  %v86_v34 = vmul.f32 %v280_v20, %v32_v6 }
  0x16   :  { %196 = vst [vmem:[%s523_s3 + $0x50] sm:$0xff] %v164_v24  ;;  %197 = vst [vmem:[%s523_s3 + $0x58] sm:$0xff] %v165_v25  ;;  %v87_v35 = vmul.f32 %v284_v22, %v33_v11  ;;  %v88_v36 = vmul.f32 %v263_v13, %v34_v12  ;;  %v89_v37 = vmul.f32 %v267_v15, %v35_v17 }
  0x17   :  { %198 = vst [vmem:[%s523_s3 + $0x60] sm:$0xff] %v166_v28  ;;  %199 = vst [vmem:[%s523_s3 + $0x68] sm:$0xff] %v167_v29  ;;  %v90_v38 = vmul.f32 %v280_v20, %v36_v26  ;;  %v91_v39 = vmul.f32 %v284_v22, %v37_v27  ;;  %v138_v40 = vadd.f32 %v265_v14, %v84_v32 }
  0x18   :  { %200 = vst [vmem:[%s523_s3 + $0x70] sm:$0xff] %v168_v30  ;;  %201 = vst [vmem:[%s523_s3 + $0x78] sm:$0xff] %v169_v31  ;;  %v139_v41 = vadd.f32 %v269_v16, %v85_v33  ;;  %v140_v42 = vadd.f32 %v282_v21, %v86_v34  ;;  %v141_v43 = vadd.f32 %v286_v23, %v87_v35 }
  0x19   :  { %v142_v47 = vadd.f32 %v265_v14, %v88_v36  ;;  %v143_v48 = vadd.f32 %v269_v16, %v89_v37  ;;  %v144_v49 = vadd.f32 %v282_v21, %v90_v38  ;;  %v145_v50 = vadd.f32 %v286_v23, %v91_v39 }
  0x1a   :  { %v170_v54 = vmax.f32 %v138_v40, 0.0  ;;  %v171_v55 = vmax.f32 %v139_v41, 0.0  ;;  %v172_v56 = vmax.f32 %v140_v42, 0.0  ;;  %v173_v57 = vmax.f32 %v141_v43, 0.0 }
  0x1b   :  { %v174_v60 = vmax.f32 %v142_v47, 0.0  ;;  %v175_v61 = vmax.f32 %v143_v48, 0.0  ;;  %v176_v62 = vmax.f32 %v144_v49, 0.0  ;;  %v177_v63 = vmax.f32 %v145_v50, 0.0 }
  0x1c   :  { %202 = vst [vmem:[%s523_s3 + $0x80] sm:$0xff] %v170_v54  ;;  %203 = vst [vmem:[%s523_s3 + $0x88] sm:$0xff] %v171_v55  ;;  %v92_v0 = vmul.f32 %v263_v13, %v38_v44  ;;  %v93_v1 = vmul.f32 %v267_v15, %v39_v45  ;;  %v94_v2 = vmul.f32 %v280_v20, %v40_v46 }
  0x1d   :  { %204 = vst [vmem:[%s523_s3 + $0x90] sm:$0xff] %v172_v56  ;;  %205 = vst [vmem:[%s523_s3 + $0x98] sm:$0xff] %v173_v57  ;;  %v95_v3 = vmul.f32 %v284_v22, %v41_v51  ;;  %v96_v4 = vmul.f32 %v263_v13, %v42_v52  ;;  %v97_v5 = vmul.f32 %v267_v15, %v43_v53 }
  0x1e   :  { %206 = vst [vmem:[%s523_s3 + $0xa0] sm:$0xff] %v174_v60  ;;  %207 = vst [vmem:[%s523_s3 + $0xa8] sm:$0xff] %v175_v61  ;;  %v98_v6 = vmul.f32 %v280_v20, %v44_v58  ;;  %v99_v7 = vmul.f32 %v284_v22, %v45_v59  ;;  %v146_v8 = vadd.f32 %v265_v14, %v92_v0 }
  0x1f   :  { %208 = vst [vmem:[%s523_s3 + $0xb0] sm:$0xff] %v176_v62  ;;  %209 = vst [vmem:[%s523_s3 + $0xb8] sm:$0xff] %v177_v63  ;;  %v147_v9 = vadd.f32 %v269_v16, %v93_v1  ;;  %v148_v10 = vadd.f32 %v282_v21, %v94_v2  ;;  %v149_v11 = vadd.f32 %v286_v23, %v95_v3 }
  0x20   :  { %v150_v12 = vadd.f32 %v265_v14, %v96_v4  ;;  %v151_v17 = vadd.f32 %v269_v16, %v97_v5  ;;  %v152_v13 = vadd.f32 %v282_v21, %v98_v6  ;;  %v153_v15 = vadd.f32 %v286_v23, %v99_v7 }
  0x21   :  { %v178_v18 = vmax.f32 %v146_v8, 0.0  ;;  %v179_v20 = vmax.f32 %v147_v9, 0.0  ;;  %v180_v19 = vmax.f32 %v148_v10, 0.0  ;;  %v181_v22 = vmax.f32 %v149_v11, 0.0 }
  0x22   :  { %v182_v24 = vmax.f32 %v150_v12, 0.0  ;;  %v183_v25 = vmax.f32 %v151_v17, 0.0  ;;  %v184_v26 = vmax.f32 %v152_v13, 0.0  ;;  %v185_v27 = vmax.f32 %v153_v15, 0.0 }
  0x23   :  { %210 = vst [vmem:[%s523_s3 + $0xc0] sm:$0xff] %v178_v18  ;;  %211 = vst [vmem:[%s523_s3 + $0xc8] sm:$0xff] %v179_v20 }
  0x24   :  { %212 = vst [vmem:[%s523_s3 + $0xd0] sm:$0xff] %v180_v19  ;;  %213 = vst [vmem:[%s523_s3 + $0xd8] sm:$0xff] %v181_v22 }
  0x25   :  { %214 = vst [vmem:[%s523_s3 + $0xe0] sm:$0xff] %v182_v24  ;;  %215 = vst [vmem:[%s523_s3 + $0xe8] sm:$0xff] %v183_v25 }
  0x26   :  { %216 = vst [vmem:[%s523_s3 + $0xf0] sm:$0xff] %v184_v26  ;;  %217 = vst [vmem:[%s523_s3 + $0xf8] sm:$0xff] %v185_v27 }

// kernel: generator_forward.26
= control target key start
LH: loop header
LB: loop body
LE: loop exit
PB: predicated region body
PF: predicated region fallthrough
CT: control target
= control target key end

     0   :  { %s1231_s9 = smov 0   ;;  %s1233_s10 = smov 0   ;;  %s1467_s0 = inlined_call_operand.vmem [shape: bf16[2048,16], index: 0, kind: input, shape index: {}]   ;;  %s1468_s1 = inlined_call_operand.vmem [shape: bf16[16,16], index: 1, kind: input, shape index: {}]   ;;  %s1469_s2 = inlined_call_operand.vmem [shape: f32[2048,16], index: 2, kind: output, shape index: {}]  }
   0x1   :  { %s1235_s11 = smov 0  }
   0x2 LB: > { %s24_s12 = sadd.s32 1, %s1210_s10  ;;  %p962_p0 = scmp.ge.s32.totalorder %s1214_s11, 1  ;;  %s1214_s11 = sphi %s1235_s11, %s12_s11   ;;  %s1210_s10 = sphi %s1233_s10, %s1471_s10   ;;  %s1206_s9 = sphi %s1231_s9, %s1470_s9  }
   0x3   : > { %p26_p1 = scmp.ge.s32.totalorder %s24_s12, 4  ;;  %p136_p2 = scmp.lt.s32.totalorder %s1214_s11, 5 }
   0x5   : > { %s1473_s12 = smov (%p26_p1, %s24_s12), 0  ;;  %p137_p3 = pnand %p962_p0, %p136_p2 }
   0x6   : > { %v1159_v0 = vld [vmem:[%s1468_s1] sm:$0xff] (!%p137_p3)   ;;  %s963_s15 = sshll.u32 (!%p137_p3), %s1206_s9, 6  ;;  %vm417_vm0 = vcmask (!%p137_p3), 130048  }
   0x7   : > { %140 = sbr.rel (%p137_p3) target bundleno = 292 (0x124), region = 28  ;;  %p166_p4 = scmp.lt.s32.totalorder (!%p137_p3), %s963_s15, 255  ;;  %1067 = vmatprep.subr.bf16.mxu0 (!%p137_p3), %v1159_v0  ;;  %1133 = vmatprep.subr.bf16.mxu1 (!%p137_p3), %v1159_v0 }
   0x8   : > { %1068 = vmatpush3.bf16.msra.mxu0 (!%p137_p3), %v1159_v0  ;;  %1134 = vmatpush3.bf16.msra.mxu1 (!%p137_p3), %v1159_v0 }
   0xe   : > { %s1475_s15 = smov (!%p166_p4, %s963_s15), 255 }
   0xf   : > { %s964_s16 = sshll.u32 %s1475_s15, 2  ;;  %s966_s20 = sshll.u32 %s1475_s15, 3 }
  0x10   : > { %s1258_s19 = scalar_lea.vmem %s1467_s0, %s964_s16  ;;  %s1328_s23 = scalar_lea.vmem %s1469_s2, %s966_s20 }
  0x11   : > { %v1160_v1 = vld [vmem:[%s1258_s19] sm:$0xff]   ;;  %v1162_v3 = vld [vmem:[%s1258_s19 + $0x8] sm:$0xff]   ;;  %v1164_v5 = vld [vmem:[%s1258_s19 + $0x10] sm:$0xff]  }
  0x12   : > { %v1161_v2 = vld [vmem:[%s1258_s19 + $0x80] sm:$0xff]   ;;  %1069 = vmatprep.mubr.msk.bf16.mxu0 %vm417_vm0, %v1160_v1  ;;  %v1163_v4 = vld [vmem:[%s1258_s19 + $0x88] sm:$0xff]   ;;  %v1165_v6 = vld [vmem:[%s1258_s19 + $0x90] sm:$0xff]  }
  0x13   : > { %1101 = vmatprep.mubr.msk.bf16.mxu1 %vm417_vm0, %v1161_v2  ;;  %1070 = vmatmul.mubr.msk.bf16.vlgmr.msra.gmra.mrb[0].mxu0 %vm417_vm0, %v1162_v3  ;;  %v1166_v7 = vld [vmem:[%s1258_s19 + $0x18] sm:$0xff]   ;;  %v1168_v9 = vld [vmem:[%s1258_s19 + $0x20] sm:$0xff]   ;;  %v1170_v11 = vld [vmem:[%s1258_s19 + $0x28] sm:$0xff]  }
  0x14   : > { %1102 = vmatmul.mubr.msk.bf16.vlgmr.msra.gmra.mrb[0].mxu1 %vm417_vm0, %v1163_v4  ;;  %1073 = vmatprep.mubr.msk.bf16.mxu0 %vm417_vm0, %v1164_v5  ;;  %v1167_v8 = vld [vmem:[%s1258_s19 + $0x98] sm:$0xff]   ;;  %v1169_v10 = vld [vmem:[%s1258_s19 + $0xa0] sm:$0xff]   ;;  %v1171_v12 = vld [vmem:[%s1258_s19 + $0xa8] sm:$0xff]  }
  0x15   : > { %1105 = vmatprep.mubr.msk.bf16.mxu1 %vm417_vm0, %v1165_v6  ;;  %v1172_v13 = vld [vmem:[%s1258_s19 + $0x30] sm:$0xff]   ;;  %v1174_v15 = vld [vmem:[%s1258_s19 + $0x38] sm:$0xff]   ;;  %v1176_v17 = vld [vmem:[%s1258_s19 + $0x40] sm:$0xff]  }
  0x16   : > { %v1173_v14 = vld [vmem:[%s1258_s19 + $0xb0] sm:$0xff]   ;;  %v1175_v16 = vld [vmem:[%s1258_s19 + $0xb8] sm:$0xff]   ;;  %v1177_v18 = vld [vmem:[%s1258_s19 + $0xc0] sm:$0xff]  }
  0x17   : > { %v1178_v19 = vld [vmem:[%s1258_s19 + $0x48] sm:$0xff]   ;;  %v1180_v21 = vld [vmem:[%s1258_s19 + $0x50] sm:$0xff]   ;;  %v1182_v23 = vld [vmem:[%s1258_s19 + $0x58] sm:$0xff]  }
  0x18   : > { %v1179_v20 = vld [vmem:[%s1258_s19 + $0xc8] sm:$0xff]   ;;  %v1181_v22 = vld [vmem:[%s1258_s19 + $0xd0] sm:$0xff]   ;;  %v1183_v24 = vld [vmem:[%s1258_s19 + $0xd8] sm:$0xff]  }
  0x19   : > { %v1184_v25 = vld [vmem:[%s1258_s19 + $0x60] sm:$0xff]   ;;  %v1186_v27 = vld [vmem:[%s1258_s19 + $0x68] sm:$0xff]   ;;  %v1188_v29 = vld [vmem:[%s1258_s19 + $0x70] sm:$0xff]  }
  0x1a   : > { %v1185_v26 = vld [vmem:[%s1258_s19 + $0xe0] sm:$0xff]   ;;  %v1187_v28 = vld [vmem:[%s1258_s19 + $0xe8] sm:$0xff]   ;;  %v1189_v30 = vld [vmem:[%s1258_s19 + $0xf0] sm:$0xff]  }
  0x1b   : > { %1074 = vmatmul.mubr.msk.bf16.gmra.mrb[4].mxu0 %vm417_vm0, %v1166_v7  ;;  %v1190_v31 = vld [vmem:[%s1258_s19 + $0x78] sm:$0xff]  }
  0x1c   : > { %1106 = vmatmul.mubr.msk.bf16.gmra.mrb[4].mxu1 %vm417_vm0, %v1167_v8  ;;  %1077 = vmatprep.mubr.msk.bf16.mxu0 %vm417_vm0, %v1168_v9  ;;  %v1191_v32 = vld [vmem:[%s1258_s19 + $0xf8] sm:$0xff]  }
  0x1d   : > { %1109 = vmatprep.mubr.msk.bf16.mxu1 %vm417_vm0, %v1169_v10 }
  0x23   : > { %1078 = vmatmul.mubr.msk.bf16.gmra.mrb[8].mxu0 %vm417_vm0, %v1170_v11 }
  0x24   : > { %1110 = vmatmul.mubr.msk.bf16.gmra.mrb[8].mxu1 %vm417_vm0, %v1171_v12  ;;  %1081 = vmatprep.mubr.msk.bf16.mxu0 %vm417_vm0, %v1172_v13 }
  0x25   : > { %1113 = vmatprep.mubr.msk.bf16.mxu1 %vm417_vm0, %v1173_v14 }
  0x2b   : > { %1082 = vmatmul.mubr.msk.bf16.gmra.mrb[12].mxu0 %vm417_vm0, %v1174_v15 }
  0x2c   : > { %1114 = vmatmul.mubr.msk.bf16.gmra.mrb[12].mxu1 %vm417_vm0, %v1175_v16  ;;  %1085 = vmatprep.mubr.msk.bf16.mxu0 %vm417_vm0, %v1176_v17 }
  0x2d   : > { %1117 = vmatprep.mubr.msk.bf16.mxu1 %vm417_vm0, %v1177_v18 }
  0x33   : > { %1086 = vmatmul.mubr.msk.bf16.gmra.mrb[16].mxu0 %vm417_vm0, %v1178_v19 }
  0x34   : > { %1118 = vmatmul.mubr.msk.bf16.gmra.mrb[16].mxu1 %vm417_vm0, %v1179_v20  ;;  %1089 = vmatprep.mubr.msk.bf16.mxu0 %vm417_vm0, %v1180_v21 }
  0x35   : > { %1121 = vmatprep.mubr.msk.bf16.mxu1 %vm417_vm0, %v1181_v22 }
  0x3b   : > { %1090 = vmatmul.mubr.msk.bf16.gmra.mrb[20].mxu0 %vm417_vm0, %v1182_v23 }
  0x3c   : > { %1122 = vmatmul.mubr.msk.bf16.gmra.mrb[20].mxu1 %vm417_vm0, %v1183_v24  ;;  %1093 = vmatprep.mubr.msk.bf16.mxu0 %vm417_vm0, %v1184_v25 }
  0x3d   : > { %1125 = vmatprep.mubr.msk.bf16.mxu1 %vm417_vm0, %v1185_v26 }
  0x43   : > { %1094 = vmatmul.mubr.msk.bf16.gmra.mrb[24].mxu0 %vm417_vm0, %v1186_v27 }
  0x44   : > { %1126 = vmatmul.mubr.msk.bf16.gmra.mrb[24].mxu1 %vm417_vm0, %v1187_v28  ;;  %1097 = vmatprep.mubr.msk.bf16.mxu0 %vm417_vm0, %v1188_v29 }
  0x45   : > { %1129 = vmatprep.mubr.msk.bf16.mxu1 %vm417_vm0, %v1189_v30 }
  0x4b   : > { %1098 = vmatmul.mubr.msk.bf16.gmra.mrb[28].mxu0 %vm417_vm0, %v1190_v31 }
  0x4c   : > { %1130 = vmatmul.mubr.msk.bf16.gmra.mrb[28].mxu1 %vm417_vm0, %v1191_v32 }
  0xe6   : > { %v1071_v33 = vpop.f32.mrb[0].mxu0 }
  0xe7   : > { %805 = vst.msk [vmem:[%s1328_s23 + $0x10] sm:$0xff] %vm417_vm0, %v1071_v33  ;;  %v1103_v34 = vpop.f32.mrb[0].mxu1  ;;  %v548_v35 = vpop.f32.mrb[1].mxu0 }
  0xe8   : > { %837 = vst.msk [vmem:[%s1328_s23 + $0x110] sm:$0xff] %vm417_vm0, %v1103_v34  ;;  %803 = vst.msk [vmem:[%s1328_s23] sm:$0xff] %vm417_vm0, %v548_v35  ;;  %v676_v36 = vpop.f32.mrb[1].mxu1  ;;  %v1072_v37 = vpop.f32.mrb[2].mxu0 }
  0xe9   : > { %835 = vst.msk [vmem:[%s1328_s23 + $0x100] sm:$0xff] %vm417_vm0, %v676_v36  ;;  %806 = vst.msk [vmem:[%s1328_s23 + $0x18] sm:$0xff] %vm417_vm0, %v1072_v37  ;;  %v1104_v38 = vpop.f32.mrb[2].mxu1  ;;  %v551_v39 = vpop.f32.mrb[3].mxu0 }
  0xea   : > { %838 = vst.msk [vmem:[%s1328_s23 + $0x118] sm:$0xff] %vm417_vm0, %v1104_v38  ;;  %804 = vst.msk [vmem:[%s1328_s23 + $0x8] sm:$0xff] %vm417_vm0, %v551_v39  ;;  %v679_v40 = vpop.f32.mrb[3].mxu1 }
  0xeb   : > { %836 = vst.msk [vmem:[%s1328_s23 + $0x108] sm:$0xff] %vm417_vm0, %v679_v40 }
  0xee   : > { %v1075_v41 = vpop.f32.mrb[4].mxu0 }
  0xef   : > { %809 = vst.msk [vmem:[%s1328_s23 + $0x30] sm:$0xff] %vm417_vm0, %v1075_v41  ;;  %v1107_v42 = vpop.f32.mrb[4].mxu1  ;;  %v564_v43 = vpop.f32.mrb[5].mxu0 }
  0xf0   : > { %841 = vst.msk [vmem:[%s1328_s23 + $0x130] sm:$0xff] %vm417_vm0, %v1107_v42  ;;  %807 = vst.msk [vmem:[%s1328_s23 + $0x20] sm:$0xff] %vm417_vm0, %v564_v43  ;;  %v692_v44 = vpop.f32.mrb[5].mxu1  ;;  %v1076_v45 = vpop.f32.mrb[6].mxu0 }
  0xf1   : > { %839 = vst.msk [vmem:[%s1328_s23 + $0x120] sm:$0xff] %vm417_vm0, %v692_v44  ;;  %810 = vst.msk [vmem:[%s1328_s23 + $0x38] sm:$0xff] %vm417_vm0, %v1076_v45  ;;  %v1108_v46 = vpop.f32.mrb[6].mxu1  ;;  %v567_v47 = vpop.f32.mrb[7].mxu0 }
  0xf2   : > { %842 = vst.msk [vmem:[%s1328_s23 + $0x138] sm:$0xff] %vm417_vm0, %v1108_v46  ;;  %808 = vst.msk [vmem:[%s1328_s23 + $0x28] sm:$0xff] %vm417_vm0, %v567_v47  ;;  %v695_v48 = vpop.f32.mrb[7].mxu1 }
  0xf3   : > { %840 = vst.msk [vmem:[%s1328_s23 + $0x128] sm:$0xff] %vm417_vm0, %v695_v48 }
  0xf6   : > { %v1079_v49 = vpop.f32.mrb[8].mxu0 }
  0xf7   : > { %813 = vst.msk [vmem:[%s1328_s23 + $0x50] sm:$0xff] %vm417_vm0, %v1079_v49  ;;  %v1111_v50 = vpop.f32.mrb[8].mxu1  ;;  %v580_v51 = vpop.f32.mrb[9].mxu0 }
  0xf8   : > { %845 = vst.msk [vmem:[%s1328_s23 + $0x150] sm:$0xff] %vm417_vm0, %v1111_v50  ;;  %811 = vst.msk [vmem:[%s1328_s23 + $0x40] sm:$0xff] %vm417_vm0, %v580_v51  ;;  %v708_v52 = vpop.f32.mrb[9].mxu1  ;;  %v1080_v53 = vpop.f32.mrb[10].mxu0 }
  0xf9   : > { %843 = vst.msk [vmem:[%s1328_s23 + $0x140] sm:$0xff] %vm417_vm0, %v708_v52  ;;  %814 = vst.msk [vmem:[%s1328_s23 + $0x58] sm:$0xff] %vm417_vm0, %v1080_v53  ;;  %v1112_v54 = vpop.f32.mrb[10].mxu1  ;;  %v583_v55 = vpop.f32.mrb[11].mxu0 }
  0xfa   : > { %846 = vst.msk [vmem:[%s1328_s23 + $0x158] sm:$0xff] %vm417_vm0, %v1112_v54  ;;  %812 = vst.msk [vmem:[%s1328_s23 + $0x48] sm:$0xff] %vm417_vm0, %v583_v55  ;;  %v711_v56 = vpop.f32.mrb[11].mxu1 }
  0xfb   : > { %844 = vst.msk [vmem:[%s1328_s23 + $0x148] sm:$0xff] %vm417_vm0, %v711_v56 }
  0xfe   : > { %v1083_v57 = vpop.f32.mrb[12].mxu0 }
  0xff   : > { %817 = vst.msk [vmem:[%s1328_s23 + $0x70] sm:$0xff] %vm417_vm0, %v1083_v57  ;;  %v1115_v58 = vpop.f32.mrb[12].mxu1  ;;  %v596_v59 = vpop.f32.mrb[13].mxu0 }
 0x100   : > { %849 = vst.msk [vmem:[%s1328_s23 + $0x170] sm:$0xff] %vm417_vm0, %v1115_v58  ;;  %815 = vst.msk [vmem:[%s1328_s23 + $0x60] sm:$0xff] %vm417_vm0, %v596_v59  ;;  %v724_v60 = vpop.f32.mrb[13].mxu1  ;;  %v1084_v61 = vpop.f32.mrb[14].mxu0 }
 0x101   : > { %847 = vst.msk [vmem:[%s1328_s23 + $0x160] sm:$0xff] %vm417_vm0, %v724_v60  ;;  %818 = vst.msk [vmem:[%s1328_s23 + $0x78] sm:$0xff] %vm417_vm0, %v1084_v61  ;;  %v1116_v62 = vpop.f32.mrb[14].mxu1  ;;  %v599_v63 = vpop.f32.mrb[15].mxu0 }
 0x102   : > { %850 = vst.msk [vmem:[%s1328_s23 + $0x178] sm:$0xff] %vm417_vm0, %v1116_v62  ;;  %816 = vst.msk [vmem:[%s1328_s23 + $0x68] sm:$0xff] %vm417_vm0, %v599_v63  ;;  %v727_v0 = vpop.f32.mrb[15].mxu1 }
 0x103   : > { %848 = vst.msk [vmem:[%s1328_s23 + $0x168] sm:$0xff] %vm417_vm0, %v727_v0 }
 0x106   : > { %v1087_v1 = vpop.f32.mrb[16].mxu0 }
 0x107   : > { %821 = vst.msk [vmem:[%s1328_s23 + $0x90] sm:$0xff] %vm417_vm0, %v1087_v1  ;;  %v1119_v2 = vpop.f32.mrb[16].mxu1  ;;  %v612_v3 = vpop.f32.mrb[17].mxu0 }
 0x108   : > { %853 = vst.msk [vmem:[%s1328_s23 + $0x190] sm:$0xff] %vm417_vm0, %v1119_v2  ;;  %819 = vst.msk [vmem:[%s1328_s23 + $0x80] sm:$0xff] %vm417_vm0, %v612_v3  ;;  %v740_v4 = vpop.f32.mrb[17].mxu1  ;;  %v1088_v5 = vpop.f32.mrb[18].mxu0 }
 0x109   : > { %851 = vst.msk [vmem:[%s1328_s23 + $0x180] sm:$0xff] %vm417_vm0, %v740_v4  ;;  %822 = vst.msk [vmem:[%s1328_s23 + $0x98] sm:$0xff] %vm417_vm0, %v1088_v5  ;;  %v1120_v6 = vpop.f32.mrb[18].mxu1  ;;  %v615_v7 = vpop.f32.mrb[19].mxu0 }
 0x10a   : > { %854 = vst.msk [vmem:[%s1328_s23 + $0x198] sm:$0xff] %vm417_vm0, %v1120_v6  ;;  %820 = vst.msk [vmem:[%s1328_s23 + $0x88] sm:$0xff] %vm417_vm0, %v615_v7  ;;  %v743_v8 = vpop.f32.mrb[19].mxu1 }
 0x10b   : > { %852 = vst.msk [vmem:[%s1328_s23 + $0x188] sm:$0xff] %vm417_vm0, %v743_v8 }
 0x10e   : > { %v1091_v9 = vpop.f32.mrb[20].mxu0 }
 0x10f   : > { %825 = vst.msk [vmem:[%s1328_s23 + $0xb0] sm:$0xff] %vm417_vm0, %v1091_v9  ;;  %v1123_v10 = vpop.f32.mrb[20].mxu1  ;;  %v628_v11 = vpop.f32.mrb[21].mxu0 }
 0x110   : > { %857 = vst.msk [vmem:[%s1328_s23 + $0x1b0] sm:$0xff] %vm417_vm0, %v1123_v10  ;;  %823 = vst.msk [vmem:[%s1328_s23 + $0xa0] sm:$0xff] %vm417_vm0, %v628_v11  ;;  %v756_v12 = vpop.f32.mrb[21].mxu1  ;;  %v1092_v13 = vpop.f32.mrb[22].mxu0 }
 0x111   : > { %855 = vst.msk [vmem:[%s1328_s23 + $0x1a0] sm:$0xff] %vm417_vm0, %v756_v12  ;;  %826 = vst.msk [vmem:[%s1328_s23 + $0xb8] sm:$0xff] %vm417_vm0, %v1092_v13  ;;  %v1124_v14 = vpop.f32.mrb[22].mxu1  ;;  %v631_v15 = vpop.f32.mrb[23].mxu0 }
 0x112   : > { %858 = vst.msk [vmem:[%s1328_s23 + $0x1b8] sm:$0xff] %vm417_vm0, %v1124_v14  ;;  %824 = vst.msk [vmem:[%s1328_s23 + $0xa8] sm:$0xff] %vm417_vm0, %v631_v15  ;;  %v759_v16 = vpop.f32.mrb[23].mxu1 }
 0x113   : > { %856 = vst.msk [vmem:[%s1328_s23 + $0x1a8] sm:$0xff] %vm417_vm0, %v759_v16 }
 0x116   : > { %v1095_v17 = vpop.f32.mrb[24].mxu0 }
 0x117   : > { %829 = vst.msk [vmem:[%s1328_s23 + $0xd0] sm:$0xff] %vm417_vm0, %v1095_v17  ;;  %v1127_v18 = vpop.f32.mrb[24].mxu1  ;;  %v644_v19 = vpop.f32.mrb[25].mxu0 }
 0x118   : > { %861 = vst.msk [vmem:[%s1328_s23 + $0x1d0] sm:$0xff] %vm417_vm0, %v1127_v18  ;;  %827 = vst.msk [vmem:[%s1328_s23 + $0xc0] sm:$0xff] %vm417_vm0, %v644_v19  ;;  %v772_v20 = vpop.f32.mrb[25].mxu1  ;;  %v1096_v21 = vpop.f32.mrb[26].mxu0 }
 0x119   : > { %859 = vst.msk [vmem:[%s1328_s23 + $0x1c0] sm:$0xff] %vm417_vm0, %v772_v20  ;;  %830 = vst.msk [vmem:[%s1328_s23 + $0xd8] sm:$0xff] %vm417_vm0, %v1096_v21  ;;  %v1128_v22 = vpop.f32.mrb[26].mxu1  ;;  %v647_v23 = vpop.f32.mrb[27].mxu0 }
 0x11a   : > { %862 = vst.msk [vmem:[%s1328_s23 + $0x1d8] sm:$0xff] %vm417_vm0, %v1128_v22  ;;  %828 = vst.msk [vmem:[%s1328_s23 + $0xc8] sm:$0xff] %vm417_vm0, %v647_v23  ;;  %v775_v24 = vpop.f32.mrb[27].mxu1 }
 0x11b   : > { %860 = vst.msk [vmem:[%s1328_s23 + $0x1c8] sm:$0xff] %vm417_vm0, %v775_v24 }
 0x11e   : > { %v1099_v25 = vpop.f32.mrb[28].mxu0 }
 0x11f   : > { %833 = vst.msk [vmem:[%s1328_s23 + $0xf0] sm:$0xff] %vm417_vm0, %v1099_v25  ;;  %v1131_v26 = vpop.f32.mrb[28].mxu1  ;;  %v660_v27 = vpop.f32.mrb[29].mxu0 }
 0x120   : > { %865 = vst.msk [vmem:[%s1328_s23 + $0x1f0] sm:$0xff] %vm417_vm0, %v1131_v26  ;;  %831 = vst.msk [vmem:[%s1328_s23 + $0xe0] sm:$0xff] %vm417_vm0, %v660_v27  ;;  %v788_v28 = vpop.f32.mrb[29].mxu1  ;;  %v1100_v29 = vpop.f32.mrb[30].mxu0 }
 0x121   : > { %863 = vst.msk [vmem:[%s1328_s23 + $0x1e0] sm:$0xff] %vm417_vm0, %v788_v28  ;;  %834 = vst.msk [vmem:[%s1328_s23 + $0xf8] sm:$0xff] %vm417_vm0, %v1100_v29  ;;  %v1132_v30 = vpop.f32.mrb[30].mxu1  ;;  %v663_v31 = vpop.f32.mrb[31].mxu0 }
 0x122   : > { %866 = vst.msk [vmem:[%s1328_s23 + $0x1f8] sm:$0xff] %vm417_vm0, %v1132_v30  ;;  %832 = vst.msk [vmem:[%s1328_s23 + $0xe8] sm:$0xff] %vm417_vm0, %v663_v31  ;;  %v791_v32 = vpop.f32.mrb[31].mxu1 }
 0x123   : > { %864 = vst.msk [vmem:[%s1328_s23 + $0x1e8] sm:$0xff] %vm417_vm0, %v791_v32 }
 0x124 PF: > { %s12_s11 = sadd.s32 1, %s1214_s11   ;;  %s1470_s9 = smov %s1210_s10 }
 0x125   : > { %p9_p5 = scmp.ge.s32.totalorder %s12_s11, 6   ;;  %s1471_s10 = smov %s1473_s12 }
 0x127   :  { %11 = sbr.rel (!%p9_p5) target bundleno = 2 (0x2), region = 61 }

// kernel: generator_forward.27
= control target key start
LH: loop header
LB: loop body
LE: loop exit
PB: predicated region body
PF: predicated region fallthrough
CT: control target
= control target key end

     0   :  { %v24_v0 = vlaneseq  ;;  %s256_s1 = inlined_call_operand.vmem [shape: f32[1,512], index: 1, kind: input, shape index: {}]   ;;  %s257_s2 = inlined_call_operand.vmem [shape: f32[1,512], index: 2, kind: input, shape index: {}]   ;;  %s258_s0 = inlined_call_operand.vmem [shape: f32[16,512], index: 0, kind: input, shape index: {}]   ;;  %s259_s3 = inlined_call_operand.vmem [shape: f32[16,512], index: 3, kind: output, shape index: {}]  }
   0x1   :  { %v22_v2 = vld [vmem:[%s256_s1] sm:$0xf]  ;;  %v15_v6 = vld [vmem:[%s258_s0 + $0x8] sm:$0xff]  ;;  %v16_v10 = vld [vmem:[%s258_s0 + $0x10] sm:$0xff] }
   0x2   :  { %v25_v1 = vshrl.u32 %v24_v0, 7  ;;  %v52_v3 = vld [vmem:[%s257_s2] sm:$0xf]  ;;  %v19_v12 = vld [vmem:[%s258_s0 + $0x28] sm:$0xff]  ;;  %v17_v17 = vld [vmem:[%s258_s0 + $0x18] sm:$0xff] }
   0x3   :  { %v14_v4 = vld [vmem:[%s258_s0] sm:$0xff]  ;;  %v20_v18 = vld [vmem:[%s258_s0 + $0x30] sm:$0xff]  ;;  %v21_v19 = vld [vmem:[%s258_s0 + $0x38] sm:$0xff] }
   0x4   :  { %v26_v5 = vsub.s32 0, %v25_v1  ;;  %v30_v7 = vsub.s32 1, %v25_v1  ;;  %v34_v8 = vsub.s32 2, %v25_v1  ;;  %v38_v9 = vsub.s32 3, %v25_v1  ;;  %v18_v11 = vld [vmem:[%s258_s0 + $0x20] sm:$0xff] }
   0x6   :  { %v27_v13 = vrot.slane %v22_v2, %v26_v5  ;;  %v57_v14 = vrot.slane %v52_v3, %v26_v5  ;;  %v31_v15 = vrot.slane %v22_v2, %v30_v7  ;;  %v61_v16 = vrot.slane %v52_v3, %v30_v7 }
   0x7   :  { %v35_v20 = vrot.slane %v22_v2, %v34_v8  ;;  %v65_v21 = vrot.slane %v52_v3, %v34_v8  ;;  %v39_v22 = vrot.slane %v22_v2, %v38_v9  ;;  %v69_v23 = vrot.slane %v52_v3, %v38_v9 }
   0x8   :  { %v44_v24 = vmul.f32 %v27_v13, %v14_v4  ;;  %v45_v25 = vmul.f32 %v31_v15, %v15_v6  ;;  %v48_v26 = vmul.f32 %v27_v13, %v18_v11  ;;  %v49_v27 = vmul.f32 %v31_v15, %v19_v12 }
   0x9   :  { %v46_v28 = vmul.f32 %v35_v20, %v16_v10  ;;  %v47_v29 = vmul.f32 %v39_v22, %v17_v17  ;;  %v50_v30 = vmul.f32 %v35_v20, %v20_v18  ;;  %v51_v31 = vmul.f32 %v39_v22, %v21_v19 }
   0xa   :  { %v74_v32 = vadd.f32 %v57_v14, %v44_v24  ;;  %v75_v33 = vadd.f32 %v61_v16, %v45_v25  ;;  %v78_v34 = vadd.f32 %v57_v14, %v48_v26  ;;  %v79_v37 = vadd.f32 %v61_v16, %v49_v27 }
   0xb   :  { %v76_v35 = vadd.f32 %v65_v21, %v46_v28  ;;  %v77_v36 = vadd.f32 %v69_v23, %v47_v29  ;;  %v80_v40 = vadd.f32 %v65_v21, %v50_v30  ;;  %v81_v43 = vadd.f32 %v69_v23, %v51_v31 }
   0xc   :  { %v142_v38 = vmul.f32 -1.442695, %v74_v32  ;;  %v143_v39 = vmul.f32 -1.442695, %v75_v33  ;;  %v146_v44 = vmul.f32 -1.442695, %v78_v34 }
   0xd   :  { %v144_v41 = vmul.f32 -1.442695, %v76_v35  ;;  %v145_v42 = vmul.f32 -1.442695, %v77_v36  ;;  %v147_v45 = vmul.f32 -1.442695, %v79_v37 }
   0xe   :  { %150 = vpow2.f32 %v142_v38  ;;  %v148_v46 = vmul.f32 -1.442695, %v80_v40  ;;  %v149_v47 = vmul.f32 -1.442695, %v81_v43 }
   0xf   :  { %152 = vpow2.f32 %v143_v39 }
  0x10   :  { %154 = vpow2.f32 %v144_v41 }
  0x11   :  { %156 = vpow2.f32 %v145_v42 }
  0x12   :  { %158 = vpow2.f32 %v146_v44 }
  0x13   :  { %160 = vpow2.f32 %v147_v45 }
  0x14   :  { %162 = vpow2.f32 %v148_v46 }
  0x15   :  { %164 = vpow2.f32 %v149_v47 }
  0x18   :  { %v151_v48 = vpop.eup %150 }
  0x19   :  { %v153_v49 = vpop.eup %152  ;;  %v106_v50 = vadd.f32 1.0, %v151_v48 }
  0x1a   :  { %v155_v51 = vpop.eup %154  ;;  %v107_v52 = vadd.f32 1.0, %v153_v49 }
  0x1b   :  { %v157_v53 = vpop.eup %156  ;;  %166 = vrcp.f32 %v106_v50  ;;  %v108_v54 = vadd.f32 1.0, %v155_v51 }
  0x1c   :  { %v159_v55 = vpop.eup %158  ;;  %168 = vrcp.f32 %v107_v52  ;;  %v109_v56 = vadd.f32 1.0, %v157_v53 }
  0x1d   :  { %v161_v57 = vpop.eup %160  ;;  %170 = vrcp.f32 %v108_v54  ;;  %v110_v58 = vadd.f32 1.0, %v159_v55 }
  0x1e   :  { %v163_v59 = vpop.eup %162  ;;  %172 = vrcp.f32 %v109_v56  ;;  %v111_v60 = vadd.f32 1.0, %v161_v57 }
  0x1f   :  { %v165_v61 = vpop.eup %164  ;;  %174 = vrcp.f32 %v110_v58  ;;  %v112_v62 = vadd.f32 1.0, %v163_v59 }
  0x20   :  { %176 = vrcp.f32 %v111_v60  ;;  %v113_v63 = vadd.f32 1.0, %v165_v61 }
  0x21   :  { %178 = vrcp.f32 %v112_v62 }
  0x22   :  { %180 = vrcp.f32 %v113_v63 }
  0x25   :  { %v167_v0 = vpop.eup %166 }
  0x26   :  { %v169_v1 = vpop.eup %168  ;;  %130 = vst [vmem:[%s259_s3] sm:$0xff] %v167_v0 }
  0x27   :  { %v171_v2 = vpop.eup %170  ;;  %131 = vst [vmem:[%s259_s3 + $0x8] sm:$0xff] %v169_v1 }
  0x28   :  { %v173_v3 = vpop.eup %172  ;;  %132 = vst [vmem:[%s259_s3 + $0x10] sm:$0xff] %v171_v2 }
  0x29   :  { %v175_v4 = vpop.eup %174  ;;  %133 = vst [vmem:[%s259_s3 + $0x18] sm:$0xff] %v173_v3 }
  0x2a   :  { %v177_v5 = vpop.eup %176  ;;  %134 = vst [vmem:[%s259_s3 + $0x20] sm:$0xff] %v175_v4 }
  0x2b   :  { %v179_v6 = vpop.eup %178  ;;  %135 = vst [vmem:[%s259_s3 + $0x28] sm:$0xff] %v177_v5 }
  0x2c   :  { %v181_v7 = vpop.eup %180  ;;  %136 = vst [vmem:[%s259_s3 + $0x30] sm:$0xff] %v179_v6 }
  0x2d   :  { %137 = vst [vmem:[%s259_s3 + $0x38] sm:$0xff] %v181_v7 }

</bundles_post_ra>
